<compile_context>
chip_gen: v5e
topology: v5e:2x2
jax: 0.10.0
libtpu: 0.0.40
codegen_flags: <defaults>
</compile_context>

<pallas_src>
import functools

import jax
import jax.numpy as jnp
from jax.experimental import pallas as pl
from jax.experimental.pallas import tpu as pltpu


# ----------------------------- in-kernel helpers --------------------------- #

def _group_norm(x, gamma, beta, mg, eps):
    """GroupNorm over a per-sample [N, C] tile.

    Group statistics are computed with matmuls against a one-hot channel->group
    matrix `mg` [C, G] (no in-kernel reshapes).  Centered two-pass variance in f32.
    """
    n, c = x.shape
    g = mg.shape[-1]
    inv_count = 1.0 / float(n * (c // g))
    s1 = jnp.sum(x, axis=0, keepdims=True)                                   # [1, C]
    mean_g = jnp.dot(s1, mg, preferred_element_type=jnp.float32) * inv_count  # [1, G]
    mean_c = jnp.dot(mean_g, mg.T, preferred_element_type=jnp.float32)        # [1, C]
    xc = x - mean_c
    s2 = jnp.sum(xc * xc, axis=0, keepdims=True)                              # [1, C]
    var_g = jnp.dot(s2, mg, preferred_element_type=jnp.float32) * inv_count   # [1, G]
    var_c = jnp.dot(var_g, mg.T, preferred_element_type=jnp.float32)          # [1, C]
    inv = jax.lax.rsqrt(var_c + eps)
    return xc * inv * gamma.astype(jnp.float32) + beta.astype(jnp.float32)


def _conv3x3(buf_ref, w_ref, bias, HW, W, pad, not_first_col, not_last_col):
    """3x3 / stride 1 / pad 1 conv as 9 shifted MXU matmuls.

    buf_ref: zero-padded VMEM scratch [HW + 2*(W+1), Cin] f32, activations stored
             at rows [pad, pad + HW).  For tap (dy, dx) the input needed by output
             row r is buf[pad + r + (dy-1)*W + (dx-1)]; rows that wrap across an
             image column boundary are zeroed with the 0/1 column masks.
    w_ref:   [9, Cin, Cout] bf16 weights (k = dy*3 + dx).
    """
    cout = w_ref.shape[-1]
    acc = jnp.zeros((HW, cout), jnp.float32)
    for dy in range(3):
        for dx in range(3):
            ox = dx - 1
            s = (dy - 1) * W + ox
            patch = buf_ref[pad + s:pad + s + HW, :]          # [HW, Cin] f32
            if ox == 1:
                patch = patch * not_last_col
            elif ox == -1:
                patch = patch * not_first_col
            acc = acc + jnp.dot(patch.astype(jnp.bfloat16), w_ref[dy * 3 + dx],
                                preferred_element_type=jnp.float32)
    return acc + bias


# ----------------------------- kernels ------------------------------------- #

def _resblock_kernel(*refs, H, W, eps, has_shortcut):
    if has_shortcut:
        (x_ref, nf_ref, nl_ref, g1_ref, b1_ref, mg1_ref, w1_ref, cb1_ref,
         g2_ref, b2_ref, mg2_ref, tc_ref, w2_ref, cb2_ref,
         sw_ref, sb_ref, o_ref, buf1_ref, buf2_ref) = refs
    else:
        (x_ref, nf_ref, nl_ref, g1_ref, b1_ref, mg1_ref, w1_ref, cb1_ref,
         g2_ref, b2_ref, mg2_ref, tc_ref, w2_ref, cb2_ref,
         o_ref, buf1_ref, buf2_ref) = refs
        sw_ref = sb_ref = None

    HW = H * W
    pad = W + 1
    x = x_ref[0].astype(jnp.float32)                    # [HW, Cin]
    nf = nf_ref[...]                                    # [HW, 1] 0/1, not-first-column
    nl = nl_ref[...]                                    # [HW, 1] 0/1, not-last-column

    # --- GroupNorm1 + SiLU (fused) ---
    h = _group_norm(x, g1_ref[...], b1_ref[...], mg1_ref[...], eps)
    h = h * jax.nn.sigmoid(h)

    # --- conv1: zero-padded VMEM scratch + 9 shifted bf16 MXU matmuls ---
    buf1_ref[...] = jnp.zeros_like(buf1_ref)
    buf1_ref[pad:pad + HW, :] = h
    h = _conv3x3(buf1_ref, w1_ref, cb1_ref[...].astype(jnp.float32), HW, W, pad, nf, nl)

    # --- GroupNorm2, FiLM modulation with (t, c) embeddings, SiLU (act2) ---
    h = _group_norm(h, g2_ref[...], b2_ref[...], mg2_ref[...], eps)
    tc = tc_ref[0].astype(jnp.float32)                  # [2, Cout]: row 0 = t, row 1 = c
    h = tc[0:1, :] * h + tc[1:2, :]
    h = h * jax.nn.sigmoid(h)
    # TODO(synk): nn.Dropout inside conv2 is stochastic; treated as identity (eval mode).

    # --- conv2 ---
    buf2_ref[...] = jnp.zeros_like(buf2_ref)
    buf2_ref[pad:pad + HW, :] = h
    h = _conv3x3(buf2_ref, w2_ref, cb2_ref[...].astype(jnp.float32), HW, W, pad, nf, nl)

    # --- shortcut (1x1 conv when Cin != Cout, else identity) + residual (f32) ---
    if has_shortcut:
        sc = jnp.dot(x.astype(jnp.bfloat16), sw_ref[...],
                     preferred_element_type=jnp.float32)
        sc = sc + sb_ref[...].astype(jnp.float32)
    else:
        sc = x
    o_ref[0] = (h + sc).astype(o_ref.dtype)


def _attnblock_kernel(r_ref, g_ref, b_ref, mg_ref,
                      wq_ref, bq_ref, wk_ref, bk_ref, wv_ref, bv_ref,
                      wo_ref, bo_ref, o_ref, *, eps, scale):
    r = r_ref[0].astype(jnp.float32)                    # [N, C]
    h = _group_norm(r, g_ref[...], b_ref[...], mg_ref[...], eps)
    hb = h.astype(jnp.bfloat16)

    q = jnp.dot(hb, wq_ref[...], preferred_element_type=jnp.float32) \
        + bq_ref[...].astype(jnp.float32)
    k = jnp.dot(hb, wk_ref[...], preferred_element_type=jnp.float32) \
        + bk_ref[...].astype(jnp.float32)
    v = jnp.dot(hb, wv_ref[...], preferred_element_type=jnp.float32) \
        + bv_ref[...].astype(jnp.float32)

    # scores = q k^T * scale  (rhs-transposed matmul; no explicit transpose op)
    s = jax.lax.dot_general(q.astype(jnp.bfloat16), k.astype(jnp.bfloat16),
                            (((1,), (1,)), ((), ())),
                            preferred_element_type=jnp.float32) * scale
    s = s - jnp.max(s, axis=-1, keepdims=True)
    prob = jnp.exp(s)
    prob = prob * pl.reciprocal(jnp.sum(prob, axis=-1, keepdims=True), approx=True)

    att = jnp.dot(prob.astype(jnp.bfloat16), v.astype(jnp.bfloat16),
                  preferred_element_type=jnp.float32)
    out = jnp.dot(att.astype(jnp.bfloat16), wo_ref[...],
                  preferred_element_type=jnp.float32) + bo_ref[...].astype(jnp.float32)
    o_ref[0] = (out + r).astype(o_ref.dtype)
    # TODO(synk): for large N (e.g. v7x diffusion resolutions, HW >= 4096) switch to a
    # KV-tiled flash-style online-softmax loop; full [N, N] scores are fine at small N.


# ----------------------------- wrappers ------------------------------------ #

def _sample_spec(shape):
    rest = tuple(shape[1:])
    zeros = (0,) * len(rest)
    return pl.BlockSpec((1,) + rest, lambda b: (b,) + zeros)


def _const_spec(shape):
    shape = tuple(shape)
    zeros = (0,) * len(shape)
    return pl.BlockSpec(shape, lambda b: zeros)


def _group_map(C, G):
    cpg = C // G
    return (jnp.arange(C)[:, None] // cpg == jnp.arange(G)[None, :]).astype(jnp.float32)


_PARALLEL = pltpu.CompilerParams(dimension_semantics=("parallel",))


def residual_block(x_seq, temb, cemb, p, *, H, W, num_groups, eps=1e-5):
    """Fused ResidualBlock forward: x_seq [B, H*W, Cin] -> [B, H*W, Cout]."""
    B, HW, Cin = x_seq.shape
    Cout = p["conv1_b"].shape[0]

    mg1 = _group_map(Cin, num_groups)
    mg2 = _group_map(Cout, num_groups)
    w1 = p["conv1_w"].reshape(9, Cin, Cout).astype(jnp.bfloat16)
    w2 = p["conv2_w"].reshape(9, Cout, Cout).astype(jnp.bfloat16)
    tc = jnp.stack([temb, cemb], axis=1).astype(jnp.float32)          # [B, 2, Cout]

    col = jnp.arange(HW, dtype=jnp.int32) % W
    nf = (col != 0).astype(jnp.float32).reshape(HW, 1)                # not first column
    nl = (col != W - 1).astype(jnp.float32).reshape(HW, 1)            # not last column

    has_shortcut = Cin != Cout

    args = [x_seq, nf, nl,
            p["gn1_g"].reshape(1, Cin), p["gn1_b"].reshape(1, Cin), mg1,
            w1, p["conv1_b"].reshape(1, Cout),
            p["gn2_g"].reshape(1, Cout), p["gn2_b"].reshape(1, Cout), mg2,
            tc, w2, p["conv2_b"].reshape(1, Cout)]
    in_specs = [_sample_spec((B, HW, Cin)), _const_spec((HW, 1)), _const_spec((HW, 1)),
                _const_spec((1, Cin)), _const_spec((1, Cin)),
                _const_spec((Cin, num_groups)),
                _const_spec((9, Cin, Cout)), _const_spec((1, Cout)),
                _const_spec((1, Cout)), _const_spec((1, Cout)),
                _const_spec((Cout, num_groups)),
                _sample_spec((B, 2, Cout)),
                _const_spec((9, Cout, Cout)), _const_spec((1, Cout))]
    if has_shortcut:
        args += [p["short_w"].astype(jnp.bfloat16), p["short_b"].reshape(1, Cout)]
        in_specs += [_const_spec((Cin, Cout)), _const_spec((1, Cout))]

    pad_rows = HW + 2 * (W + 1)
    kern = functools.partial(_resblock_kernel, H=H, W=W, eps=eps,
                             has_shortcut=has_shortcut)
    return pl.pallas_call(
        kern,
        out_shape=jax.ShapeDtypeStruct((B, HW, Cout), x_seq.dtype),
        grid_spec=pltpu.PrefetchScalarGridSpec(
            num_scalar_prefetch=0, grid=(B,),
            in_specs=in_specs,
            out_specs=_sample_spec((B, HW, Cout)),
            scratch_shapes=[pltpu.VMEM((pad_rows, Cin), jnp.float32),
                            pltpu.VMEM((pad_rows, Cout), jnp.float32)]),
        compiler_params=_PARALLEL,
    )(*args)


def attention_block(r_seq, p, *, num_groups, eps=1e-5):
    """Fused AttentionBlock forward (n_heads=1, d_k=C): [B, N, C] -> [B, N, C]."""
    B, N, C = r_seq.shape
    mg = _group_map(C, num_groups)
    scale = float(C) ** -0.5
    wq = p["proj_w"][:, 0 * C:1 * C].astype(jnp.bfloat16)
    wk = p["proj_w"][:, 1 * C:2 * C].astype(jnp.bfloat16)
    wv = p["proj_w"][:, 2 * C:3 * C].astype(jnp.bfloat16)
    bq = p["proj_b"][0 * C:1 * C].reshape(1, C)
    bk = p["proj_b"][1 * C:2 * C].reshape(1, C)
    bv = p["proj_b"][2 * C:3 * C].reshape(1, C)
    wo = p["out_w"].astype(jnp.bfloat16)
    bo = p["out_b"].reshape(1, C)

    args = [r_seq, p["gna_g"].reshape(1, C), p["gna_b"].reshape(1, C), mg,
            wq, bq, wk, bk, wv, bv, wo, bo]
    in_specs = [_sample_spec((B, N, C)),
                _const_spec((1, C)), _const_spec((1, C)), _const_spec((C, num_groups)),
                _const_spec((C, C)), _const_spec((1, C)),
                _const_spec((C, C)), _const_spec((1, C)),
                _const_spec((C, C)), _const_spec((1, C)),
                _const_spec((C, C)), _const_spec((1, C))]
    kern = functools.partial(_attnblock_kernel, eps=eps, scale=scale)
    return pl.pallas_call(
        kern,
        out_shape=jax.ShapeDtypeStruct((B, N, C), r_seq.dtype),
        grid_spec=pltpu.PrefetchScalarGridSpec(
            num_scalar_prefetch=0, grid=(B,),
            in_specs=in_specs,
            out_specs=_sample_spec((B, N, C))),
        compiler_params=_PARALLEL,
    )(*args)


# ----------------------------- ResAttBlock --------------------------------- #

def res_att_block(x, t, c, params, *, num_groups=32, has_attn=True, eps=1e-5):
    """x: [B, Cin, H, W] (NCHW), t/c: [B, time_channels] -> [B, Cout, H, W]."""
    B, Cin, H, W = x.shape
    Cout = params["conv1_b"].shape[0]
    x_seq = jnp.transpose(x, (0, 2, 3, 1)).reshape(B, H * W, Cin)

    # time/class embeddings: SiLU -> Linear.  M=1 per-sample matmuls are pure
    # launch/DMA overhead as kernels, so they run as one batched XLA matmul and
    # are fed per-sample into the fused residual-block kernel.
    temb = jax.nn.silu(t) @ params["time_w"] + params["time_b"]       # [B, Cout]
    cemb = jax.nn.silu(c) @ params["class_w"] + params["class_b"]     # [B, Cout]

    res = residual_block(x_seq, temb, cemb, params, H=H, W=W,
                         num_groups=num_groups, eps=eps)
    if has_attn:
        out_seq = attention_block(res, params, num_groups=num_groups, eps=eps)
    else:
        out_seq = res
    return jnp.transpose(out_seq.reshape(B, H, W, Cout), (0, 3, 1, 2))


# ----------------------------- pure-JAX reference --------------------------- #

def _reference_forward(x, t, c, p, *, num_groups=32, has_attn=True, eps=1e-5):
    hi = jax.lax.Precision.HIGHEST

    def gn(u, g, b):
        B, C, H, W = u.shape
        ug = u.reshape(B, num_groups, C // num_groups, H * W)
        m = ug.mean(axis=(2, 3), keepdims=True)
        v = ug.var(axis=(2, 3), keepdims=True)
        un = ((ug - m) / jnp.sqrt(v + eps)).reshape(B, C, H, W)
        return un * g[None, :, None, None] + b[None, :, None, None]

    def silu(u):
        return u * jax.nn.sigmoid(u)

    def conv3(u, w, b):
        y = jax.lax.conv_general_dilated(
            u.transpose(0, 2, 3, 1), w, (1, 1), ((1, 1), (1, 1)),
            dimension_numbers=("NHWC", "HWIO", "NHWC"), precision=hi)
        return (y + b).transpose(0, 3, 1, 2)

    B, Cin, H, W = x.shape
    Cout = p["conv1_b"].shape[0]

    h = conv3(silu(gn(x, p["gn1_g"], p["gn1_b"])), p["conv1_w"], p["conv1_b"])
    h = gn(h, p["gn2_g"], p["gn2_b"])
    temb = silu(t) @ p["time_w"] + p["time_b"]
    cemb = silu(c) @ p["class_w"] + p["class_b"]
    h = temb[:, :, None, None] * h + cemb[:, :, None, None]
    h = conv3(silu(h), p["conv2_w"], p["conv2_b"])
    if Cin != Cout:
        sc = jnp.einsum("bchw,co->bohw", x, p["short_w"], precision=hi) \
             + p["short_b"][None, :, None, None]
    else:
        sc = x
    res = h + sc
    if not has_attn:
        return res

    ha = gn(res, p["gna_g"], p["gna_b"])
    hseq = ha.reshape(B, Cout, H * W).transpose(0, 2, 1)               # [B, N, C]
    qkv = jnp.einsum("bnc,cd->bnd", hseq, p["proj_w"], precision=hi) + p["proj_b"]
    q, k, v = jnp.split(qkv, 3, axis=-1)
    attn = jax.nn.softmax(
        jnp.einsum("bic,bjc->bij", q, k, precision=hi) * (float(Cout) ** -0.5), axis=-1)
    o = jnp.einsum("bij,bjc->bic", attn, v, precision=hi)
    o = jnp.einsum("bnc,cd->bnd", o, p["out_w"], precision=hi) + p["out_b"]
    o = o.transpose(0, 2, 1).reshape(B, Cout, H, W)
    return o + res


# ----------------------------- params & main -------------------------------- #

def init_params(key, Cin, Cout, Tc):
    ks = jax.random.split(key, 20)

    def w(k, shape, scale=0.05):
        return (scale * jax.random.normal(k, shape)).astype(jnp.float32)

    return {
        "gn1_g": 1.0 + w(ks[0], (Cin,)),  "gn1_b": w(ks[1], (Cin,)),
        "conv1_w": w(ks[2], (3, 3, Cin, Cout)), "conv1_b": w(ks[3], (Cout,)),
        "gn2_g": 1.0 + w(ks[4], (Cout,)), "gn2_b": w(ks[5], (Cout,)),
        "time_w": w(ks[6], (Tc, Cout)),   "time_b": w(ks[7], (Cout,)),
        "class_w": w(ks[8], (Tc, Cout)),  "class_b": w(ks[9], (Cout,)),
        "conv2_w": w(ks[10], (3, 3, Cout, Cout)), "conv2_b": w(ks[11], (Cout,)),
        "short_w": w(ks[12], (Cin, Cout)), "short_b": w(ks[13], (Cout,)),
        "gna_g": 1.0 + w(ks[14], (Cout,)), "gna_b": w(ks[15], (Cout,)),
        "proj_w": w(ks[16], (Cout, 3 * Cout)), "proj_b": w(ks[17], (3 * Cout,)),
        "out_w": w(ks[18], (Cout, Cout)), "out_b": w(ks[19], (Cout,)),
    }


if __name__ == "__main__":
    # GroupNorm(32, C) requires channel counts divisible by 32.
    B, Cin, Cout, H, W, Tc = 2, 32, 64, 8, 8, 32

    key = jax.random.PRNGKey(0)
    kx, kt, kc, kp = jax.random.split(key, 4)
    x = jax.random.normal(kx, (B, Cin, H, W), dtype=jnp.float32)   # NCHW like PyTorch
    t = jax.random.normal(kt, (B, Tc), dtype=jnp.float32)
    c = jax.random.normal(kc, (B, Tc), dtype=jnp.float32)
    params = init_params(kp, Cin, Cout, Tc)

    fwd = jax.jit(functools.partial(res_att_block, num_groups=32, has_attn=True))
    out = jax.block_until_ready(fwd(x, t, c, params))
    assert out.shape == (B, Cout, H, W)
    assert bool(jnp.all(jnp.isfinite(out)))

    # numerical check against a pure-JAX f32 reference of the PyTorch module
    # (tolerance accounts for bf16 MXU operands in the Pallas path).
    ref = _reference_forward(x, t, c, params, num_groups=32, has_attn=True)
    err = float(jnp.max(jnp.abs(out - ref)))
    assert err < 0.15, f"max |pallas - reference| = {err}"
    print("KERNEL_OK")
</pallas_src>

<mosaic_0001>
module attributes {stable_mosaic.version = 11 : i64} {
  func.func @_resblock_kernel(%arg0: i32, %arg1: memref<1x64x32xf32, #tpu.memory_space<vmem>>, %arg2: memref<64x1xf32, #tpu.memory_space<vmem>>, %arg3: memref<64x1xf32, #tpu.memory_space<vmem>>, %arg4: memref<1x32xf32, #tpu.memory_space<vmem>>, %arg5: memref<1x32xf32, #tpu.memory_space<vmem>>, %arg6: memref<32x32xf32, #tpu.memory_space<vmem>>, %arg7: memref<9x32x64xbf16, #tpu.memory_space<vmem>>, %arg8: memref<1x64xf32, #tpu.memory_space<vmem>>, %arg9: memref<1x64xf32, #tpu.memory_space<vmem>>, %arg10: memref<1x64xf32, #tpu.memory_space<vmem>>, %arg11: memref<64x32xf32, #tpu.memory_space<vmem>>, %arg12: memref<1x2x64xf32, #tpu.memory_space<vmem>>, %arg13: memref<9x64x64xbf16, #tpu.memory_space<vmem>>, %arg14: memref<1x64xf32, #tpu.memory_space<vmem>>, %arg15: memref<32x64xbf16, #tpu.memory_space<vmem>>, %arg16: memref<1x64xf32, #tpu.memory_space<vmem>>, %arg17: memref<1x64x64xf32, #tpu.memory_space<vmem>>, %arg18: memref<82x32xf32, #tpu.memory_space<vmem>>, %arg19: memref<82x64xf32, #tpu.memory_space<vmem>>) attributes {dimension_semantics = [#tpu.dimension_semantics<parallel>], iteration_bounds = array<i64: 2>, scalar_prefetch = 0 : i64, scratch_operands = 2 : i64, tpu.core_type = #tpu.core_type<tc>, window_params = [{transform_indices = @transform_0, window_bounds = array<i64: 1, 64, 32>}, {pipeline_mode = #tpu.pipeline_mode<synchronous>, transform_indices = @transform_1, window_bounds = array<i64: 64, 1>}, {pipeline_mode = #tpu.pipeline_mode<synchronous>, transform_indices = @transform_2, window_bounds = array<i64: 64, 1>}, {pipeline_mode = #tpu.pipeline_mode<synchronous>, transform_indices = @transform_3, window_bounds = array<i64: 1, 32>}, {pipeline_mode = #tpu.pipeline_mode<synchronous>, transform_indices = @transform_4, window_bounds = array<i64: 1, 32>}, {pipeline_mode = #tpu.pipeline_mode<synchronous>, transform_indices = @transform_5, window_bounds = array<i64: 32, 32>}, {pipeline_mode = #tpu.pipeline_mode<synchronous>, transform_indices = @transform_6, window_bounds = array<i64: 9, 32, 64>}, {pipeline_mode = #tpu.pipeline_mode<synchronous>, transform_indices = @transform_7, window_bounds = array<i64: 1, 64>}, {pipeline_mode = #tpu.pipeline_mode<synchronous>, transform_indices = @transform_8, window_bounds = array<i64: 1, 64>}, {pipeline_mode = #tpu.pipeline_mode<synchronous>, transform_indices = @transform_9, window_bounds = array<i64: 1, 64>}, {pipeline_mode = #tpu.pipeline_mode<synchronous>, transform_indices = @transform_10, window_bounds = array<i64: 64, 32>}, {transform_indices = @transform_11, window_bounds = array<i64: 1, 2, 64>}, {pipeline_mode = #tpu.pipeline_mode<synchronous>, transform_indices = @transform_12, window_bounds = array<i64: 9, 64, 64>}, {pipeline_mode = #tpu.pipeline_mode<synchronous>, transform_indices = @transform_13, window_bounds = array<i64: 1, 64>}, {pipeline_mode = #tpu.pipeline_mode<synchronous>, transform_indices = @transform_14, window_bounds = array<i64: 32, 64>}, {pipeline_mode = #tpu.pipeline_mode<synchronous>, transform_indices = @transform_15, window_bounds = array<i64: 1, 64>}, {transform_indices = @transform_16, window_bounds = array<i64: 1, 64, 64>}]} {
    %c0 = arith.constant 0 : index
    %c0_0 = arith.constant 0 : index
    %c0_1 = arith.constant 0 : index
    %0 = vector.load %arg1[%c0, %c0_0, %c0_1] : memref<1x64x32xf32, #tpu.memory_space<vmem>>, vector<1x64x32xf32>
    %1 = vector.shape_cast %0 : vector<1x64x32xf32> to vector<64x32xf32>
    %c0_2 = arith.constant 0 : index
    %c0_3 = arith.constant 0 : index
    %2 = vector.load %arg2[%c0_2, %c0_3] : memref<64x1xf32, #tpu.memory_space<vmem>>, vector<64x1xf32>
    %c0_4 = arith.constant 0 : index
    %c0_5 = arith.constant 0 : index
    %3 = vector.load %arg3[%c0_4, %c0_5] : memref<64x1xf32, #tpu.memory_space<vmem>>, vector<64x1xf32>
    %c0_6 = arith.constant 0 : index
    %c0_7 = arith.constant 0 : index
    %4 = vector.load %arg4[%c0_6, %c0_7] : memref<1x32xf32, #tpu.memory_space<vmem>>, vector<1x32xf32>
    %c0_8 = arith.constant 0 : index
    %c0_9 = arith.constant 0 : index
    %5 = vector.load %arg5[%c0_8, %c0_9] : memref<1x32xf32, #tpu.memory_space<vmem>>, vector<1x32xf32>
    %c0_10 = arith.constant 0 : index
    %c0_11 = arith.constant 0 : index
    %6 = vector.load %arg6[%c0_10, %c0_11] : memref<32x32xf32, #tpu.memory_space<vmem>>, vector<32x32xf32>
    %cst = arith.constant dense<0.000000e+00> : vector<32xf32>
    %7 = vector.multi_reduction <add>, %1, %cst [0] : vector<64x32xf32> to vector<32xf32>
    %8 = vector.shape_cast %7 : vector<32xf32> to vector<1x32xf32>
    %cst_12 = arith.constant dense<0.000000e+00> : vector<1x32xf32>
    %9 = tpu.matmul %8, %6, %cst_12 {dimension_numbers = #tpu.dot_dimension_numbers<[1], [0], [0], [1], [0, 0, 1, 1], [], []>} : vector<1x32xf32>, vector<32x32xf32>, vector<1x32xf32> -> vector<1x32xf32>
    %cst_13 = arith.constant 1.562500e-02 : f32
    %10 = vector.broadcast %cst_13 : f32 to vector<1x32xf32>
    %11 = arith.mulf %9, %10 : vector<1x32xf32>
    %12 = tpu.transpose %6, [1, 0] : vector<32x32xf32> -> vector<32x32xf32>
    %cst_14 = arith.constant dense<0.000000e+00> : vector<1x32xf32>
    %13 = tpu.matmul %11, %12, %cst_14 {dimension_numbers = #tpu.dot_dimension_numbers<[1], [0], [0], [1], [0, 0, 1, 1], [], []>} : vector<1x32xf32>, vector<32x32xf32>, vector<1x32xf32> -> vector<1x32xf32>
    %14 = vector.broadcast %13 : vector<1x32xf32> to vector<64x32xf32>
    %15 = arith.subf %1, %14 : vector<64x32xf32>
    %16 = arith.mulf %15, %15 : vector<64x32xf32>
    %cst_15 = arith.constant dense<0.000000e+00> : vector<32xf32>
    %17 = vector.multi_reduction <add>, %16, %cst_15 [0] : vector<64x32xf32> to vector<32xf32>
    %18 = vector.shape_cast %17 : vector<32xf32> to vector<1x32xf32>
    %cst_16 = arith.constant dense<0.000000e+00> : vector<1x32xf32>
    %19 = tpu.matmul %18, %6, %cst_16 {dimension_numbers = #tpu.dot_dimension_numbers<[1], [0], [0], [1], [0, 0, 1, 1], [], []>} : vector<1x32xf32>, vector<32x32xf32>, vector<1x32xf32> -> vector<1x32xf32>
    %cst_17 = arith.constant 1.562500e-02 : f32
    %20 = vector.broadcast %cst_17 : f32 to vector<1x32xf32>
    %21 = arith.mulf %19, %20 : vector<1x32xf32>
    %22 = tpu.transpose %6, [1, 0] : vector<32x32xf32> -> vector<32x32xf32>
    %cst_18 = arith.constant dense<0.000000e+00> : vector<1x32xf32>
    %23 = tpu.matmul %21, %22, %cst_18 {dimension_numbers = #tpu.dot_dimension_numbers<[1], [0], [0], [1], [0, 0, 1, 1], [], []>} : vector<1x32xf32>, vector<32x32xf32>, vector<1x32xf32> -> vector<1x32xf32>
    %cst_19 = arith.constant 9.99999974E-6 : f32
    %24 = vector.broadcast %cst_19 : f32 to vector<1x32xf32>
    %25 = arith.addf %23, %24 : vector<1x32xf32>
    %26 = math.rsqrt %25 : vector<1x32xf32>
    %27 = vector.broadcast %26 : vector<1x32xf32> to vector<64x32xf32>
    %28 = arith.mulf %15, %27 : vector<64x32xf32>
    %29 = vector.broadcast %4 : vector<1x32xf32> to vector<64x32xf32>
    %30 = arith.mulf %28, %29 : vector<64x32xf32>
    %31 = vector.broadcast %5 : vector<1x32xf32> to vector<64x32xf32>
    %32 = arith.addf %30, %31 : vector<64x32xf32>
    %33 = arith.negf %32 : vector<64x32xf32>
    %34 = math.exp %33 : vector<64x32xf32>
    %cst_20 = arith.constant 1.000000e+00 : f32
    %35 = vector.broadcast %cst_20 : f32 to vector<64x32xf32>
    %36 = arith.addf %35, %34 : vector<64x32xf32>
    %37 = arith.divf %35, %36 : vector<64x32xf32>
    %38 = arith.mulf %32, %37 : vector<64x32xf32>
    %cst_21 = arith.constant 0.000000e+00 : f32
    %39 = vector.broadcast %cst_21 : f32 to vector<82x32xf32>
    %c0_22 = arith.constant 0 : index
    %c0_23 = arith.constant 0 : index
    %40 = vector.load %arg18[%c0_22, %c0_23] : memref<82x32xf32, #tpu.memory_space<vmem>>, vector<82x32xf32>
    tpu.vector_store %arg18[%c0_22, %c0_23], %39 {strides = array<i32>} : memref<82x32xf32, #tpu.memory_space<vmem>>, vector<82x32xf32>,
    %c9 = arith.constant 9 : index
    %c0_24 = arith.constant 0 : index
    %41 = vector.load %arg18[%c9, %c0_24] : memref<82x32xf32, #tpu.memory_space<vmem>>, vector<64x32xf32>
    tpu.vector_store %arg18[%c9, %c0_24], %38 {strides = array<i32>} : memref<82x32xf32, #tpu.memory_space<vmem>>, vector<64x32xf32>,
    %c0_25 = arith.constant 0 : index
    %c0_26 = arith.constant 0 : index
    %42 = vector.load %arg8[%c0_25, %c0_26] : memref<1x64xf32, #tpu.memory_space<vmem>>, vector<1x64xf32>
    %cst_27 = arith.constant 0.000000e+00 : f32
    %43 = vector.broadcast %cst_27 : f32 to vector<64x64xf32>
    %c0_28 = arith.constant 0 : index
    %c0_29 = arith.constant 0 : index
    %44 = vector.load %arg18[%c0_28, %c0_29] : memref<82x32xf32, #tpu.memory_space<vmem>>, vector<64x32xf32>
    %45 = vector.broadcast %2 : vector<64x1xf32> to vector<64x32xf32>
    %46 = arith.mulf %44, %45 : vector<64x32xf32>
    %47 = arith.truncf %46 : vector<64x32xf32> to vector<64x32xbf16>
    %c0_30 = arith.constant 0 : index
    %c0_31 = arith.constant 0 : index
    %c0_32 = arith.constant 0 : index
    %48 = vector.load %arg7[%c0_30, %c0_31, %c0_32] : memref<9x32x64xbf16, #tpu.memory_space<vmem>>, vector<1x32x64xbf16>
    %49 = vector.shape_cast %48 : vector<1x32x64xbf16> to vector<32x64xbf16>
    %cst_33 = arith.constant dense<0.000000e+00> : vector<64x64xf32>
    %50 = tpu.matmul %47, %49, %cst_33 {dimension_numbers = #tpu.dot_dimension_numbers<[1], [0], [0], [1], [0, 0, 1, 1], [], []>} : vector<64x32xbf16>, vector<32x64xbf16>, vector<64x64xf32> -> vector<64x64xf32>
    %51 = arith.addf %43, %50 : vector<64x64xf32>
    %c1 = arith.constant 1 : index
    %c0_34 = arith.constant 0 : index
    %52 = vector.load %arg18[%c1, %c0_34] : memref<82x32xf32, #tpu.memory_space<vmem>>, vector<64x32xf32>
    %53 = arith.truncf %52 : vector<64x32xf32> to vector<64x32xbf16>
    %c1_35 = arith.constant 1 : index
    %c0_36 = arith.constant 0 : index
    %c0_37 = arith.constant 0 : index
    %54 = vector.load %arg7[%c1_35, %c0_36, %c0_37] : memref<9x32x64xbf16, #tpu.memory_space<vmem>>, vector<1x32x64xbf16>
    %55 = vector.shape_cast %54 : vector<1x32x64xbf16> to vector<32x64xbf16>
    %cst_38 = arith.constant dense<0.000000e+00> : vector<64x64xf32>
    %56 = tpu.matmul %53, %55, %cst_38 {dimension_numbers = #tpu.dot_dimension_numbers<[1], [0], [0], [1], [0, 0, 1, 1], [], []>} : vector<64x32xbf16>, vector<32x64xbf16>, vector<64x64xf32> -> vector<64x64xf32>
    %57 = arith.addf %51, %56 : vector<64x64xf32>
    %c2 = arith.constant 2 : index
    %c0_39 = arith.constant 0 : index
    %58 = vector.load %arg18[%c2, %c0_39] : memref<82x32xf32, #tpu.memory_space<vmem>>, vector<64x32xf32>
    %59 = vector.broadcast %3 : vector<64x1xf32> to vector<64x32xf32>
    %60 = arith.mulf %58, %59 : vector<64x32xf32>
    %61 = arith.truncf %60 : vector<64x32xf32> to vector<64x32xbf16>
    %c2_40 = arith.constant 2 : index
    %c0_41 = arith.constant 0 : index
    %c0_42 = arith.constant 0 : index
    %62 = vector.load %arg7[%c2_40, %c0_41, %c0_42] : memref<9x32x64xbf16, #tpu.memory_space<vmem>>, vector<1x32x64xbf16>
    %63 = vector.shape_cast %62 : vector<1x32x64xbf16> to vector<32x64xbf16>
    %cst_43 = arith.constant dense<0.000000e+00> : vector<64x64xf32>
    %64 = tpu.matmul %61, %63, %cst_43 {dimension_numbers = #tpu.dot_dimension_numbers<[1], [0], [0], [1], [0, 0, 1, 1], [], []>} : vector<64x32xbf16>, vector<32x64xbf16>, vector<64x64xf32> -> vector<64x64xf32>
    %65 = arith.addf %57, %64 : vector<64x64xf32>
    %c8 = arith.constant 8 : index
    %c0_44 = arith.constant 0 : index
    %66 = vector.load %arg18[%c8, %c0_44] : memref<82x32xf32, #tpu.memory_space<vmem>>, vector<64x32xf32>
    %67 = vector.broadcast %2 : vector<64x1xf32> to vector<64x32xf32>
    %68 = arith.mulf %66, %67 : vector<64x32xf32>
    %69 = arith.truncf %68 : vector<64x32xf32> to vector<64x32xbf16>
    %c3 = arith.constant 3 : index
    %c0_45 = arith.constant 0 : index
    %c0_46 = arith.constant 0 : index
    %70 = vector.load %arg7[%c3, %c0_45, %c0_46] : memref<9x32x64xbf16, #tpu.memory_space<vmem>>, vector<1x32x64xbf16>
    %71 = vector.shape_cast %70 : vector<1x32x64xbf16> to vector<32x64xbf16>
    %cst_47 = arith.constant dense<0.000000e+00> : vector<64x64xf32>
    %72 = tpu.matmul %69, %71, %cst_47 {dimension_numbers = #tpu.dot_dimension_numbers<[1], [0], [0], [1], [0, 0, 1, 1], [], []>} : vector<64x32xbf16>, vector<32x64xbf16>, vector<64x64xf32> -> vector<64x64xf32>
    %73 = arith.addf %65, %72 : vector<64x64xf32>
    %c9_48 = arith.constant 9 : index
    %c0_49 = arith.constant 0 : index
    %74 = vector.load %arg18[%c9_48, %c0_49] : memref<82x32xf32, #tpu.memory_space<vmem>>, vector<64x32xf32>
    %75 = arith.truncf %74 : vector<64x32xf32> to vector<64x32xbf16>
    %c4 = arith.constant 4 : index
    %c0_50 = arith.constant 0 : index
    %c0_51 = arith.constant 0 : index
    %76 = vector.load %arg7[%c4, %c0_50, %c0_51] : memref<9x32x64xbf16, #tpu.memory_space<vmem>>, vector<1x32x64xbf16>
    %77 = vector.shape_cast %76 : vector<1x32x64xbf16> to vector<32x64xbf16>
    %cst_52 = arith.constant dense<0.000000e+00> : vector<64x64xf32>
    %78 = tpu.matmul %75, %77, %cst_52 {dimension_numbers = #tpu.dot_dimension_numbers<[1], [0], [0], [1], [0, 0, 1, 1], [], []>} : vector<64x32xbf16>, vector<32x64xbf16>, vector<64x64xf32> -> vector<64x64xf32>
    %79 = arith.addf %73, %78 : vector<64x64xf32>
    %c10 = arith.constant 10 : index
    %c0_53 = arith.constant 0 : index
    %80 = vector.load %arg18[%c10, %c0_53] : memref<82x32xf32, #tpu.memory_space<vmem>>, vector<64x32xf32>
    %81 = vector.broadcast %3 : vector<64x1xf32> to vector<64x32xf32>
    %82 = arith.mulf %80, %81 : vector<64x32xf32>
    %83 = arith.truncf %82 : vector<64x32xf32> to vector<64x32xbf16>
    %c5 = arith.constant 5 : index
    %c0_54 = arith.constant 0 : index
    %c0_55 = arith.constant 0 : index
    %84 = vector.load %arg7[%c5, %c0_54, %c0_55] : memref<9x32x64xbf16, #tpu.memory_space<vmem>>, vector<1x32x64xbf16>
    %85 = vector.shape_cast %84 : vector<1x32x64xbf16> to vector<32x64xbf16>
    %cst_56 = arith.constant dense<0.000000e+00> : vector<64x64xf32>
    %86 = tpu.matmul %83, %85, %cst_56 {dimension_numbers = #tpu.dot_dimension_numbers<[1], [0], [0], [1], [0, 0, 1, 1], [], []>} : vector<64x32xbf16>, vector<32x64xbf16>, vector<64x64xf32> -> vector<64x64xf32>
    %87 = arith.addf %79, %86 : vector<64x64xf32>
    %c16 = arith.constant 16 : index
    %c0_57 = arith.constant 0 : index
    %88 = vector.load %arg18[%c16, %c0_57] : memref<82x32xf32, #tpu.memory_space<vmem>>, vector<64x32xf32>
    %89 = vector.broadcast %2 : vector<64x1xf32> to vector<64x32xf32>
    %90 = arith.mulf %88, %89 : vector<64x32xf32>
    %91 = arith.truncf %90 : vector<64x32xf32> to vector<64x32xbf16>
    %c6 = arith.constant 6 : index
    %c0_58 = arith.constant 0 : index
    %c0_59 = arith.constant 0 : index
    %92 = vector.load %arg7[%c6, %c0_58, %c0_59] : memref<9x32x64xbf16, #tpu.memory_space<vmem>>, vector<1x32x64xbf16>
    %93 = vector.shape_cast %92 : vector<1x32x64xbf16> to vector<32x64xbf16>
    %cst_60 = arith.constant dense<0.000000e+00> : vector<64x64xf32>
    %94 = tpu.matmul %91, %93, %cst_60 {dimension_numbers = #tpu.dot_dimension_numbers<[1], [0], [0], [1], [0, 0, 1, 1], [], []>} : vector<64x32xbf16>, vector<32x64xbf16>, vector<64x64xf32> -> vector<64x64xf32>
    %95 = arith.addf %87, %94 : vector<64x64xf32>
    %c17 = arith.constant 17 : index
    %c0_61 = arith.constant 0 : index
    %96 = vector.load %arg18[%c17, %c0_61] : memref<82x32xf32, #tpu.memory_space<vmem>>, vector<64x32xf32>
    %97 = arith.truncf %96 : vector<64x32xf32> to vector<64x32xbf16>
    %c7 = arith.constant 7 : index
    %c0_62 = arith.constant 0 : index
    %c0_63 = arith.constant 0 : index
    %98 = vector.load %arg7[%c7, %c0_62, %c0_63] : memref<9x32x64xbf16, #tpu.memory_space<vmem>>, vector<1x32x64xbf16>
    %99 = vector.shape_cast %98 : vector<1x32x64xbf16> to vector<32x64xbf16>
    %cst_64 = arith.constant dense<0.000000e+00> : vector<64x64xf32>
    %100 = tpu.matmul %97, %99, %cst_64 {dimension_numbers = #tpu.dot_dimension_numbers<[1], [0], [0], [1], [0, 0, 1, 1], [], []>} : vector<64x32xbf16>, vector<32x64xbf16>, vector<64x64xf32> -> vector<64x64xf32>
    %101 = arith.addf %95, %100 : vector<64x64xf32>
    %c18 = arith.constant 18 : index
    %c0_65 = arith.constant 0 : index
    %102 = vector.load %arg18[%c18, %c0_65] : memref<82x32xf32, #tpu.memory_space<vmem>>, vector<64x32xf32>
    %103 = vector.broadcast %3 : vector<64x1xf32> to vector<64x32xf32>
    %104 = arith.mulf %102, %103 : vector<64x32xf32>
    %105 = arith.truncf %104 : vector<64x32xf32> to vector<64x32xbf16>
    %c8_66 = arith.constant 8 : index
    %c0_67 = arith.constant 0 : index
    %c0_68 = arith.constant 0 : index
    %106 = vector.load %arg7[%c8_66, %c0_67, %c0_68] : memref<9x32x64xbf16, #tpu.memory_space<vmem>>, vector<1x32x64xbf16>
    %107 = vector.shape_cast %106 : vector<1x32x64xbf16> to vector<32x64xbf16>
    %cst_69 = arith.constant dense<0.000000e+00> : vector<64x64xf32>
    %108 = tpu.matmul %105, %107, %cst_69 {dimension_numbers = #tpu.dot_dimension_numbers<[1], [0], [0], [1], [0, 0, 1, 1], [], []>} : vector<64x32xbf16>, vector<32x64xbf16>, vector<64x64xf32> -> vector<64x64xf32>
    %109 = arith.addf %101, %108 : vector<64x64xf32>
    %110 = vector.broadcast %42 : vector<1x64xf32> to vector<64x64xf32>
    %111 = arith.addf %109, %110 : vector<64x64xf32>
    %c0_70 = arith.constant 0 : index
    %c0_71 = arith.constant 0 : index
    %112 = vector.load %arg9[%c0_70, %c0_71] : memref<1x64xf32, #tpu.memory_space<vmem>>, vector<1x64xf32>
    %c0_72 = arith.constant 0 : index
    %c0_73 = arith.constant 0 : index
    %113 = vector.load %arg10[%c0_72, %c0_73] : memref<1x64xf32, #tpu.memory_space<vmem>>, vector<1x64xf32>
    %c0_74 = arith.constant 0 : index
    %c0_75 = arith.constant 0 : index
    %114 = vector.load %arg11[%c0_74, %c0_75] : memref<64x32xf32, #tpu.memory_space<vmem>>, vector<64x32xf32>
    %cst_76 = arith.constant dense<0.000000e+00> : vector<64xf32>
    %115 = vector.multi_reduction <add>, %111, %cst_76 [0] : vector<64x64xf32> to vector<64xf32>
    %116 = vector.shape_cast %115 : vector<64xf32> to vector<1x64xf32>
    %cst_77 = arith.constant dense<0.000000e+00> : vector<1x32xf32>
    %117 = tpu.matmul %116, %114, %cst_77 {dimension_numbers = #tpu.dot_dimension_numbers<[1], [0], [0], [1], [0, 0, 1, 1], [], []>} : vector<1x64xf32>, vector<64x32xf32>, vector<1x32xf32> -> vector<1x32xf32>
    %cst_78 = arith.constant 7.812500e-03 : f32
    %118 = vector.broadcast %cst_78 : f32 to vector<1x32xf32>
    %119 = arith.mulf %117, %118 : vector<1x32xf32>
    %120 = tpu.transpose %114, [1, 0] : vector<64x32xf32> -> vector<32x64xf32>
    %cst_79 = arith.constant dense<0.000000e+00> : vector<1x64xf32>
    %121 = tpu.matmul %119, %120, %cst_79 {dimension_numbers = #tpu.dot_dimension_numbers<[1], [0], [0], [1], [0, 0, 1, 1], [], []>} : vector<1x32xf32>, vector<32x64xf32>, vector<1x64xf32> -> vector<1x64xf32>
    %122 = vector.broadcast %121 : vector<1x64xf32> to vector<64x64xf32>
    %123 = arith.subf %111, %122 : vector<64x64xf32>
    %124 = arith.mulf %123, %123 : vector<64x64xf32>
    %cst_80 = arith.constant dense<0.000000e+00> : vector<64xf32>
    %125 = vector.multi_reduction <add>, %124, %cst_80 [0] : vector<64x64xf32> to vector<64xf32>
    %126 = vector.shape_cast %125 : vector<64xf32> to vector<1x64xf32>
    %cst_81 = arith.constant dense<0.000000e+00> : vector<1x32xf32>
    %127 = tpu.matmul %126, %114, %cst_81 {dimension_numbers = #tpu.dot_dimension_numbers<[1], [0], [0], [1], [0, 0, 1, 1], [], []>} : vector<1x64xf32>, vector<64x32xf32>, vector<1x32xf32> -> vector<1x32xf32>
    %cst_82 = arith.constant 7.812500e-03 : f32
    %128 = vector.broadcast %cst_82 : f32 to vector<1x32xf32>
    %129 = arith.mulf %127, %128 : vector<1x32xf32>
    %130 = tpu.transpose %114, [1, 0] : vector<64x32xf32> -> vector<32x64xf32>
    %cst_83 = arith.constant dense<0.000000e+00> : vector<1x64xf32>
    %131 = tpu.matmul %129, %130, %cst_83 {dimension_numbers = #tpu.dot_dimension_numbers<[1], [0], [0], [1], [0, 0, 1, 1], [], []>} : vector<1x32xf32>, vector<32x64xf32>, vector<1x64xf32> -> vector<1x64xf32>
    %cst_84 = arith.constant 9.99999974E-6 : f32
    %132 = vector.broadcast %cst_84 : f32 to vector<1x64xf32>
    %133 = arith.addf %131, %132 : vector<1x64xf32>
    %134 = math.rsqrt %133 : vector<1x64xf32>
    %135 = vector.broadcast %134 : vector<1x64xf32> to vector<64x64xf32>
    %136 = arith.mulf %123, %135 : vector<64x64xf32>
    %137 = vector.broadcast %112 : vector<1x64xf32> to vector<64x64xf32>
    %138 = arith.mulf %136, %137 : vector<64x64xf32>
    %139 = vector.broadcast %113 : vector<1x64xf32> to vector<64x64xf32>
    %140 = arith.addf %138, %139 : vector<64x64xf32>
    %c0_85 = arith.constant 0 : index
    %c0_86 = arith.constant 0 : index
    %c0_87 = arith.constant 0 : index
    %141 = vector.load %arg12[%c0_85, %c0_86, %c0_87] : memref<1x2x64xf32, #tpu.memory_space<vmem>>, vector<1x2x64xf32>
    %142 = vector.shape_cast %141 : vector<1x2x64xf32> to vector<2x64xf32>
    %143 = vector.extract_strided_slice %142 {offsets = [0, 0], sizes = [1, 64], strides = [1, 1]} : vector<2x64xf32> to vector<1x64xf32>
    %144 = vector.broadcast %143 : vector<1x64xf32> to vector<64x64xf32>
    %145 = arith.mulf %144, %140 : vector<64x64xf32>
    %146 = vector.extract_strided_slice %142 {offsets = [1, 0], sizes = [1, 64], strides = [1, 1]} : vector<2x64xf32> to vector<1x64xf32>
    %147 = vector.broadcast %146 : vector<1x64xf32> to vector<64x64xf32>
    %148 = arith.addf %145, %147 : vector<64x64xf32>
    %149 = arith.negf %148 : vector<64x64xf32>
    %150 = math.exp %149 : vector<64x64xf32>
    %cst_88 = arith.constant 1.000000e+00 : f32
    %151 = vector.broadcast %cst_88 : f32 to vector<64x64xf32>
    %152 = arith.addf %151, %150 : vector<64x64xf32>
    %153 = arith.divf %151, %152 : vector<64x64xf32>
    %154 = arith.mulf %148, %153 : vector<64x64xf32>
    %cst_89 = arith.constant 0.000000e+00 : f32
    %155 = vector.broadcast %cst_89 : f32 to vector<82x64xf32>
    %c0_90 = arith.constant 0 : index
    %c0_91 = arith.constant 0 : index
    %156 = vector.load %arg19[%c0_90, %c0_91] : memref<82x64xf32, #tpu.memory_space<vmem>>, vector<82x64xf32>
    tpu.vector_store %arg19[%c0_90, %c0_91], %155 {strides = array<i32>} : memref<82x64xf32, #tpu.memory_space<vmem>>, vector<82x64xf32>,
    %c9_92 = arith.constant 9 : index
    %c0_93 = arith.constant 0 : index
    %157 = vector.load %arg19[%c9_92, %c0_93] : memref<82x64xf32, #tpu.memory_space<vmem>>, vector<64x64xf32>
    tpu.vector_store %arg19[%c9_92, %c0_93], %154 {strides = array<i32>} : memref<82x64xf32, #tpu.memory_space<vmem>>, vector<64x64xf32>,
    %c0_94 = arith.constant 0 : index
    %c0_95 = arith.constant 0 : index
    %158 = vector.load %arg14[%c0_94, %c0_95] : memref<1x64xf32, #tpu.memory_space<vmem>>, vector<1x64xf32>
    %cst_96 = arith.constant 0.000000e+00 : f32
    %159 = vector.broadcast %cst_96 : f32 to vector<64x64xf32>
    %c0_97 = arith.constant 0 : index
    %c0_98 = arith.constant 0 : index
    %160 = vector.load %arg19[%c0_97, %c0_98] : memref<82x64xf32, #tpu.memory_space<vmem>>, vector<64x64xf32>
    %161 = vector.broadcast %2 : vector<64x1xf32> to vector<64x64xf32>
    %162 = arith.mulf %160, %161 : vector<64x64xf32>
    %163 = arith.truncf %162 : vector<64x64xf32> to vector<64x64xbf16>
    %c0_99 = arith.constant 0 : index
    %c0_100 = arith.constant 0 : index
    %c0_101 = arith.constant 0 : index
    %164 = vector.load %arg13[%c0_99, %c0_100, %c0_101] : memref<9x64x64xbf16, #tpu.memory_space<vmem>>, vector<1x64x64xbf16>
    %165 = vector.shape_cast %164 : vector<1x64x64xbf16> to vector<64x64xbf16>
    %cst_102 = arith.constant dense<0.000000e+00> : vector<64x64xf32>
    %166 = tpu.matmul %163, %165, %cst_102 {dimension_numbers = #tpu.dot_dimension_numbers<[1], [0], [0], [1], [0, 0, 1, 1], [], []>} : vector<64x64xbf16>, vector<64x64xbf16>, vector<64x64xf32> -> vector<64x64xf32>
    %167 = arith.addf %159, %166 : vector<64x64xf32>
    %c1_103 = arith.constant 1 : index
    %c0_104 = arith.constant 0 : index
    %168 = vector.load %arg19[%c1_103, %c0_104] : memref<82x64xf32, #tpu.memory_space<vmem>>, vector<64x64xf32>
    %169 = arith.truncf %168 : vector<64x64xf32> to vector<64x64xbf16>
    %c1_105 = arith.constant 1 : index
    %c0_106 = arith.constant 0 : index
    %c0_107 = arith.constant 0 : index
    %170 = vector.load %arg13[%c1_105, %c0_106, %c0_107] : memref<9x64x64xbf16, #tpu.memory_space<vmem>>, vector<1x64x64xbf16>
    %171 = vector.shape_cast %170 : vector<1x64x64xbf16> to vector<64x64xbf16>
    %cst_108 = arith.constant dense<0.000000e+00> : vector<64x64xf32>
    %172 = tpu.matmul %169, %171, %cst_108 {dimension_numbers = #tpu.dot_dimension_numbers<[1], [0], [0], [1], [0, 0, 1, 1], [], []>} : vector<64x64xbf16>, vector<64x64xbf16>, vector<64x64xf32> -> vector<64x64xf32>
    %173 = arith.addf %167, %172 : vector<64x64xf32>
    %c2_109 = arith.constant 2 : index
    %c0_110 = arith.constant 0 : index
    %174 = vector.load %arg19[%c2_109, %c0_110] : memref<82x64xf32, #tpu.memory_space<vmem>>, vector<64x64xf32>
    %175 = vector.broadcast %3 : vector<64x1xf32> to vector<64x64xf32>
    %176 = arith.mulf %174, %175 : vector<64x64xf32>
    %177 = arith.truncf %176 : vector<64x64xf32> to vector<64x64xbf16>
    %c2_111 = arith.constant 2 : index
    %c0_112 = arith.constant 0 : index
    %c0_113 = arith.constant 0 : index
    %178 = vector.load %arg13[%c2_111, %c0_112, %c0_113] : memref<9x64x64xbf16, #tpu.memory_space<vmem>>, vector<1x64x64xbf16>
    %179 = vector.shape_cast %178 : vector<1x64x64xbf16> to vector<64x64xbf16>
    %cst_114 = arith.constant dense<0.000000e+00> : vector<64x64xf32>
    %180 = tpu.matmul %177, %179, %cst_114 {dimension_numbers = #tpu.dot_dimension_numbers<[1], [0], [0], [1], [0, 0, 1, 1], [], []>} : vector<64x64xbf16>, vector<64x64xbf16>, vector<64x64xf32> -> vector<64x64xf32>
    %181 = arith.addf %173, %180 : vector<64x64xf32>
    %c8_115 = arith.constant 8 : index
    %c0_116 = arith.constant 0 : index
    %182 = vector.load %arg19[%c8_115, %c0_116] : memref<82x64xf32, #tpu.memory_space<vmem>>, vector<64x64xf32>
    %183 = vector.broadcast %2 : vector<64x1xf32> to vector<64x64xf32>
    %184 = arith.mulf %182, %183 : vector<64x64xf32>
    %185 = arith.truncf %184 : vector<64x64xf32> to vector<64x64xbf16>
    %c3_117 = arith.constant 3 : index
    %c0_118 = arith.constant 0 : index
    %c0_119 = arith.constant 0 : index
    %186 = vector.load %arg13[%c3_117, %c0_118, %c0_119] : memref<9x64x64xbf16, #tpu.memory_space<vmem>>, vector<1x64x64xbf16>
    %187 = vector.shape_cast %186 : vector<1x64x64xbf16> to vector<64x64xbf16>
    %cst_120 = arith.constant dense<0.000000e+00> : vector<64x64xf32>
    %188 = tpu.matmul %185, %187, %cst_120 {dimension_numbers = #tpu.dot_dimension_numbers<[1], [0], [0], [1], [0, 0, 1, 1], [], []>} : vector<64x64xbf16>, vector<64x64xbf16>, vector<64x64xf32> -> vector<64x64xf32>
    %189 = arith.addf %181, %188 : vector<64x64xf32>
    %c9_121 = arith.constant 9 : index
    %c0_122 = arith.constant 0 : index
    %190 = vector.load %arg19[%c9_121, %c0_122] : memref<82x64xf32, #tpu.memory_space<vmem>>, vector<64x64xf32>
    %191 = arith.truncf %190 : vector<64x64xf32> to vector<64x64xbf16>
    %c4_123 = arith.constant 4 : index
    %c0_124 = arith.constant 0 : index
    %c0_125 = arith.constant 0 : index
    %192 = vector.load %arg13[%c4_123, %c0_124, %c0_125] : memref<9x64x64xbf16, #tpu.memory_space<vmem>>, vector<1x64x64xbf16>
    %193 = vector.shape_cast %192 : vector<1x64x64xbf16> to vector<64x64xbf16>
    %cst_126 = arith.constant dense<0.000000e+00> : vector<64x64xf32>
    %194 = tpu.matmul %191, %193, %cst_126 {dimension_numbers = #tpu.dot_dimension_numbers<[1], [0], [0], [1], [0, 0, 1, 1], [], []>} : vector<64x64xbf16>, vector<64x64xbf16>, vector<64x64xf32> -> vector<64x64xf32>
    %195 = arith.addf %189, %194 : vector<64x64xf32>
    %c10_127 = arith.constant 10 : index
    %c0_128 = arith.constant 0 : index
    %196 = vector.load %arg19[%c10_127, %c0_128] : memref<82x64xf32, #tpu.memory_space<vmem>>, vector<64x64xf32>
    %197 = vector.broadcast %3 : vector<64x1xf32> to vector<64x64xf32>
    %198 = arith.mulf %196, %197 : vector<64x64xf32>
    %199 = arith.truncf %198 : vector<64x64xf32> to vector<64x64xbf16>
    %c5_129 = arith.constant 5 : index
    %c0_130 = arith.constant 0 : index
    %c0_131 = arith.constant 0 : index
    %200 = vector.load %arg13[%c5_129, %c0_130, %c0_131] : memref<9x64x64xbf16, #tpu.memory_space<vmem>>, vector<1x64x64xbf16>
    %201 = vector.shape_cast %200 : vector<1x64x64xbf16> to vector<64x64xbf16>
    %cst_132 = arith.constant dense<0.000000e+00> : vector<64x64xf32>
    %202 = tpu.matmul %199, %201, %cst_132 {dimension_numbers = #tpu.dot_dimension_numbers<[1], [0], [0], [1], [0, 0, 1, 1], [], []>} : vector<64x64xbf16>, vector<64x64xbf16>, vector<64x64xf32> -> vector<64x64xf32>
    %203 = arith.addf %195, %202 : vector<64x64xf32>
    %c16_133 = arith.constant 16 : index
    %c0_134 = arith.constant 0 : index
    %204 = vector.load %arg19[%c16_133, %c0_134] : memref<82x64xf32, #tpu.memory_space<vmem>>, vector<64x64xf32>
    %205 = vector.broadcast %2 : vector<64x1xf32> to vector<64x64xf32>
    %206 = arith.mulf %204, %205 : vector<64x64xf32>
    %207 = arith.truncf %206 : vector<64x64xf32> to vector<64x64xbf16>
    %c6_135 = arith.constant 6 : index
    %c0_136 = arith.constant 0 : index
    %c0_137 = arith.constant 0 : index
    %208 = vector.load %arg13[%c6_135, %c0_136, %c0_137] : memref<9x64x64xbf16, #tpu.memory_space<vmem>>, vector<1x64x64xbf16>
    %209 = vector.shape_cast %208 : vector<1x64x64xbf16> to vector<64x64xbf16>
    %cst_138 = arith.constant dense<0.000000e+00> : vector<64x64xf32>
    %210 = tpu.matmul %207, %209, %cst_138 {dimension_numbers = #tpu.dot_dimension_numbers<[1], [0], [0], [1], [0, 0, 1, 1], [], []>} : vector<64x64xbf16>, vector<64x64xbf16>, vector<64x64xf32> -> vector<64x64xf32>
    %211 = arith.addf %203, %210 : vector<64x64xf32>
    %c17_139 = arith.constant 17 : index
    %c0_140 = arith.constant 0 : index
    %212 = vector.load %arg19[%c17_139, %c0_140] : memref<82x64xf32, #tpu.memory_space<vmem>>, vector<64x64xf32>
    %213 = arith.truncf %212 : vector<64x64xf32> to vector<64x64xbf16>
    %c7_141 = arith.constant 7 : index
    %c0_142 = arith.constant 0 : index
    %c0_143 = arith.constant 0 : index
    %214 = vector.load %arg13[%c7_141, %c0_142, %c0_143] : memref<9x64x64xbf16, #tpu.memory_space<vmem>>, vector<1x64x64xbf16>
    %215 = vector.shape_cast %214 : vector<1x64x64xbf16> to vector<64x64xbf16>
    %cst_144 = arith.constant dense<0.000000e+00> : vector<64x64xf32>
    %216 = tpu.matmul %213, %215, %cst_144 {dimension_numbers = #tpu.dot_dimension_numbers<[1], [0], [0], [1], [0, 0, 1, 1], [], []>} : vector<64x64xbf16>, vector<64x64xbf16>, vector<64x64xf32> -> vector<64x64xf32>
    %217 = arith.addf %211, %216 : vector<64x64xf32>
    %c18_145 = arith.constant 18 : index
    %c0_146 = arith.constant 0 : index
    %218 = vector.load %arg19[%c18_145, %c0_146] : memref<82x64xf32, #tpu.memory_space<vmem>>, vector<64x64xf32>
    %219 = vector.broadcast %3 : vector<64x1xf32> to vector<64x64xf32>
    %220 = arith.mulf %218, %219 : vector<64x64xf32>
    %221 = arith.truncf %220 : vector<64x64xf32> to vector<64x64xbf16>
    %c8_147 = arith.constant 8 : index
    %c0_148 = arith.constant 0 : index
    %c0_149 = arith.constant 0 : index
    %222 = vector.load %arg13[%c8_147, %c0_148, %c0_149] : memref<9x64x64xbf16, #tpu.memory_space<vmem>>, vector<1x64x64xbf16>
    %223 = vector.shape_cast %222 : vector<1x64x64xbf16> to vector<64x64xbf16>
    %cst_150 = arith.constant dense<0.000000e+00> : vector<64x64xf32>
    %224 = tpu.matmul %221, %223, %cst_150 {dimension_numbers = #tpu.dot_dimension_numbers<[1], [0], [0], [1], [0, 0, 1, 1], [], []>} : vector<64x64xbf16>, vector<64x64xbf16>, vector<64x64xf32> -> vector<64x64xf32>
    %225 = arith.addf %217, %224 : vector<64x64xf32>
    %226 = vector.broadcast %158 : vector<1x64xf32> to vector<64x64xf32>
    %227 = arith.addf %225, %226 : vector<64x64xf32>
    %228 = arith.truncf %1 : vector<64x32xf32> to vector<64x32xbf16>
    %c0_151 = arith.constant 0 : index
    %c0_152 = arith.constant 0 : index
    %229 = vector.load %arg15[%c0_151, %c0_152] : memref<32x64xbf16, #tpu.memory_space<vmem>>, vector<32x64xbf16>
    %cst_153 = arith.constant dense<0.000000e+00> : vector<64x64xf32>
    %230 = tpu.matmul %228, %229, %cst_153 {dimension_numbers = #tpu.dot_dimension_numbers<[1], [0], [0], [1], [0, 0, 1, 1], [], []>} : vector<64x32xbf16>, vector<32x64xbf16>, vector<64x64xf32> -> vector<64x64xf32>
    %c0_154 = arith.constant 0 : index
    %c0_155 = arith.constant 0 : index
    %231 = vector.load %arg16[%c0_154, %c0_155] : memref<1x64xf32, #tpu.memory_space<vmem>>, vector<1x64xf32>
    %232 = vector.broadcast %231 : vector<1x64xf32> to vector<64x64xf32>
    %233 = arith.addf %230, %232 : vector<64x64xf32>
    %234 = arith.addf %227, %233 : vector<64x64xf32>
    %c0_156 = arith.constant 0 : index
    %c0_157 = arith.constant 0 : index
    %c0_158 = arith.constant 0 : index
    %235 = vector.load %arg17[%c0_156, %c0_157, %c0_158] : memref<1x64x64xf32, #tpu.memory_space<vmem>>, vector<1x64x64xf32>
    %236 = vector.shape_cast %235 : vector<1x64x64xf32> to vector<64x64xf32>
    %237 = vector.shape_cast %234 : vector<64x64xf32> to vector<1x64x64xf32>
    tpu.vector_store %arg17[%c0_156, %c0_157, %c0_158], %237 {strides = array<i32>} : memref<1x64x64xf32, #tpu.memory_space<vmem>>, vector<1x64x64xf32>,
    return
  }
  func.func @transform_0(%arg0: i32) -> (i32, i32, i32) {
    %c0_i32 = arith.constant 0 : i32
    %c0_i32_0 = arith.constant 0 : i32
    %c0_i32_1 = arith.constant 0 : i32
    return %arg0, %c0_i32, %c0_i32_0 : i32, i32, i32
  }
  func.func @transform_1(%arg0: i32) -> (i32, i32) {
    %c0_i32 = arith.constant 0 : i32
    %c0_i32_0 = arith.constant 0 : i32
    %c0_i32_1 = arith.constant 0 : i32
    return %c0_i32, %c0_i32_0 : i32, i32
  }
  func.func @transform_2(%arg0: i32) -> (i32, i32) {
    %c0_i32 = arith.constant 0 : i32
    %c0_i32_0 = arith.constant 0 : i32
    %c0_i32_1 = arith.constant 0 : i32
    return %c0_i32, %c0_i32_0 : i32, i32
  }
  func.func @transform_3(%arg0: i32) -> (i32, i32) {
    %c0_i32 = arith.constant 0 : i32
    %c0_i32_0 = arith.constant 0 : i32
    %c0_i32_1 = arith.constant 0 : i32
    return %c0_i32, %c0_i32_0 : i32, i32
  }
  func.func @transform_4(%arg0: i32) -> (i32, i32) {
    %c0_i32 = arith.constant 0 : i32
    %c0_i32_0 = arith.constant 0 : i32
    %c0_i32_1 = arith.constant 0 : i32
    return %c0_i32, %c0_i32_0 : i32, i32
  }
  func.func @transform_5(%arg0: i32) -> (i32, i32) {
    %c0_i32 = arith.constant 0 : i32
    %c0_i32_0 = arith.constant 0 : i32
    %c0_i32_1 = arith.constant 0 : i32
    return %c0_i32, %c0_i32_0 : i32, i32
  }
  func.func @transform_6(%arg0: i32) -> (i32, i32, i32) {
    %c0_i32 = arith.constant 0 : i32
    %c0_i32_0 = arith.constant 0 : i32
    %c0_i32_1 = arith.constant 0 : i32
    %c0_i32_2 = arith.constant 0 : i32
    return %c0_i32, %c0_i32_0, %c0_i32_1 : i32, i32, i32
  }
  func.func @transform_7(%arg0: i32) -> (i32, i32) {
    %c0_i32 = arith.constant 0 : i32
    %c0_i32_0 = arith.constant 0 : i32
    %c0_i32_1 = arith.constant 0 : i32
    return %c0_i32, %c0_i32_0 : i32, i32
  }
  func.func @transform_8(%arg0: i32) -> (i32, i32) {
    %c0_i32 = arith.constant 0 : i32
    %c0_i32_0 = arith.constant 0 : i32
    %c0_i32_1 = arith.constant 0 : i32
    return %c0_i32, %c0_i32_0 : i32, i32
  }
  func.func @transform_9(%arg0: i32) -> (i32, i32) {
    %c0_i32 = arith.constant 0 : i32
    %c0_i32_0 = arith.constant 0 : i32
    %c0_i32_1 = arith.constant 0 : i32
    return %c0_i32, %c0_i32_0 : i32, i32
  }
  func.func @transform_10(%arg0: i32) -> (i32, i32) {
    %c0_i32 = arith.constant 0 : i32
    %c0_i32_0 = arith.constant 0 : i32
    %c0_i32_1 = arith.constant 0 : i32
    return %c0_i32, %c0_i32_0 : i32, i32
  }
  func.func @transform_11(%arg0: i32) -> (i32, i32, i32) {
    %c0_i32 = arith.constant 0 : i32
    %c0_i32_0 = arith.constant 0 : i32
    %c0_i32_1 = arith.constant 0 : i32
    return %arg0, %c0_i32, %c0_i32_0 : i32, i32, i32
  }
  func.func @transform_12(%arg0: i32) -> (i32, i32, i32) {
    %c0_i32 = arith.constant 0 : i32
    %c0_i32_0 = arith.constant 0 : i32
    %c0_i32_1 = arith.constant 0 : i32
    %c0_i32_2 = arith.constant 0 : i32
    return %c0_i32, %c0_i32_0, %c0_i32_1 : i32, i32, i32
  }
  func.func @transform_13(%arg0: i32) -> (i32, i32) {
    %c0_i32 = arith.constant 0 : i32
    %c0_i32_0 = arith.constant 0 : i32
    %c0_i32_1 = arith.constant 0 : i32
    return %c0_i32, %c0_i32_0 : i32, i32
  }
  func.func @transform_14(%arg0: i32) -> (i32, i32) {
    %c0_i32 = arith.constant 0 : i32
    %c0_i32_0 = arith.constant 0 : i32
    %c0_i32_1 = arith.constant 0 : i32
    return %c0_i32, %c0_i32_0 : i32, i32
  }
  func.func @transform_15(%arg0: i32) -> (i32, i32) {
    %c0_i32 = arith.constant 0 : i32
    %c0_i32_0 = arith.constant 0 : i32
    %c0_i32_1 = arith.constant 0 : i32
    return %c0_i32, %c0_i32_0 : i32, i32
  }
  func.func @transform_16(%arg0: i32) -> (i32, i32, i32) {
    %c0_i32 = arith.constant 0 : i32
    %c0_i32_0 = arith.constant 0 : i32
    %c0_i32_1 = arith.constant 0 : i32
    return %arg0, %c0_i32, %c0_i32_0 : i32, i32, i32
  }
}

module attributes {stable_mosaic.version = 11 : i64} {
  func.func @_attnblock_kernel(%arg0: i32, %arg1: memref<1x64x64xf32, #tpu.memory_space<vmem>>, %arg2: memref<1x64xf32, #tpu.memory_space<vmem>>, %arg3: memref<1x64xf32, #tpu.memory_space<vmem>>, %arg4: memref<64x32xf32, #tpu.memory_space<vmem>>, %arg5: memref<64x64xbf16, #tpu.memory_space<vmem>>, %arg6: memref<1x64xf32, #tpu.memory_space<vmem>>, %arg7: memref<64x64xbf16, #tpu.memory_space<vmem>>, %arg8: memref<1x64xf32, #tpu.memory_space<vmem>>, %arg9: memref<64x64xbf16, #tpu.memory_space<vmem>>, %arg10: memref<1x64xf32, #tpu.memory_space<vmem>>, %arg11: memref<64x64xbf16, #tpu.memory_space<vmem>>, %arg12: memref<1x64xf32, #tpu.memory_space<vmem>>, %arg13: memref<1x64x64xf32, #tpu.memory_space<vmem>>) attributes {dimension_semantics = [#tpu.dimension_semantics<parallel>], iteration_bounds = array<i64: 2>, scalar_prefetch = 0 : i64, scratch_operands = 0 : i64, tpu.core_type = #tpu.core_type<tc>, window_params = [{transform_indices = @transform_0, window_bounds = array<i64: 1, 64, 64>}, {pipeline_mode = #tpu.pipeline_mode<synchronous>, transform_indices = @transform_1, window_bounds = array<i64: 1, 64>}, {pipeline_mode = #tpu.pipeline_mode<synchronous>, transform_indices = @transform_2, window_bounds = array<i64: 1, 64>}, {pipeline_mode = #tpu.pipeline_mode<synchronous>, transform_indices = @transform_3, window_bounds = array<i64: 64, 32>}, {pipeline_mode = #tpu.pipeline_mode<synchronous>, transform_indices = @transform_4, window_bounds = array<i64: 64, 64>}, {pipeline_mode = #tpu.pipeline_mode<synchronous>, transform_indices = @transform_5, window_bounds = array<i64: 1, 64>}, {pipeline_mode = #tpu.pipeline_mode<synchronous>, transform_indices = @transform_6, window_bounds = array<i64: 64, 64>}, {pipeline_mode = #tpu.pipeline_mode<synchronous>, transform_indices = @transform_7, window_bounds = array<i64: 1, 64>}, {pipeline_mode = #tpu.pipeline_mode<synchronous>, transform_indices = @transform_8, window_bounds = array<i64: 64, 64>}, {pipeline_mode = #tpu.pipeline_mode<synchronous>, transform_indices = @transform_9, window_bounds = array<i64: 1, 64>}, {pipeline_mode = #tpu.pipeline_mode<synchronous>, transform_indices = @transform_10, window_bounds = array<i64: 64, 64>}, {pipeline_mode = #tpu.pipeline_mode<synchronous>, transform_indices = @transform_11, window_bounds = array<i64: 1, 64>}, {transform_indices = @transform_12, window_bounds = array<i64: 1, 64, 64>}]} {
    %c0 = arith.constant 0 : index
    %c0_0 = arith.constant 0 : index
    %c0_1 = arith.constant 0 : index
    %0 = vector.load %arg1[%c0, %c0_0, %c0_1] : memref<1x64x64xf32, #tpu.memory_space<vmem>>, vector<1x64x64xf32>
    %1 = vector.shape_cast %0 : vector<1x64x64xf32> to vector<64x64xf32>
    %c0_2 = arith.constant 0 : index
    %c0_3 = arith.constant 0 : index
    %2 = vector.load %arg2[%c0_2, %c0_3] : memref<1x64xf32, #tpu.memory_space<vmem>>, vector<1x64xf32>
    %c0_4 = arith.constant 0 : index
    %c0_5 = arith.constant 0 : index
    %3 = vector.load %arg3[%c0_4, %c0_5] : memref<1x64xf32, #tpu.memory_space<vmem>>, vector<1x64xf32>
    %c0_6 = arith.constant 0 : index
    %c0_7 = arith.constant 0 : index
    %4 = vector.load %arg4[%c0_6, %c0_7] : memref<64x32xf32, #tpu.memory_space<vmem>>, vector<64x32xf32>
    %cst = arith.constant dense<0.000000e+00> : vector<64xf32>
    %5 = vector.multi_reduction <add>, %1, %cst [0] : vector<64x64xf32> to vector<64xf32>
    %6 = vector.shape_cast %5 : vector<64xf32> to vector<1x64xf32>
    %cst_8 = arith.constant dense<0.000000e+00> : vector<1x32xf32>
    %7 = tpu.matmul %6, %4, %cst_8 {dimension_numbers = #tpu.dot_dimension_numbers<[1], [0], [0], [1], [0, 0, 1, 1], [], []>} : vector<1x64xf32>, vector<64x32xf32>, vector<1x32xf32> -> vector<1x32xf32>
    %cst_9 = arith.constant 7.812500e-03 : f32
    %8 = vector.broadcast %cst_9 : f32 to vector<1x32xf32>
    %9 = arith.mulf %7, %8 : vector<1x32xf32>
    %10 = tpu.transpose %4, [1, 0] : vector<64x32xf32> -> vector<32x64xf32>
    %cst_10 = arith.constant dense<0.000000e+00> : vector<1x64xf32>
    %11 = tpu.matmul %9, %10, %cst_10 {dimension_numbers = #tpu.dot_dimension_numbers<[1], [0], [0], [1], [0, 0, 1, 1], [], []>} : vector<1x32xf32>, vector<32x64xf32>, vector<1x64xf32> -> vector<1x64xf32>
    %12 = vector.broadcast %11 : vector<1x64xf32> to vector<64x64xf32>
    %13 = arith.subf %1, %12 : vector<64x64xf32>
    %14 = arith.mulf %13, %13 : vector<64x64xf32>
    %cst_11 = arith.constant dense<0.000000e+00> : vector<64xf32>
    %15 = vector.multi_reduction <add>, %14, %cst_11 [0] : vector<64x64xf32> to vector<64xf32>
    %16 = vector.shape_cast %15 : vector<64xf32> to vector<1x64xf32>
    %cst_12 = arith.constant dense<0.000000e+00> : vector<1x32xf32>
    %17 = tpu.matmul %16, %4, %cst_12 {dimension_numbers = #tpu.dot_dimension_numbers<[1], [0], [0], [1], [0, 0, 1, 1], [], []>} : vector<1x64xf32>, vector<64x32xf32>, vector<1x32xf32> -> vector<1x32xf32>
    %cst_13 = arith.constant 7.812500e-03 : f32
    %18 = vector.broadcast %cst_13 : f32 to vector<1x32xf32>
    %19 = arith.mulf %17, %18 : vector<1x32xf32>
    %20 = tpu.transpose %4, [1, 0] : vector<64x32xf32> -> vector<32x64xf32>
    %cst_14 = arith.constant dense<0.000000e+00> : vector<1x64xf32>
    %21 = tpu.matmul %19, %20, %cst_14 {dimension_numbers = #tpu.dot_dimension_numbers<[1], [0], [0], [1], [0, 0, 1, 1], [], []>} : vector<1x32xf32>, vector<32x64xf32>, vector<1x64xf32> -> vector<1x64xf32>
    %cst_15 = arith.constant 9.99999974E-6 : f32
    %22 = vector.broadcast %cst_15 : f32 to vector<1x64xf32>
    %23 = arith.addf %21, %22 : vector<1x64xf32>
    %24 = math.rsqrt %23 : vector<1x64xf32>
    %25 = vector.broadcast %24 : vector<1x64xf32> to vector<64x64xf32>
    %26 = arith.mulf %13, %25 : vector<64x64xf32>
    %27 = vector.broadcast %2 : vector<1x64xf32> to vector<64x64xf32>
    %28 = arith.mulf %26, %27 : vector<64x64xf32>
    %29 = vector.broadcast %3 : vector<1x64xf32> to vector<64x64xf32>
    %30 = arith.addf %28, %29 : vector<64x64xf32>
    %31 = arith.truncf %30 : vector<64x64xf32> to vector<64x64xbf16>
    %c0_16 = arith.constant 0 : index
    %c0_17 = arith.constant 0 : index
    %32 = vector.load %arg5[%c0_16, %c0_17] : memref<64x64xbf16, #tpu.memory_space<vmem>>, vector<64x64xbf16>
    %cst_18 = arith.constant dense<0.000000e+00> : vector<64x64xf32>
    %33 = tpu.matmul %31, %32, %cst_18 {dimension_numbers = #tpu.dot_dimension_numbers<[1], [0], [0], [1], [0, 0, 1, 1], [], []>} : vector<64x64xbf16>, vector<64x64xbf16>, vector<64x64xf32> -> vector<64x64xf32>
    %c0_19 = arith.constant 0 : index
    %c0_20 = arith.constant 0 : index
    %34 = vector.load %arg6[%c0_19, %c0_20] : memref<1x64xf32, #tpu.memory_space<vmem>>, vector<1x64xf32>
    %35 = vector.broadcast %34 : vector<1x64xf32> to vector<64x64xf32>
    %36 = arith.addf %33, %35 : vector<64x64xf32>
    %c0_21 = arith.constant 0 : index
    %c0_22 = arith.constant 0 : index
    %37 = vector.load %arg7[%c0_21, %c0_22] : memref<64x64xbf16, #tpu.memory_space<vmem>>, vector<64x64xbf16>
    %cst_23 = arith.constant dense<0.000000e+00> : vector<64x64xf32>
    %38 = tpu.matmul %31, %37, %cst_23 {dimension_numbers = #tpu.dot_dimension_numbers<[1], [0], [0], [1], [0, 0, 1, 1], [], []>} : vector<64x64xbf16>, vector<64x64xbf16>, vector<64x64xf32> -> vector<64x64xf32>
    %c0_24 = arith.constant 0 : index
    %c0_25 = arith.constant 0 : index
    %39 = vector.load %arg8[%c0_24, %c0_25] : memref<1x64xf32, #tpu.memory_space<vmem>>, vector<1x64xf32>
    %40 = vector.broadcast %39 : vector<1x64xf32> to vector<64x64xf32>
    %41 = arith.addf %38, %40 : vector<64x64xf32>
    %c0_26 = arith.constant 0 : index
    %c0_27 = arith.constant 0 : index
    %42 = vector.load %arg9[%c0_26, %c0_27] : memref<64x64xbf16, #tpu.memory_space<vmem>>, vector<64x64xbf16>
    %cst_28 = arith.constant dense<0.000000e+00> : vector<64x64xf32>
    %43 = tpu.matmul %31, %42, %cst_28 {dimension_numbers = #tpu.dot_dimension_numbers<[1], [0], [0], [1], [0, 0, 1, 1], [], []>} : vector<64x64xbf16>, vector<64x64xbf16>, vector<64x64xf32> -> vector<64x64xf32>
    %c0_29 = arith.constant 0 : index
    %c0_30 = arith.constant 0 : index
    %44 = vector.load %arg10[%c0_29, %c0_30] : memref<1x64xf32, #tpu.memory_space<vmem>>, vector<1x64xf32>
    %45 = vector.broadcast %44 : vector<1x64xf32> to vector<64x64xf32>
    %46 = arith.addf %43, %45 : vector<64x64xf32>
    %47 = arith.truncf %36 : vector<64x64xf32> to vector<64x64xbf16>
    %48 = arith.truncf %41 : vector<64x64xf32> to vector<64x64xbf16>
    %cst_31 = arith.constant dense<0.000000e+00> : vector<64x64xf32>
    %49 = tpu.matmul %47, %48, %cst_31 {dimension_numbers = #tpu.dot_dimension_numbers<[1], [1], [0], [0], [0, 0, 1, 0], [], []>} : vector<64x64xbf16>, vector<64x64xbf16>, vector<64x64xf32> -> vector<64x64xf32>
    %cst_32 = arith.constant 1.250000e-01 : f32
    %50 = vector.broadcast %cst_32 : f32 to vector<64x64xf32>
    %51 = arith.mulf %49, %50 : vector<64x64xf32>
    %cst_33 = arith.constant dense<0xFF800000> : vector<64xf32>
    %52 = vector.multi_reduction <maximumf>, %51, %cst_33 [1] : vector<64x64xf32> to vector<64xf32>
    %53 = vector.shape_cast %52 : vector<64xf32> to vector<64x1xf32>
    %54 = vector.broadcast %53 : vector<64x1xf32> to vector<64x64xf32>
    %55 = arith.subf %51, %54 : vector<64x64xf32>
    %56 = math.exp %55 : vector<64x64xf32>
    %cst_34 = arith.constant dense<0.000000e+00> : vector<64xf32>
    %57 = vector.multi_reduction <add>, %56, %cst_34 [1] : vector<64x64xf32> to vector<64xf32>
    %58 = vector.shape_cast %57 : vector<64xf32> to vector<64x1xf32>
    %59 = tpu.reciprocal %58 {approx = true} : vector<64x1xf32> -> vector<64x1xf32>
    %60 = vector.broadcast %59 : vector<64x1xf32> to vector<64x64xf32>
    %61 = arith.mulf %56, %60 : vector<64x64xf32>
    %62 = arith.truncf %61 : vector<64x64xf32> to vector<64x64xbf16>
    %63 = arith.truncf %46 : vector<64x64xf32> to vector<64x64xbf16>
    %cst_35 = arith.constant dense<0.000000e+00> : vector<64x64xf32>
    %64 = tpu.matmul %62, %63, %cst_35 {dimension_numbers = #tpu.dot_dimension_numbers<[1], [0], [0], [1], [0, 0, 1, 1], [], []>} : vector<64x64xbf16>, vector<64x64xbf16>, vector<64x64xf32> -> vector<64x64xf32>
    %65 = arith.truncf %64 : vector<64x64xf32> to vector<64x64xbf16>
    %c0_36 = arith.constant 0 : index
    %c0_37 = arith.constant 0 : index
    %66 = vector.load %arg11[%c0_36, %c0_37] : memref<64x64xbf16, #tpu.memory_space<vmem>>, vector<64x64xbf16>
    %cst_38 = arith.constant dense<0.000000e+00> : vector<64x64xf32>
    %67 = tpu.matmul %65, %66, %cst_38 {dimension_numbers = #tpu.dot_dimension_numbers<[1], [0], [0], [1], [0, 0, 1, 1], [], []>} : vector<64x64xbf16>, vector<64x64xbf16>, vector<64x64xf32> -> vector<64x64xf32>
    %c0_39 = arith.constant 0 : index
    %c0_40 = arith.constant 0 : index
    %68 = vector.load %arg12[%c0_39, %c0_40] : memref<1x64xf32, #tpu.memory_space<vmem>>, vector<1x64xf32>
    %69 = vector.broadcast %68 : vector<1x64xf32> to vector<64x64xf32>
    %70 = arith.addf %67, %69 : vector<64x64xf32>
    %71 = arith.addf %70, %1 : vector<64x64xf32>
    %c0_41 = arith.constant 0 : index
    %c0_42 = arith.constant 0 : index
    %c0_43 = arith.constant 0 : index
    %72 = vector.load %arg13[%c0_41, %c0_42, %c0_43] : memref<1x64x64xf32, #tpu.memory_space<vmem>>, vector<1x64x64xf32>
    %73 = vector.shape_cast %72 : vector<1x64x64xf32> to vector<64x64xf32>
    %74 = vector.shape_cast %71 : vector<64x64xf32> to vector<1x64x64xf32>
    tpu.vector_store %arg13[%c0_41, %c0_42, %c0_43], %74 {strides = array<i32>} : memref<1x64x64xf32, #tpu.memory_space<vmem>>, vector<1x64x64xf32>,
    return
  }
  func.func @transform_0(%arg0: i32) -> (i32, i32, i32) {
    %c0_i32 = arith.constant 0 : i32
    %c0_i32_0 = arith.constant 0 : i32
    %c0_i32_1 = arith.constant 0 : i32
    return %arg0, %c0_i32, %c0_i32_0 : i32, i32, i32
  }
  func.func @transform_1(%arg0: i32) -> (i32, i32) {
    %c0_i32 = arith.constant 0 : i32
    %c0_i32_0 = arith.constant 0 : i32
    %c0_i32_1 = arith.constant 0 : i32
    return %c0_i32, %c0_i32_0 : i32, i32
  }
  func.func @transform_2(%arg0: i32) -> (i32, i32) {
    %c0_i32 = arith.constant 0 : i32
    %c0_i32_0 = arith.constant 0 : i32
    %c0_i32_1 = arith.constant 0 : i32
    return %c0_i32, %c0_i32_0 : i32, i32
  }
  func.func @transform_3(%arg0: i32) -> (i32, i32) {
    %c0_i32 = arith.constant 0 : i32
    %c0_i32_0 = arith.constant 0 : i32
    %c0_i32_1 = arith.constant 0 : i32
    return %c0_i32, %c0_i32_0 : i32, i32
  }
  func.func @transform_4(%arg0: i32) -> (i32, i32) {
    %c0_i32 = arith.constant 0 : i32
    %c0_i32_0 = arith.constant 0 : i32
    %c0_i32_1 = arith.constant 0 : i32
    return %c0_i32, %c0_i32_0 : i32, i32
  }
  func.func @transform_5(%arg0: i32) -> (i32, i32) {
    %c0_i32 = arith.constant 0 : i32
    %c0_i32_0 = arith.constant 0 : i32
    %c0_i32_1 = arith.constant 0 : i32
    return %c0_i32, %c0_i32_0 : i32, i32
  }
  func.func @transform_6(%arg0: i32) -> (i32, i32) {
    %c0_i32 = arith.constant 0 : i32
    %c0_i32_0 = arith.constant 0 : i32
    %c0_i32_1 = arith.constant 0 : i32
    return %c0_i32, %c0_i32_0 : i32, i32
  }
  func.func @transform_7(%arg0: i32) -> (i32, i32) {
    %c0_i32 = arith.constant 0 : i32
    %c0_i32_0 = arith.constant 0 : i32
    %c0_i32_1 = arith.constant 0 : i32
    return %c0_i32, %c0_i32_0 : i32, i32
  }
  func.func @transform_8(%arg0: i32) -> (i32, i32) {
    %c0_i32 = arith.constant 0 : i32
    %c0_i32_0 = arith.constant 0 : i32
    %c0_i32_1 = arith.constant 0 : i32
    return %c0_i32, %c0_i32_0 : i32, i32
  }
  func.func @transform_9(%arg0: i32) -> (i32, i32) {
    %c0_i32 = arith.constant 0 : i32
    %c0_i32_0 = arith.constant 0 : i32
    %c0_i32_1 = arith.constant 0 : i32
    return %c0_i32, %c0_i32_0 : i32, i32
  }
  func.func @transform_10(%arg0: i32) -> (i32, i32) {
    %c0_i32 = arith.constant 0 : i32
    %c0_i32_0 = arith.constant 0 : i32
    %c0_i32_1 = arith.constant 0 : i32
    return %c0_i32, %c0_i32_0 : i32, i32
  }
  func.func @transform_11(%arg0: i32) -> (i32, i32) {
    %c0_i32 = arith.constant 0 : i32
    %c0_i32_0 = arith.constant 0 : i32
    %c0_i32_1 = arith.constant 0 : i32
    return %c0_i32, %c0_i32_0 : i32, i32
  }
  func.func @transform_12(%arg0: i32) -> (i32, i32, i32) {
    %c0_i32 = arith.constant 0 : i32
    %c0_i32_0 = arith.constant 0 : i32
    %c0_i32_1 = arith.constant 0 : i32
    return %arg0, %c0_i32, %c0_i32_0 : i32, i32, i32
  }
}

</mosaic_0001>

<bundles_post_ra>
// kernel: res_att_block.3
= control target key start
LH: loop header
LB: loop body
LE: loop exit
PB: predicated region body
PF: predicated region fallthrough
CT: control target
= control target key end

     0   :  { %s1969_s0 = inlined_call_operand.vmem [shape: f32[2,64,64], index: 0, kind: input, shape index: {}]   ;;  %s1970_s1 = inlined_call_operand.vmem [shape: f32[1,64], index: 1, kind: input, shape index: {}]   ;;  %s1971_s2 = inlined_call_operand.vmem [shape: f32[1,64], index: 2, kind: input, shape index: {}]   ;;  %s1972_s3 = inlined_call_operand.vmem [shape: f32[64,32], index: 3, kind: input, shape index: {}]   ;;  %s1973_s4 = inlined_call_operand.vmem [shape: bf16[64,64], index: 4, kind: input, shape index: {}]   ;;  %s1974_s5 = inlined_call_operand.vmem [shape: f32[1,64], index: 5, kind: input, shape index: {}]   ;;  %s1975_s6 = inlined_call_operand.vmem [shape: bf16[64,64], index: 6, kind: input, shape index: {}]   ;;  %s1976_s7 = inlined_call_operand.vmem [shape: f32[1,64], index: 7, kind: input, shape index: {}]   ;;  %s1977_s8 = inlined_call_operand.vmem [shape: bf16[64,64], index: 8, kind: input, shape index: {}]   ;;  %s1978_s9 = inlined_call_operand.vmem [shape: f32[1,64], index: 9, kind: input, shape index: {}]   ;;  %s1979_s10 = inlined_call_operand.vmem [shape: bf16[64,64], index: 10, kind: input, shape index: {}]   ;;  %s1980_s11 = inlined_call_operand.vmem [shape: f32[1,64], index: 11, kind: input, shape index: {}]   ;;  %s1981_s12 = inlined_call_operand.hbm [shape: f32[2,64,64], index: 12, kind: output, shape index: {}]  }
   0x1   :  { %1982 = sst [smem:[#allocation5_spill]] %s1969_s0 }
   0x2   :  { %1983 = sst [smem:[#allocation6_spill]] %s1970_s1 }
   0x3   :  { %17 = vsyncpa [#allocation3], 0 }
   0x4   :  { %19 = vsyncpa [#allocation3 + $0x1], 0  ;;  %s1593_s21 = smov 0   ;;  %s1595_s22 = smov 0  }
   0x5   :  { %s1597_s23 = smov 0   ;;  %s1599_s24 = smov 0  }
   0x6 LB: > { %s1614_s25 = sadd.s32 4294967295, %s1524_s24   ;;  %s1243_s26 = sadd.s32 4294967294, %s1524_s24   ;;  %s1524_s24 = sphi %s1599_s24, %s1991_s24   ;;  %s1520_s23 = sphi %s1597_s23, %s1990_s23   ;;  %s1516_s22 = sphi %s1595_s22, %s1989_s22   ;;  %s1512_s21 = sphi %s1593_s21, %s1988_s21  }
   0x7   : > { %s1618_s27 = sadd.s32 1, %s1524_s24   ;;  %s289_s28 = sadd.s32 1, %s1520_s23 }
   0x8   : > { %s286_s29 = ssub.s32 %s1524_s24, %s1618_s27  ;;  %p299_p0 = scmp.ne.s32.totalorder %s1520_s23, %s1516_s22 }
   0x9   : > { %p287_p1 = scmp.eq.s32.totalorder %s286_s29, 0  ;;  %p300_p2 = scmp.eq.s32.totalorder %s1614_s25, 1 }
   0xa   : > { %p305_p3 = scmp.ne.s32.totalorder %s1516_s22, %s1512_s21  ;;  %p306_p4 = scmp.eq.s32.totalorder %s1243_s26, 1 }
   0xb   : > { %s1629_s30 = scalar_select %p287_p1, %s1520_s23, %s289_s28  }
   0xc   : > { %p1631_p5 = por %p300_p2, %p299_p0  ;;  %p1635_p6 = por %p306_p4, %p305_p3 }
   0xd   : > { %p1246_p7 = scmp.ge.s32.totalorder %s1524_s24, 1  ;;  %p365_p8 = scmp.lt.s32.totalorder %s1524_s24, 3 }
   0xf   : > { %p366_p9 = pnand %p1246_p7, %p365_p8 }
  0x10   : > { %p407_p10 = scmp.lt.s32.totalorder (!%p366_p9), %s1614_s25, 1  ;;  %s1986_s0 = sld [smem:[#allocation5_spill]] (!%p366_p9) }
  0x11   : > { %369 = sbr.rel (%p366_p9) target bundleno = 1585 (0x631), region = 68  ;;  %s1987_s1 = sld [smem:[#allocation6_spill]] (!%p366_p9) }
  0x12   : > { %s1380_s16 = sshll.u32 (!%p366_p9), %s1614_s25, 6  ;;  %s1482_s17 = scalar_lea.hbm (!%p366_p9), %s1981_s12, 128 }
  0x13   : > { %s1177_s18 = scalar_lea.hbm (!%p366_p9), %s1981_s12, %s1380_s16 }
  0x16   : > { %v1644_v0 = vld [vmem:[%s1972_s3 + $0x38] sm:$0xff]  ;;  %v1649_v1 = vld [vmem:[%s1972_s3 + $0x30] sm:$0xff]  ;;  %v1656_v2 = vld [vmem:[%s1972_s3 + $0x28] sm:$0xff]  ;;  %s408_s26 = scalar_select %p407_p10, %s1614_s25, 1  ;;  %vm431_vm0 = vcmask 523264   ;;  %vm477_vm1 = vcmask 261120  }
  0x17   : > { %464 = vmatpush.msra.mxu1 %v1644_v0  ;;  %1261 = vmatpush.xpose.msk.msra.mxu3 %vm477_vm1, %v1644_v0  ;;  %v427_v3 = vld [vmem:[%s1972_s3 + $0x20] sm:$0xff]  ;;  %v426_v4 = vld [vmem:[%s1972_s3 + $0x18] sm:$0xff]  ;;  %v425_v12 = vld [vmem:[%s1972_s3 + $0x10] sm:$0xff] }
  0x18   : > { %s1363_s15 = sshll.u32 %s408_s26, 6  ;;  %v424_v16 = vld [vmem:[%s1972_s3 + $0x8] sm:$0xff]  ;;  %v423_v20 = vld [vmem:[%s1972_s3] sm:$0xff]  ;;  %s1180_s26 = sshll.u32 %s1177_s18, 4  ;;  %s1181_s26 = int_to_ptr.hbm [resolvable:$true] %s1180_s26 }
  0x19   : > { %465 = vmatpush.msra.mxu1 %v1649_v1  ;;  %s411_s20 = scalar_lea.vmem %s1986_s0, %s1363_s15  ;;  %s1476_s28 = sshra.s32 %s1181_s26, 4  ;;  %s1477_s28 = int_to_ptr.hbm [resolvable:$true] %s1476_s28 }
  0x1a   : > { %v1672_v5 = vld [vmem:[%s411_s20] sm:$0xff]  ;;  %v1674_v6 = vld [vmem:[%s411_s20 + $0x8] sm:$0xff]  ;;  %v1676_v7 = vld [vmem:[%s411_s20 + $0x10] sm:$0xff]  ;;  %p1483_p0 = scmp.lt.s32.totalorder %s1477_s28, %s1981_s12 }
  0x1b   : > { %466 = vmatpush.msra.mxu1 %v1656_v2  ;;  %v1678_v8 = vld [vmem:[%s411_s20 + $0x18] sm:$0xff]  ;;  %v432_v9 = vsel %vm431_vm0, %v1672_v5, 0.0  ;;  %v433_v10 = vsel %vm431_vm0, %v1674_v6, 0.0  ;;  %v435_v11 = vsel %vm431_vm0, %v1676_v7, 0.0  ;;  %1262 = vmatpush.xpose.msk.msra.mxu3 %vm477_vm1, %v1649_v1  ;;  %v1691_v13 = vld [vmem:[%s411_s20 + $0x20] sm:$0xff]  ;;  %v1698_v17 = vld [vmem:[%s411_s20 + $0x28] sm:$0xff] }
  0x1c   : > { %v434_v14 = vadd.f32 %v433_v10, %v432_v9  ;;  %v437_v15 = vsel %vm431_vm0, %v1678_v8, 0.0  ;;  %v439_v19 = vsel %vm431_vm0, %v1691_v13, 0.0  ;;  %v1707_v21 = vld [vmem:[%s411_s20 + $0x30] sm:$0xff]  ;;  %v441_v23 = vsel %vm431_vm0, %v1698_v17, 0.0  ;;  %v1711_v24 = vld [vmem:[%s411_s20 + $0x38] sm:$0xff]  ;;  %s404_s20 = sand.u32 1, %s1516_s22  }
  0x1d   : > { %467 = vmatpush.msra.mxu1 %v427_v3  ;;  %v443_v26 = vsel %vm431_vm0, %v1707_v21, 0.0  ;;  %v445_v28 = vsel %vm431_vm0, %v1711_v24, 0.0  ;;  %s1247_s29 = sshll.u32 %s404_s20, 6  ;;  %s1166_s25 = scalar_lea.sflag [#allocation3], %s404_s20 }
  0x1e   : > { %v436_v18 = vadd.f32 %v435_v11, %v434_v14  ;;  %s1910_s15 = scalar_lea.vmem [#allocation2], %s1247_s29  ;;  %s1478_s29 = scalar_lea.hbm %s1477_s28, 64 }
  0x1f   : > { %468 = vmatpush.msra.mxu1 %v426_v4  ;;  %1263 = vmatpush.xpose.msk.msra.mxu3 %vm477_vm1, %v1656_v2  ;;  %s1178_s19 = sshll.u32 %s1910_s15, 4  ;;  %p1479_p11 = scmp.ne.s32.totalorder %s1477_s28, %s1478_s29  ;;  %s1179_s19 = int_to_ptr.vmem [resolvable:$true] %s1178_s19 }
  0x20   : > { %v438_v22 = vadd.f32 %v437_v15, %v436_v18  ;;  %p1484_p1 = scmp.lt.s32.totalorder %s1482_s17, %s1478_s29 }
  0x21   : > { %469 = vmatpush.msra.mxu1 %v425_v12  ;;  %p1480_p12 = pnand %p1479_p11, %p1631_p5 }
  0x22   : > { %v440_v25 = vadd.f32 %v439_v19, %v438_v22  ;;  %p1485_p2 = por %p1484_p1, %p1483_p0 }
  0x23   : > { %470 = vmatpush.msra.mxu1 %v424_v16  ;;  %1264 = vmatpush.xpose.msk.msra.mxu3 %vm477_vm1, %v427_v3  ;;  %p1481_p13 = pneg %p1480_p12 }
  0x24   : > { %v442_v27 = vadd.f32 %v441_v23, %v440_v25  ;;  %v1367_v23 = vld [vmem:[%s1973_s4 + $0x18] sm:$0xff] }
  0x25   : > { %471 = vmatpush.msra.mxu1 %v423_v20  ;;  %v1371_v25 = vld [vmem:[%s1975_s6 + $0x18] sm:$0xff]  ;;  %707 = vmatpush.bf16.msra.mxu0 %v1367_v23  ;;  %p1486_p3 = pnand %p1485_p2, %p1481_p13 }
  0x26   : > { %v444_v29 = vadd.f32 %v443_v26, %v442_v27  ;;  %v1375_v26 = vld [vmem:[%s1977_s8 + $0x18] sm:$0xff]  ;;  %772 = vmatpush.bf16.msra.mxu2 %v1371_v25  ;;  %v1366_v27 = vld [vmem:[%s1973_s4 + $0x10] sm:$0xff] }
  0x27   : > { %1251 = vmatpush.xpose.msk.msrb.mxu1 %vm477_vm1, %v1644_v0  ;;  %1265 = vmatpush.xpose.msk.msra.mxu3 %vm477_vm1, %v426_v4 }
  0x28   : > { %v446_v30 = vadd.f32 %v445_v28, %v444_v29  ;;  %v1370_v28 = vld [vmem:[%s1975_s6 + $0x10] sm:$0xff] }
  0x29   : > { %v1374_v29 = vld [vmem:[%s1977_s8 + $0x10] sm:$0xff]  ;;  %708 = vmatpush.bf16.msra.mxu0 %v1366_v27 }
  0x2a   : > { %v447_v31 = vrot.slane %v446_v30, 4  ;;  %773 = vmatpush.bf16.msra.mxu2 %v1370_v28 }
  0x2b   : > { %1252 = vmatpush.xpose.msk.msrb.mxu1 %vm477_vm1, %v1649_v1  ;;  %1266 = vmatpush.xpose.msk.msra.mxu3 %vm477_vm1, %v425_v12 }
  0x2c   : > { %v448_v32 = vadd.f32 %v447_v31, %v446_v30  ;;  %v1365_v30 = vld [vmem:[%s1973_s4 + $0x8] sm:$0xff] }
  0x2d   : > { %v1369_v31 = vld [vmem:[%s1975_s6 + $0x8] sm:$0xff]  ;;  %709 = vmatpush.bf16.msra.mxu0 %v1365_v30 }
  0x2e   : > { %v449_v33 = vrot.slane %v448_v32, 2  ;;  %774 = vmatpush.bf16.msra.mxu2 %v1369_v31 }
  0x2f   : > { %1253 = vmatpush.xpose.msk.msrb.mxu1 %vm477_vm1, %v1656_v2  ;;  %1267 = vmatpush.xpose.msk.msra.mxu3 %vm477_vm1, %v424_v16 }
  0x30   : > { %v450_v34 = vadd.f32 %v449_v33, %v448_v32  ;;  %v1373_v32 = vld [vmem:[%s1977_s8 + $0x8] sm:$0xff]  ;;  %v1364_v33 = vld [vmem:[%s1973_s4] sm:$0xff] }
  0x31   : > { %710 = vmatpush.bf16.msra.mxu0 %v1364_v33 }
  0x32   : > { %v451_v35 = vrot.slane %v450_v34, 1 }
  0x33   : > { %1254 = vmatpush.xpose.msk.msrb.mxu1 %vm477_vm1, %v427_v3  ;;  %1268 = vmatpush.xpose.msk.msra.mxu3 %vm477_vm1, %v423_v20 }
  0x34   : > { %v452_v36 = vadd.f32 %v451_v35, %v450_v34  ;;  %v1368_v34 = vld [vmem:[%s1975_s6] sm:$0xff] }
  0x35   : > { %v1372_v35 = vld [vmem:[%s1977_s8] sm:$0xff]  ;;  %775 = vmatpush.bf16.msra.mxu2 %v1368_v34 }
  0x36   : > { %1250 = vmatmul.msk.f32.vlgmr.msra.gmra.mxu1 %vm431_vm0, %v452_v36 }
  0x37   : > { %1255 = vmatpush.xpose.msk.msrb.mxu1 %vm477_vm1, %v426_v4 }
  0x3b   : > { %1256 = vmatpush.xpose.msk.msrb.mxu1 %vm477_vm1, %v425_v12 }
  0x3f   : > { %1257 = vmatpush.xpose.msk.msrb.mxu1 %vm477_vm1, %v424_v16 }
  0x43   : > { %1258 = vmatpush.xpose.msk.msrb.mxu1 %vm477_vm1, %v423_v20 }
  0x47   : > { %574 = vmatpush.msra.mxu1 %v1644_v0 }
  0x49   : > { %575 = vmatpush.msra.mxu1 %v1649_v1 }
  0x4b   : > { %576 = vmatpush.msra.mxu1 %v1656_v2 }
  0x4d   : > { %577 = vmatpush.msra.mxu1 %v427_v3 }
  0x4f   : > { %578 = vmatpush.msra.mxu1 %v426_v4 }
  0x51   : > { %579 = vmatpush.msra.mxu1 %v425_v12 }
  0x53   : > { %580 = vmatpush.msra.mxu1 %v424_v16 }
  0x55   : > { %581 = vmatpush.msra.mxu1 %v423_v20 }
  0xb3   : > { %v473_v37 = vpop.f32.mrf.mxu1 }
  0xb4   : > { %v476_v38 = vmul.f32 0.0078125, %v473_v37 }
  0xb6   : > { %1259 = vmatmul.msk.f32.vlgmr.msrb.gmra.mxu1 %vm477_vm1, %v476_v38 }
  0xb7   : > { %837 = vmatpush.bf16.msrb.mxu1 %v1375_v26 }
  0xbb   : > { %838 = vmatpush.bf16.msrb.mxu1 %v1374_v29 }
  0xbf   : > { %839 = vmatpush.bf16.msrb.mxu1 %v1373_v32 }
  0xc3   : > { %840 = vmatpush.bf16.msrb.mxu1 %v1372_v35 }
 0x133   : > { %v522_v39 = vpop.f32.mrf.mxu1 }
 0x134   : > { %v525_v40 = vperm.slane %v522_v39, 0 }
 0x136   : > { %v1739_v41 = vsub.f32 %v1672_v5, %v525_v40  ;;  %v1742_v42 = vsub.f32 %v1674_v6, %v525_v40  ;;  %v1745_v43 = vsub.f32 %v1676_v7, %v525_v40  ;;  %v1748_v44 = vsub.f32 %v1678_v8, %v525_v40 }
 0x137   : > { %v1751_v45 = vsub.f32 %v1691_v13, %v525_v40  ;;  %v1760_v49 = vsub.f32 %v1698_v17, %v525_v40  ;;  %v1767_v54 = vsub.f32 %v1707_v21, %v525_v40  ;;  %v1773_v58 = vsub.f32 %v1711_v24, %v525_v40 }
 0x138   : > { %v534_v46 = vmul.f32 %v1739_v41, %v1739_v41  ;;  %v535_v47 = vmul.f32 %v1742_v42, %v1742_v42  ;;  %v536_v48 = vmul.f32 %v1745_v43, %v1745_v43  ;;  %v537_v50 = vmul.f32 %v1748_v44, %v1748_v44 }
 0x139   : > { %v538_v55 = vmul.f32 %v1751_v45, %v1751_v45  ;;  %v539_v59 = vmul.f32 %v1760_v49, %v1760_v49  ;;  %v540_v62 = vmul.f32 %v1767_v54, %v1767_v54  ;;  %v541_v1 = vmul.f32 %v1773_v58, %v1773_v58 }
 0x13a   : > { %v542_v51 = vsel %vm431_vm0, %v534_v46, 0.0  ;;  %v543_v52 = vsel %vm431_vm0, %v535_v47, 0.0  ;;  %v545_v56 = vsel %vm431_vm0, %v536_v48, 0.0  ;;  %v547_v60 = vsel %vm431_vm0, %v537_v50, 0.0 }
 0x13b   : > { %v544_v53 = vadd.f32 %v543_v52, %v542_v51  ;;  %v549_v63 = vsel %vm431_vm0, %v538_v55, 0.0  ;;  %v551_v2 = vsel %vm431_vm0, %v539_v59, 0.0  ;;  %v553_v4 = vsel %vm431_vm0, %v540_v62, 0.0  ;;  %v1422_v52 = vld [vmem:[%s1987_s1] ss:$0 sm:$0xff] }
 0x13c   : > { %v555_v10 = vsel %vm431_vm0, %v541_v1, 0.0 }
 0x13d   : > { %v546_v57 = vadd.f32 %v545_v56, %v544_v53  ;;  %v1423_v56 = vld [vmem:[%s1971_s2] ss:$0 sm:$0xff] }
 0x13f   : > { %v548_v61 = vadd.f32 %v547_v60, %v546_v57 }
 0x141   : > { %v550_v0 = vadd.f32 %v549_v63, %v548_v61 }
 0x143   : > { %v552_v3 = vadd.f32 %v551_v2, %v550_v0 }
 0x145   : > { %v554_v9 = vadd.f32 %v553_v4, %v552_v3 }
 0x147   : > { %v556_v11 = vadd.f32 %v555_v10, %v554_v9 }
 0x149   : > { %v557_v12 = vrot.slane %v556_v11, 4 }
 0x14b   : > { %v558_v14 = vadd.f32 %v557_v12, %v556_v11 }
 0x14d   : > { %v559_v15 = vrot.slane %v558_v14, 2 }
 0x14f   : > { %v560_v16 = vadd.f32 %v559_v15, %v558_v14 }
 0x151   : > { %v561_v18 = vrot.slane %v560_v16, 1 }
 0x153   : > { %v562_v19 = vadd.f32 %v561_v18, %v560_v16 }
 0x155   : > { %1260 = vmatmul.msk.f32.vlgmr.msra.gmra.mxu1 %vm431_vm0, %v562_v19 }
 0x1d2   : > { %v583_v20 = vpop.f32.mrf.mxu1 }
 0x1d3   : > { %v586_v22 = vmul.f32 0.0078125, %v583_v20 }
 0x1d5   : > { %1269 = vmatmul.msk.f32.vlgmr.msra.gmra.mxu3 %vm477_vm1, %v586_v22 }
 0x258   : > { %v607_v36 = vpop.f32.mrf.mxu3 }
 0x259   : > { %v608_v37 = vadd.f32 1e-05, %v607_v36 }
 0x25b   : > { %1428 = vrsqrt.f32 %v608_v37  ;;  %vm616_vm3 = vweird.f32 %v608_v37 }
 0x261   : > { %v1429_v38 = vpop.eup %1428 }
 0x262   : > { %v611_v39 = vmul.f32 %v1429_v38, %v608_v37  ;;  %vm617_vm2 = vweird.f32 %v1429_v38 }
 0x263   : > { %vm618_vm4 = vmor %vm616_vm3, %vm617_vm2 }
 0x264   : > { %v612_v40 = vmul.f32 %v1429_v38, %v611_v39 }
 0x266   : > { %v613_v46 = vmul.f32 0.5, %v612_v40 }
 0x268   : > { %v614_v47 = vsub.f32 1.5, %v613_v46 }
 0x26a   : > { %v615_v48 = vmul.f32 %v1429_v38, %v614_v47 }
 0x26c   : > { %v619_v50 = vsel %vm618_vm4, %v1429_v38, %v615_v48  ;;  %v1425_v38 = vld [vmem:[%s1978_s9] ss:$0 sm:$0xff] }
 0x26d   : > { %v620_v51 = vperm.slane %v619_v50, 0 }
 0x26f   : > { %v621_v53 = vmul.f32 %v620_v51, %v1739_v41  ;;  %v622_v55 = vmul.f32 %v620_v51, %v1742_v42  ;;  %v623_v63 = vmul.f32 %v620_v51, %v1745_v43  ;;  %v624_v41 = vmul.f32 %v620_v51, %v1748_v44 }
 0x270   : > { %v625_v4 = vmul.f32 %v620_v51, %v1751_v45  ;;  %v626_v9 = vmul.f32 %v620_v51, %v1760_v49  ;;  %v627_v14 = vmul.f32 %v620_v51, %v1767_v54  ;;  %v628_v15 = vmul.f32 %v620_v51, %v1773_v58  ;;  %v1426_v54 = vld [vmem:[%s1976_s7] ss:$0 sm:$0xff] }
 0x271   : > { %v632_v57 = vmul.f32 %v1422_v52, %v621_v53  ;;  %v633_v59 = vmul.f32 %v1422_v52, %v622_v55  ;;  %v634_v42 = vmul.f32 %v1422_v52, %v623_v63  ;;  %v635_v0 = vmul.f32 %v1422_v52, %v624_v41 }
 0x272   : > { %v636_v10 = vmul.f32 %v1422_v52, %v625_v4  ;;  %v637_v11 = vmul.f32 %v1422_v52, %v626_v9  ;;  %v638_v16 = vmul.f32 %v1422_v52, %v627_v14  ;;  %v639_v18 = vmul.f32 %v1422_v52, %v628_v15 }
 0x273   : > { %v643_v60 = vadd.f32 %v1423_v56, %v632_v57  ;;  %v644_v61 = vadd.f32 %v1423_v56, %v633_v59  ;;  %v645_v1 = vadd.f32 %v1423_v56, %v634_v42  ;;  %v646_v2 = vadd.f32 %v1423_v56, %v635_v0 }
 0x274   : > { %v647_v43 = vadd.f32 %v1423_v56, %v636_v10  ;;  %v648_v12 = vadd.f32 %v1423_v56, %v637_v11  ;;  %v649_v45 = vadd.f32 %v1423_v56, %v638_v16  ;;  %v650_v19 = vadd.f32 %v1423_v56, %v639_v18 }
 0x275   : > { %v651_v62 = vpack.c.bf16 %v644_v61, %v643_v60  ;;  %v652_v3 = vpack.c.bf16 %v646_v2, %v645_v1 }
 0x276   : > { %v653_v44 = vpack.c.bf16 %v648_v12, %v647_v43  ;;  %v654_v49 = vpack.c.bf16 %v650_v19, %v649_v45 }
 0x277   : > { %1286 = vmatmul.msk.bf16.vlgmr.msra.gmra.mxu0 %vm431_vm0, %v651_v62  ;;  %1306 = vmatmul.msk.bf16.vlgmr.msra.gmra.mxu2 %vm431_vm0, %v651_v62 }
 0x278   : > { %1326 = vmatmul.msk.bf16.vlgmr.msrb.gmra.mxu1 %vm431_vm0, %v651_v62 }
 0x287   : > { %1287 = vmatmul.msk.bf16.gmra.mxu0 %vm431_vm0, %v652_v3  ;;  %1307 = vmatmul.msk.bf16.gmra.mxu2 %vm431_vm0, %v652_v3 }
 0x288   : > { %1327 = vmatmul.msk.bf16.gmra.mxu1 %vm431_vm0, %v652_v3 }
 0x297   : > { %1288 = vmatmul.msk.bf16.gmra.mxu0 %vm431_vm0, %v653_v44  ;;  %1308 = vmatmul.msk.bf16.gmra.mxu2 %vm431_vm0, %v653_v44 }
 0x298   : > { %1328 = vmatmul.msk.bf16.gmra.mxu1 %vm431_vm0, %v653_v44  ;;  %v1424_v44 = vld [vmem:[%s1974_s5] ss:$0 sm:$0xff] }
 0x2a7   : > { %1289 = vmatmul.msk.bf16.gmra.mxu0 %vm431_vm0, %v654_v49  ;;  %1309 = vmatmul.msk.bf16.gmra.mxu2 %vm431_vm0, %v654_v49 }
 0x2a8   : > { %1329 = vmatmul.msk.bf16.gmra.mxu1 %vm431_vm0, %v654_v49 }
 0x2f4   : > { %v712_v62 = vpop.f32.mrf.mxu0 }
 0x2f5   : > { %v842_v20 = vpop.f32.mrf.mxu1  ;;  %v713_v16 = vadd.f32 %v1424_v44, %v712_v62 }
 0x2f6   : > { %v843_v0 = vadd.f32 %v1425_v38, %v842_v20 }
 0x2fa   : > { %v777_v22 = vpop.f32.mrf.mxu2 }
 0x2fb   : > { %v778_v58 = vadd.f32 %v1426_v54, %v777_v22 }
 0x2fc   : > { %v714_v10 = vpop.f32.mrf.mxu0 }
 0x2fd   : > { %v844_v23 = vpop.f32.mrf.mxu1  ;;  %v715_v15 = vadd.f32 %v1424_v44, %v714_v10 }
 0x2fe   : > { %v845_v63 = vadd.f32 %v1425_v38, %v844_v23 }
 0x2ff   : > { %v862_v18 = vpack.c.bf16 %v715_v15, %v713_v16 }
 0x300   : > { %v1023_v2 = vpack.c.bf16 %v845_v63, %v843_v0 }
 0x302   : > { %v779_v25 = vpop.f32.mrf.mxu2 }
 0x303   : > { %v780_v26 = vadd.f32 %v1426_v54, %v779_v25 }
 0x304   : > { %v717_v12 = vpop.f32.mrf.mxu0 }
 0x305   : > { %v847_v27 = vpop.f32.mrf.mxu1  ;;  %v866_v28 = vpack.c.bf16 %v780_v26, %v778_v58  ;;  %v718_v20 = vadd.f32 %v1424_v44, %v717_v12 }
 0x306   : > { %v848_v59 = vadd.f32 %v1425_v38, %v847_v27 }
 0x307   : > { %v883_v14 = vsel %vm431_vm0, %v866_v28, 0 }
 0x30a   : > { %v782_v29 = vpop.f32.mrf.mxu2 }
 0x30b   : > { %v783_v9 = vadd.f32 %v1426_v54, %v782_v29 }
 0x30c   : > { %v719_v45 = vpop.f32.mrf.mxu0 }
 0x30d   : > { %v849_v30 = vpop.f32.mrf.mxu1  ;;  %v720_v49 = vadd.f32 %v1424_v44, %v719_v45 }
 0x30e   : > { %v850_v55 = vadd.f32 %v1425_v38, %v849_v30 }
 0x30f   : > { %v863_v22 = vpack.c.bf16 %v720_v49, %v718_v20 }
 0x310   : > { %v1024_v41 = vpack.c.bf16 %v850_v55, %v848_v59 }
 0x312   : > { %v784_v31 = vpop.f32.mrf.mxu2 }
 0x313   : > { %v785_v3 = vadd.f32 %v1426_v54, %v784_v31 }
 0x314   : > { %v722_v19 = vpop.f32.mrf.mxu0 }
 0x315   : > { %v852_v32 = vpop.f32.mrf.mxu1  ;;  %v867_v11 = vpack.c.bf16 %v785_v3, %v783_v9  ;;  %v723_v25 = vadd.f32 %v1424_v44, %v722_v19 }
 0x316   : > { %v853_v50 = vadd.f32 %v1425_v38, %v852_v32 }
 0x317   : > { %v886_v43 = vsel %vm431_vm0, %v867_v11, 0 }
 0x31a   : > { %v787_v33 = vpop.f32.mrf.mxu2 }
 0x31b   : > { %v788_v42 = vadd.f32 %v1426_v54, %v787_v33 }
 0x31c   : > { %v724_v23 = vpop.f32.mrf.mxu0 }
 0x31d   : > { %v854_v34 = vpop.f32.mrf.mxu1 }
 0x31e   : > { %v855_v47 = vadd.f32 %v1425_v38, %v854_v34 }
 0x320   : > { %v1025_v56 = vpack.c.bf16 %v855_v47, %v853_v50 }
 0x322   : > { %v789_v35 = vpop.f32.mrf.mxu2 }
 0x323   : > { %v790_v60 = vadd.f32 %v1426_v54, %v789_v35 }
 0x324   : > { %v727_v58 = vpop.f32.mrf.mxu0 }
 0x325   : > { %v857_v36 = vpop.f32.mrf.mxu1  ;;  %v868_v1 = vpack.c.bf16 %v790_v60, %v788_v42  ;;  %v728_v29 = vadd.f32 %v1424_v44, %v727_v58 }
 0x326   : > { %v858_v40 = vadd.f32 %v1425_v38, %v857_v36 }
 0x327   : > { %v889_v4 = vsel %vm431_vm0, %v868_v1, 0 }
 0x32a   : > { %v792_v37 = vpop.f32.mrf.mxu2 }
 0x32b   : > { %v793_v52 = vadd.f32 %v1426_v54, %v792_v37 }
 0x32c   : > { %v729_v27 = vpop.f32.mrf.mxu0 }
 0x32d   : > { %v859_v39 = vpop.f32.mrf.mxu1  ;;  %v730_v28 = vadd.f32 %v1424_v44, %v729_v27 }
 0x32e   : > { %v860_v46 = vadd.f32 %v1425_v38, %v859_v39 }
 0x32f   : > { %v865_v30 = vpack.c.bf16 %v730_v28, %v728_v29 }
 0x330   : > { %v1026_v48 = vpack.c.bf16 %v860_v46, %v858_v40 }
 0x332   : > { %1043 = vmatpush.bf16.msrb.mxu0 %v1026_v48  ;;  %v794_v51 = vpop.f32.mrf.mxu2 }
 0x333   : > { %v795_v53 = vadd.f32 %v1426_v54, %v794_v51  ;;  %v725_v54 = vadd.f32 %v1424_v44, %v724_v23 }
 0x335   : > { %v869_v57 = vpack.c.bf16 %v795_v53, %v793_v52  ;;  %v864_v26 = vpack.c.bf16 %v725_v54, %v723_v25 }
 0x336   : > { %1044 = vmatpush.bf16.msrb.mxu0 %v1025_v56 }
 0x337   : > { %v892_v61 = vsel %vm431_vm0, %v869_v57, 0 }
 0x338   : > { %898 = vmatpush.bf16.xpose.msrb.mxu3 %v892_v61 }
 0x33a   : > { %1045 = vmatpush.bf16.msrb.mxu0 %v1024_v41 }
 0x33e   : > { %1046 = vmatpush.bf16.msrb.mxu0 %v1023_v2 }
 0x340   : > { %899 = vmatpush.bf16.xpose.msrb.mxu3 %v889_v4 }
 0x348   : > { %900 = vmatpush.bf16.xpose.msrb.mxu3 %v886_v43 }
 0x350   : > { %901 = vmatpush.bf16.xpose.msrb.mxu3 %v883_v14 }
 0x357   : > { %1330 = vmatmul.msk.bf16.vlgmr.msrb.gmra.mxu3 %vm431_vm0, %v862_v18 }
 0x367   : > { %1331 = vmatmul.msk.bf16.gmra.mxu3 %vm431_vm0, %v863_v22 }
 0x377   : > { %1332 = vmatmul.msk.bf16.gmra.mxu3 %vm431_vm0, %v864_v26 }
 0x387   : > { %1333 = vmatmul.msk.bf16.gmra.mxu3 %vm431_vm0, %v865_v30 }
 0x3da   : > { %v903_v31 = vpop.f32.mrf.mxu3 }
 0x3db   : > { %v923_v32 = vmul.f32 0.125, %v903_v31 }
 0x3dd   : > { %v931_v33 = vsel %vm431_vm0, %v923_v32, -inf }
 0x3de   : > { %932 = vmax.xlane.f32.xlu0 %v931_v33 }
 0x3e2   : > { %v905_v34 = vpop.f32.mrf.mxu3 }
 0x3e3   : > { %v924_v35 = vmul.f32 0.125, %v905_v34 }
 0x3e5   : > { %v934_v36 = vsel %vm431_vm0, %v924_v35, -inf }
 0x3e6   : > { %935 = vmax.xlane.f32.xlu0 %v934_v36 }
 0x3ea   : > { %v908_v37 = vpop.f32.mrf.mxu3 }
 0x3eb   : > { %v925_v38 = vmul.f32 0.125, %v908_v37 }
 0x3ed   : > { %v937_v39 = vsel %vm431_vm0, %v925_v38, -inf }
 0x3ee   : > { %938 = vmax.xlane.f32.xlu1 %v937_v39 }
 0x3f2   : > { %v910_v40 = vpop.f32.mrf.mxu3 }
 0x3f3   : > { %v926_v46 = vmul.f32 0.125, %v910_v40 }
 0x3f5   : > { %v940_v47 = vsel %vm431_vm0, %v926_v46, -inf }
 0x3f6   : > { %941 = vmax.xlane.f32.xlu1 %v940_v47 }
 0x3fa   : > { %v913_v48 = vpop.f32.mrf.mxu3 }
 0x3fb   : > { %v927_v50 = vmul.f32 0.125, %v913_v48 }
 0x3fd   : > { %v943_v51 = vsel %vm431_vm0, %v927_v50, -inf }
 0x3fe   : > { %944 = vmax.xlane.f32.xlu2 %v943_v51 }
 0x402   : > { %v915_v52 = vpop.f32.mrf.mxu3 }
 0x403   : > { %v928_v53 = vmul.f32 0.125, %v915_v52 }
 0x405   : > { %v946_v55 = vsel %vm431_vm0, %v928_v53, -inf }
 0x406   : > { %947 = vmax.xlane.f32.xlu2 %v946_v55 }
 0x40a   : > { %v918_v56 = vpop.f32.mrf.mxu3 }
 0x40b   : > { %v929_v57 = vmul.f32 0.125, %v918_v56 }
 0x40d   : > { %v949_v59 = vsel %vm431_vm0, %v929_v57, -inf }
 0x40e   : > { %950 = vmax.xlane.f32.xlu0 %v949_v59 }
 0x412   : > { %v920_v60 = vpop.f32.mrf.mxu3 }
 0x413   : > { %v930_v61 = vmul.f32 0.125, %v920_v60 }
 0x415   : > { %v952_v62 = vsel %vm431_vm0, %v930_v61, -inf }
 0x416   : > { %953 = vmax.xlane.f32.xlu1 %v952_v62  ;;  %v1379_v62 = vld [vmem:[%s1979_s10 + $0x18] sm:$0xff] }
 0x417   : > { %1124 = vmatpush.bf16.msrb.mxu2 %v1379_v62 }
 0x451   : > { %v933_v63 = vpop.xlane.xlu0 %932 }
 0x452   : > { %v955_v41 = vsub.f32 %v923_v32, %v933_v63  ;;  %v1378_v63 = vld [vmem:[%s1979_s10 + $0x10] sm:$0xff] }
 0x453   : > { %1125 = vmatpush.bf16.msrb.mxu2 %v1378_v63 }
 0x454   : > { %v963_v42 = vmul.f32 1.442695, %v955_v41 }
 0x456   : > { %1430 = vpow2.f32 %v963_v42  ;;  %v1377_v42 = vld [vmem:[%s1979_s10 + $0x8] sm:$0xff] }
 0x457   : > { %1126 = vmatpush.bf16.msrb.mxu2 %v1377_v42 }
 0x459   : > { %v936_v0 = vpop.xlane.xlu0 %935 }
 0x45a   : > { %v956_v1 = vsub.f32 %v924_v35, %v936_v0 }
 0x45c   : > { %v1431_v2 = vpop.eup %1430  ;;  %v965_v3 = vmul.f32 1.442695, %v956_v1  ;;  %v1376_v1 = vld [vmem:[%s1979_s10] sm:$0xff] }
 0x45d   : > { %v979_v4 = vsel %vm431_vm0, %v1431_v2, 0.0  ;;  %1127 = vmatpush.bf16.msrb.mxu2 %v1376_v1 }
 0x45e   : > { %1432 = vpow2.f32 %v965_v3  ;;  %980 = vadd.xlane.f32.xlu2 %v979_v4 }
 0x461   : > { %v939_v9 = vpop.xlane.xlu1 %938 }
 0x462   : > { %v957_v10 = vsub.f32 %v925_v38, %v939_v9 }
 0x464   : > { %v1433_v11 = vpop.eup %1432  ;;  %v967_v43 = vmul.f32 1.442695, %v957_v10 }
 0x465   : > { %v982_v12 = vsel %vm431_vm0, %v1433_v11, 0.0 }
 0x466   : > { %1434 = vpow2.f32 %v967_v43  ;;  %983 = vadd.xlane.f32.xlu0 %v982_v12 }
 0x469   : > { %v942_v44 = vpop.xlane.xlu1 %941 }
 0x46a   : > { %v958_v14 = vsub.f32 %v926_v46, %v942_v44 }
 0x46c   : > { %v1435_v15 = vpop.eup %1434  ;;  %v969_v16 = vmul.f32 1.442695, %v958_v14 }
 0x46d   : > { %v985_v18 = vsel %vm431_vm0, %v1435_v15, 0.0 }
 0x46e   : > { %1436 = vpow2.f32 %v969_v16  ;;  %986 = vadd.xlane.f32.xlu1 %v985_v18 }
 0x471   : > { %v945_v45 = vpop.xlane.xlu2 %944 }
 0x472   : > { %v959_v19 = vsub.f32 %v927_v50, %v945_v45 }
 0x474   : > { %v1437_v49 = vpop.eup %1436  ;;  %v971_v20 = vmul.f32 1.442695, %v959_v19 }
 0x475   : > { %v988_v22 = vsel %vm431_vm0, %v1437_v49, 0.0 }
 0x476   : > { %1438 = vpow2.f32 %v971_v20  ;;  %989 = vadd.xlane.f32.xlu2 %v988_v22 }
 0x479   : > { %v948_v23 = vpop.xlane.xlu2 %947 }
 0x47a   : > { %v960_v54 = vsub.f32 %v928_v53, %v948_v23 }
 0x47c   : > { %v1439_v25 = vpop.eup %1438  ;;  %v973_v58 = vmul.f32 1.442695, %v960_v54 }
 0x47d   : > { %v991_v26 = vsel %vm431_vm0, %v1439_v25, 0.0 }
 0x47e   : > { %1440 = vpow2.f32 %v973_v58  ;;  %992 = vadd.xlane.f32.xlu0 %v991_v26 }
 0x481   : > { %v951_v27 = vpop.xlane.xlu0 %950 }
 0x482   : > { %v961_v28 = vsub.f32 %v929_v57, %v951_v27  ;;  %v1427_v27 = vld [vmem:[%s1980_s11] ss:$0 sm:$0xff] }
 0x484   : > { %v1441_v29 = vpop.eup %1440  ;;  %v975_v30 = vmul.f32 1.442695, %v961_v28 }
 0x485   : > { %v994_v31 = vsel %vm431_vm0, %v1441_v29, 0.0 }
 0x486   : > { %1442 = vpow2.f32 %v975_v30  ;;  %995 = vadd.xlane.f32.xlu1 %v994_v31 }
 0x489   : > { %v954_v32 = vpop.xlane.xlu1 %953 }
 0x48a   : > { %v962_v33 = vsub.f32 %v930_v61, %v954_v32 }
 0x48c   : > { %v1443_v34 = vpop.eup %1442  ;;  %v977_v35 = vmul.f32 1.442695, %v962_v33 }
 0x48d   : > { %v997_v36 = vsel %vm431_vm0, %v1443_v34, 0.0 }
 0x48e   : > { %1444 = vpow2.f32 %v977_v35  ;;  %998 = vadd.xlane.f32.xlu2 %v997_v36 }
 0x494   : > { %v1445_v37 = vpop.eup %1444 }
 0x495   : > { %v1000_v38 = vsel %vm431_vm0, %v1445_v37, 0.0 }
 0x496   : > { %1001 = vadd.xlane.f32.xlu0 %v1000_v38 }
 0x4d1   : > { %v981_v39 = vpop.xlane.xlu2 %980 }
 0x4d2   : > { %1446 = vrcp.f32 %v981_v39 }
 0x4d8   : > { %v1447_v46 = vpop.eup %1446 }
 0x4d9   : > { %v984_v40 = vpop.xlane.xlu0 %983  ;;  %v1011_v48 = vmul.f32 %v1447_v46, %v1431_v2 }
 0x4da   : > { %1448 = vrcp.f32 %v984_v40 }
 0x4e0   : > { %v1449_v47 = vpop.eup %1448 }
 0x4e1   : > { %v1012_v50 = vmul.f32 %v1449_v47, %v1433_v11  ;;  %v987_v52 = vpop.xlane.xlu1 %986 }
 0x4e2   : > { %1450 = vrcp.f32 %v987_v52 }
 0x4e3   : > { %v1019_v51 = vpack.c.bf16 %v1012_v50, %v1011_v48 }
 0x4e5   : > { %1334 = vmatmul.msk.bf16.vlgmr.msrb.gmra.mxu0 %vm431_vm0, %v1019_v51 }
 0x4e8   : > { %v1451_v55 = vpop.eup %1450 }
 0x4e9   : > { %v990_v53 = vpop.xlane.xlu2 %989  ;;  %v1013_v57 = vmul.f32 %v1451_v55, %v1435_v15 }
 0x4ea   : > { %1452 = vrcp.f32 %v990_v53 }
 0x4f0   : > { %v1453_v56 = vpop.eup %1452 }
 0x4f1   : > { %v1014_v59 = vmul.f32 %v1453_v56, %v1437_v49  ;;  %v993_v61 = vpop.xlane.xlu0 %992 }
 0x4f2   : > { %1454 = vrcp.f32 %v993_v61 }
 0x4f3   : > { %v1020_v60 = vpack.c.bf16 %v1014_v59, %v1013_v57 }
 0x4f5   : > { %1335 = vmatmul.msk.bf16.gmra.mxu0 %vm431_vm0, %v1020_v60 }
 0x4f8   : > { %v1455_v0 = vpop.eup %1454 }
 0x4f9   : > { %v996_v41 = vpop.xlane.xlu1 %995  ;;  %v1015_v3 = vmul.f32 %v1455_v0, %v1439_v25 }
 0x4fa   : > { %1456 = vrcp.f32 %v996_v41 }
 0x500   : > { %v1457_v2 = vpop.eup %1456 }
 0x501   : > { %v1016_v4 = vmul.f32 %v1457_v2, %v1441_v29  ;;  %v999_v10 = vpop.xlane.xlu2 %998 }
 0x502   : > { %1458 = vrcp.f32 %v999_v10 }
 0x503   : > { %v1021_v9 = vpack.c.bf16 %v1016_v4, %v1015_v3 }
 0x505   : > { %1336 = vmatmul.msk.bf16.gmra.mxu0 %vm431_vm0, %v1021_v9 }
 0x508   : > { %v1459_v43 = vpop.eup %1458 }
 0x509   : > { %v1002_v11 = vpop.xlane.xlu0 %1001  ;;  %v1017_v44 = vmul.f32 %v1459_v43, %v1443_v34 }
 0x50a   : > { %1460 = vrcp.f32 %v1002_v11 }
 0x510   : > { %v1461_v12 = vpop.eup %1460 }
 0x511   : > { %v1018_v14 = vmul.f32 %v1461_v12, %v1445_v37 }
 0x513   : > { %v1022_v15 = vpack.c.bf16 %v1018_v14, %v1017_v44 }
 0x515   : > { %1337 = vmatmul.msk.bf16.gmra.mxu0 %vm431_vm0, %v1022_v15 }
 0x562   : > { %v1048_v16 = vpop.f32.mrf.mxu0 }
 0x56a   : > { %v1050_v18 = vpop.f32.mrf.mxu0 }
 0x56b   : > { %v1068_v45 = vpack.c.bf16 %v1050_v18, %v1048_v16 }
 0x56d   : > { %1354 = vmatmul.msk.bf16.vlgmr.msrb.gmra.mxu2 %vm431_vm0, %v1068_v45 }
 0x572   : > { %v1053_v19 = vpop.f32.mrf.mxu0 }
 0x57a   : > { %v1055_v49 = vpop.f32.mrf.mxu0 }
 0x57b   : > { %v1069_v20 = vpack.c.bf16 %v1055_v49, %v1053_v19 }
 0x57d   : > { %1355 = vmatmul.msk.bf16.gmra.mxu2 %vm431_vm0, %v1069_v20 }
 0x582   : > { %v1058_v22 = vpop.f32.mrf.mxu0 }
 0x58a   : > { %v1060_v23 = vpop.f32.mrf.mxu0 }
 0x58b   : > { %v1070_v54 = vpack.c.bf16 %v1060_v23, %v1058_v22 }
 0x58d   : > { %1356 = vmatmul.msk.bf16.gmra.mxu2 %vm431_vm0, %v1070_v54 }
 0x592   : > { %v1063_v25 = vpop.f32.mrf.mxu0 }
 0x59a   : > { %v1065_v58 = vpop.f32.mrf.mxu0 }
 0x59b   : > { %v1071_v26 = vpack.c.bf16 %v1065_v58, %v1063_v25 }
 0x59d   : > { %1357 = vmatmul.msk.bf16.gmra.mxu2 %vm431_vm0, %v1071_v26 }
 0x5f0   : > { %v1129_v28 = vpop.f32.mrf.mxu2 }
 0x5f1   : > { %v1130_v29 = vadd.f32 %v1427_v27, %v1129_v28 }
 0x5f3   : > { %v1149_v30 = vadd.f32 %v1130_v29, %v1672_v5 }
 0x5f5   : > { %1157 = vst.msk [vmem:[%s1910_s15] sm:$0xff] %vm431_vm0, %v1149_v30 }
 0x5f8   : > { %v1131_v31 = vpop.f32.mrf.mxu2 }
 0x5f9   : > { %v1132_v32 = vadd.f32 %v1427_v27, %v1131_v31 }
 0x5fb   : > { %v1150_v33 = vadd.f32 %v1132_v32, %v1674_v6 }
 0x5fd   : > { %1158 = vst.msk [vmem:[%s1910_s15 + $0x8] sm:$0xff] %vm431_vm0, %v1150_v33 }
 0x600   : > { %v1134_v34 = vpop.f32.mrf.mxu2 }
 0x601   : > { %v1135_v35 = vadd.f32 %v1427_v27, %v1134_v34 }
 0x603   : > { %v1151_v5 = vadd.f32 %v1135_v35, %v1676_v7 }
 0x605   : > { %1159 = vst.msk [vmem:[%s1910_s15 + $0x10] sm:$0xff] %vm431_vm0, %v1151_v5 }
 0x608   : > { %v1136_v36 = vpop.f32.mrf.mxu2 }
 0x609   : > { %v1137_v37 = vadd.f32 %v1427_v27, %v1136_v36 }
 0x60b   : > { %v1152_v38 = vadd.f32 %v1137_v37, %v1678_v8 }
 0x60d   : > { %1160 = vst.msk [vmem:[%s1910_s15 + $0x18] sm:$0xff] %vm431_vm0, %v1152_v38 }
 0x610   : > { %v1139_v39 = vpop.f32.mrf.mxu2 }
 0x611   : > { %v1140_v6 = vadd.f32 %v1427_v27, %v1139_v39 }
 0x613   : > { %v1153_v40 = vadd.f32 %v1140_v6, %v1691_v13 }
 0x615   : > { %1161 = vst.msk [vmem:[%s1910_s15 + $0x20] sm:$0xff] %vm431_vm0, %v1153_v40 }
 0x618   : > { %v1141_v46 = vpop.f32.mrf.mxu2 }
 0x619   : > { %v1142_v47 = vadd.f32 %v1427_v27, %v1141_v46 }
 0x61b   : > { %v1154_v7 = vadd.f32 %v1142_v47, %v1698_v17 }
 0x61d   : > { %1162 = vst.msk [vmem:[%s1910_s15 + $0x28] sm:$0xff] %vm431_vm0, %v1154_v7 }
 0x620   : > { %v1144_v48 = vpop.f32.mrf.mxu2 }
 0x621   : > { %v1145_v50 = vadd.f32 %v1427_v27, %v1144_v48 }
 0x623   : > { %v1155_v8 = vadd.f32 %v1145_v50, %v1707_v21 }
 0x625   : > { %1163 = vst.msk [vmem:[%s1910_s15 + $0x30] sm:$0xff] %vm431_vm0, %v1155_v8 }
 0x628   : > { %v1146_v13 = vpop.f32.mrf.mxu2 }
 0x629   : > { %v1147_v51 = vadd.f32 %v1427_v27, %v1146_v13 }
 0x62b   : > { %v1156_v17 = vadd.f32 %v1147_v51, %v1711_v24 }
 0x62d   : > { %1164 = vst.msk [vmem:[%s1910_s15 + $0x38] sm:$0xff] %vm431_vm0, %v1156_v17 }
 0x62e   : > { %1489 = shalt.err (!%p1486_p3)
}
 0x62f   : > { %s1526_s20 = smov 128   ;;  %s1527_s15 = smov 8  }
 0x630   : > { %1381 = dma.vmem_to_hbm [thread:$0]  (%p1631_p5), %s1179_s19, 1024, %s1181_s26, %s1166_s25, %s1526_s20, %s1526_s20, %s1527_s15  }
 0x631 PF: > { %p1387_p4 = scmp.ge.s32.totalorder %s1524_s24, 2  ;;  %s1195_s16 = sand.u32 1, %s1512_s21  }
 0x632   : > { %s1196_s1 = scalar_lea.sflag [#allocation3], %s1195_s16 }
 0x633   : > { %p1384_p7 = pnand %p1387_p4, %p1635_p6 }
 0x635   : > { %p1385_p8 = pneg %p1384_p7 }
 0x637   : > { %1507 = dma.done.wait (%p1385_p8), %s1196_s1, 1024  }
 0x638   : > { %1509 = vsyncadd (%p1385_p8), %s1196_s1, 4294966272  ;;  %p22_p9 = scmp.ge.s32.totalorder %s1618_s27, 4   ;;  %s1988_s21 = smov %s1516_s22 }
 0x639   : > { %s1989_s22 = smov %s1520_s23  ;;  %s1990_s23 = smov %s1629_s30 }
 0x63a   : > { %s1991_s24 = smov %s1618_s27  ;;  %24 = sbr.rel (!%p22_p9) target bundleno = 6 (0x6), region = 103 }
 0x63f   :  { %1202 = vsyncpa [#allocation3], 1 }
 0x640   :  { %1204 = vsyncpa [#allocation3 + $0x1], 1 }

// kernel: res_att_block.2
= control target key start
LH: loop header
LB: loop body
LE: loop exit
PB: predicated region body
PF: predicated region fallthrough
CT: control target
= control target key end

     0   :  { %s3952_s21 = smov 0   ;;  %s5439_s0 = inlined_call_operand.vmem [shape: f32[2,64,32], index: 0, kind: input, shape index: {}]   ;;  %s5440_s1 = inlined_call_operand.vmem [shape: f32[64,1], index: 1, kind: input, shape index: {}]   ;;  %s5441_s2 = inlined_call_operand.vmem [shape: f32[64,1], index: 2, kind: input, shape index: {}]   ;;  %s5442_s3 = inlined_call_operand.vmem [shape: f32[1,32], index: 3, kind: input, shape index: {}]   ;;  %s5443_s4 = inlined_call_operand.vmem [shape: f32[1,32], index: 4, kind: input, shape index: {}]   ;;  %s5444_s5 = inlined_call_operand.vmem [shape: f32[32,32], index: 5, kind: input, shape index: {}]   ;;  %s5445_s6 = inlined_call_operand.vmem [shape: bf16[9,32,64], index: 6, kind: input, shape index: {}]   ;;  %s5446_s7 = inlined_call_operand.vmem [shape: f32[1,64], index: 7, kind: input, shape index: {}]   ;;  %s5447_s8 = inlined_call_operand.vmem [shape: f32[1,64], index: 8, kind: input, shape index: {}]   ;;  %s5448_s9 = inlined_call_operand.vmem [shape: f32[1,64], index: 9, kind: input, shape index: {}]   ;;  %s5449_s10 = inlined_call_operand.vmem [shape: f32[64,32], index: 10, kind: input, shape index: {}]   ;;  %s5450_s11 = inlined_call_operand.vmem [shape: f32[2,2,64], index: 11, kind: input, shape index: {}]   ;;  %s5451_s12 = inlined_call_operand.vmem [shape: bf16[9,64,64], index: 12, kind: input, shape index: {}]   ;;  %s5452_s13 = inlined_call_operand.vmem [shape: f32[1,64], index: 13, kind: input, shape index: {}]   ;;  %s5453_s14 = inlined_call_operand.vmem [shape: bf16[32,64], index: 14, kind: input, shape index: {}]   ;;  %s5454_s15 = inlined_call_operand.vmem [shape: f32[1,64], index: 15, kind: input, shape index: {}]   ;;  %s5455_s16 = inlined_call_operand.vmem [shape: f32[2,64,64], index: 16, kind: output, shape index: {}]  }
   0x1   :  { %5475 = sst [smem:[#allocation13_spill]] %s5439_s0 }
   0x2 LB: > { %s3247_s22 = sadd.s32 4294967295, %s3863_s21   ;;  %p3251_p0 = scmp.ge.s32.totalorder %s3863_s21, 1  ;;  %s3863_s21 = sphi %s3952_s21, %s26_s21  }
   0x3   : > { %p471_p1 = scmp.lt.s32.totalorder %s3863_s21, 3 }
   0x5   : > { %p472_p2 = pnand %p3251_p0, %p471_p1 }
   0x7   : > { %475 = sbr.rel (%p472_p2) target bundleno = 1959 (0x7a7), region = 84 }
   0xc   : > { %v569_v0 = vld [vmem:[%s5444_s5 + $0x18] sm:$0xff]  ;;  %v568_v1 = vld [vmem:[%s5444_s5 + $0x10] sm:$0xff]  ;;  %p525_p3 = scmp.lt.s32.totalorder %s3247_s22, 1  ;;  %vm5456_vm0 = vcmask 261120   ;;  %v567_v2 = vld [vmem:[%s5444_s5 + $0x8] sm:$0xff]  ;;  %s5476_s19 = sld [smem:[#allocation13_spill]] }
   0xd   : > { %607 = vmatpush.msra.mxu2 %v569_v0  ;;  %3264 = vmatpush.xpose.msk.msra.mxu0 %vm5456_vm0, %v569_v0  ;;  %v566_v3 = vld [vmem:[%s5444_s5] sm:$0xff]  ;;  %vm1792_vm4 = vcmask 523264   ;;  %vm947_vm7 = vcmask 254976  }
   0xe   : > { %s5582_s22 = smov (!%p525_p3, %s3247_s22), 1 }
   0xf   : > { %608 = vmatpush.msra.mxu2 %v568_v1  ;;  %s3703_s0 = sshll.u32 %s5582_s22, 6  ;;  %s3254_s25 = sshll.u32 %s5582_s22, 1 }
  0x10   : > { %s533_s28 = scalar_lea.vmem %s5450_s11, %s3254_s25  ;;  %s5383_s26 = scalar_lea.vmem %s5455_s16, %s3703_s0 }
  0x11   : > { %609 = vmatpush.msra.mxu2 %v567_v2  ;;  %3265 = vmatpush.xpose.msk.msra.mxu0 %vm5456_vm0, %v568_v1 }
  0x12   : > { %s3981_s20 = scalar_lea.vmem %s5476_s19, %s3703_s0 }
  0x13   : > { %v540_v4 = vld [vmem:[%s3981_s20] sm:$0xff]  ;;  %v541_v5 = vld [vmem:[%s3981_s20 + $0x8] sm:$0xff]  ;;  %v542_v6 = vld [vmem:[%s3981_s20 + $0x10] sm:$0xff]  ;;  %610 = vmatpush.msra.mxu2 %v566_v3 }
  0x14   : > { %v543_v7 = vld [vmem:[%s3981_s20 + $0x18] sm:$0xff]  ;;  %v571_v8 = vsel %vm5456_vm0, %v540_v4, 0.0  ;;  %v572_v9 = vsel %vm5456_vm0, %v541_v5, 0.0  ;;  %v574_v10 = vsel %vm5456_vm0, %v542_v6, 0.0  ;;  %v544_v11 = vld [vmem:[%s3981_s20 + $0x20] sm:$0xff]  ;;  %v545_v14 = vld [vmem:[%s3981_s20 + $0x28] sm:$0xff] }
  0x15   : > { %v573_v12 = vadd.f32 %v572_v9, %v571_v8  ;;  %3258 = vmatpush.xpose.msk.msrb.mxu2 %vm5456_vm0, %v569_v0  ;;  %v576_v13 = vsel %vm5456_vm0, %v543_v7, 0.0  ;;  %3266 = vmatpush.xpose.msk.msra.mxu0 %vm5456_vm0, %v567_v2  ;;  %v578_v16 = vsel %vm5456_vm0, %v544_v11, 0.0  ;;  %v546_v17 = vld [vmem:[%s3981_s20 + $0x30] sm:$0xff]  ;;  %v580_v19 = vsel %vm5456_vm0, %v545_v14, 0.0  ;;  %v547_v20 = vld [vmem:[%s3981_s20 + $0x38] sm:$0xff] }
  0x16   : > { %v582_v22 = vsel %vm5456_vm0, %v546_v17, 0.0  ;;  %v584_v24 = vsel %vm5456_vm0, %v547_v20, 0.0 }
  0x17   : > { %v575_v15 = vadd.f32 %v574_v10, %v573_v12  ;;  %v548_v10 = vld [vmem:[%s5440_s1] sm:$0xff]  ;;  %v3865_v12 = vmov 0  }
  0x18   : > { %3771 = vset.pattern.permute.xlu0 %v3865_v12  ;;  %3772 = vset.pattern.permute.xlu1 %v3865_v12 }
  0x19   : > { %v577_v18 = vadd.f32 %v576_v13, %v575_v15  ;;  %3259 = vmatpush.xpose.msk.msrb.mxu2 %vm5456_vm0, %v568_v1  ;;  %3267 = vmatpush.xpose.msk.msra.mxu0 %vm5456_vm0, %v566_v3  ;;  %v550_v13 = vld [vmem:[%s5440_s1 + $0x10] sm:$0xff]  ;;  %v557_v15 = vld [vmem:[%s5441_s2 + $0x8] sm:$0xff] }
  0x1a   : > { %968 = vperm.xlu0 %3771, %v548_v10   ;;  %3773 = vset.pattern.permute.xlu2 %v3865_v12 }
  0x1b   : > { %v579_v21 = vadd.f32 %v578_v16, %v577_v18  ;;  %978 = vperm.xlu2 %3773, %v550_v13   ;;  %v551_v16 = vld [vmem:[%s5440_s1 + $0x18] sm:$0xff] }
  0x1c   : > { %v559_v18 = vld [vmem:[%s5441_s2 + $0x18] sm:$0xff] }
  0x1d   : > { %v581_v23 = vadd.f32 %v580_v19, %v579_v21  ;;  %3260 = vmatpush.xpose.msk.msrb.mxu2 %vm5456_vm0, %v567_v2  ;;  %v552_v19 = vld [vmem:[%s5440_s1 + $0x20] sm:$0xff] }
  0x1e   : > { %v560_v21 = vld [vmem:[%s5441_s2 + $0x20] sm:$0xff] }
  0x1f   : > { %v583_v25 = vadd.f32 %v582_v22, %v581_v23  ;;  %v561_v22 = vld [vmem:[%s5441_s2 + $0x28] sm:$0xff] }
  0x21   : > { %v585_v26 = vadd.f32 %v584_v24, %v583_v25  ;;  %3261 = vmatpush.xpose.msk.msrb.mxu2 %vm5456_vm0, %v566_v3  ;;  %v554_v25 = vld [vmem:[%s5440_s1 + $0x30] sm:$0xff] }
  0x23   : > { %v586_v27 = vrot.slane %v585_v26, 4  ;;  %983 = vperm.xlu2 %3773, %v551_v16  }
  0x25   : > { %v587_v28 = vadd.f32 %v586_v27, %v585_v26  ;;  %v555_v26 = vld [vmem:[%s5440_s1 + $0x38] sm:$0xff]  ;;  %v562_v27 = vld [vmem:[%s5441_s2 + $0x30] sm:$0xff] }
  0x27   : > { %v588_v29 = vrot.slane %v587_v28, 2 }
  0x29   : > { %v589_v30 = vadd.f32 %v588_v29, %v587_v28  ;;  %v563_v28 = vld [vmem:[%s5441_s2 + $0x38] sm:$0xff] }
  0x2b   : > { %v590_v31 = vrot.slane %v589_v30, 1  ;;  %988 = vperm.xlu2 %3773, %v552_v19   ;;  %v3710_v19 = vld [vmem:[%s5445_s6 + $0x28] sm:$0xff] }
  0x2c   : > { %1240 = vmatpush.bf16.msra.mxu1 %v3710_v19 }
  0x2d   : > { %v591_v32 = vadd.f32 %v590_v31, %v589_v30 }
  0x2f   : > { %3257 = vmatmul.msk.f32.vlgmr.msra.gmra.mxu2 %vm5456_vm0, %v591_v32 }
  0x30   : > { %704 = vmatpush.msra.mxu2 %v569_v0 }
  0x32   : > { %705 = vmatpush.msra.mxu2 %v568_v1 }
  0x33   : > { %1180 = vperm.xlu2 %3773, %v561_v22   ;;  %v3712_v22 = vld [vmem:[%s5445_s6 + $0x38] sm:$0xff] }
  0x34   : > { %706 = vmatpush.msra.mxu2 %v567_v2  ;;  %1326 = vmatpush.bf16.msra.mxu3 %v3712_v22 }
  0x36   : > { %707 = vmatpush.msra.mxu2 %v566_v3 }
  0x3b   : > { %1185 = vperm.xlu2 %3773, %v562_v27  }
  0xb2   : > { %v612_v33 = vpop.f32.mrf.mxu2 }
  0xb3   : > { %v615_v34 = vmul.f32 0.015625, %v612_v33 }
  0xb5   : > { %3262 = vmatmul.msk.f32.vlgmr.msrb.gmra.mxu2 %vm5456_vm0, %v615_v34 }
 0x138   : > { %v648_v35 = vpop.f32.mrf.mxu2 }
 0x139   : > { %v651_v36 = vperm.slane %v648_v35, 0 }
 0x13b   : > { %v4008_v37 = vsub.f32 %v540_v4, %v651_v36  ;;  %v4010_v38 = vsub.f32 %v541_v5, %v651_v36  ;;  %v4012_v39 = vsub.f32 %v542_v6, %v651_v36  ;;  %v4014_v40 = vsub.f32 %v543_v7, %v651_v36 }
 0x13c   : > { %v4016_v41 = vsub.f32 %v544_v11, %v651_v36  ;;  %v4024_v45 = vsub.f32 %v545_v14, %v651_v36  ;;  %v4030_v50 = vsub.f32 %v546_v17, %v651_v36  ;;  %v4035_v54 = vsub.f32 %v547_v20, %v651_v36  ;;  %v556_v11 = vld [vmem:[%s5441_s2] sm:$0xff]  ;;  %v549_v14 = vld [vmem:[%s5440_s1 + $0x8] sm:$0xff]  ;;  %v558_v17 = vld [vmem:[%s5441_s2 + $0x10] sm:$0xff] }
 0x13d   : > { %v660_v42 = vmul.f32 %v4008_v37, %v4008_v37  ;;  %v661_v43 = vmul.f32 %v4010_v38, %v4010_v38  ;;  %v662_v44 = vmul.f32 %v4012_v39, %v4012_v39  ;;  %v663_v46 = vmul.f32 %v4014_v40, %v4014_v40  ;;  %1155 = vperm.xlu1 %3772, %v556_v11   ;;  %v553_v20 = vld [vmem:[%s5440_s1 + $0x28] sm:$0xff] }
 0x13e   : > { %v664_v51 = vmul.f32 %v4016_v41, %v4016_v41  ;;  %v665_v55 = vmul.f32 %v4024_v45, %v4024_v45  ;;  %v666_v58 = vmul.f32 %v4030_v50, %v4030_v50  ;;  %v667_v61 = vmul.f32 %v4035_v54, %v4035_v54  ;;  %973 = vperm.xlu0 %3771, %v549_v14  }
 0x13f   : > { %v668_v47 = vsel %vm5456_vm0, %v660_v42, 0.0  ;;  %v669_v48 = vsel %vm5456_vm0, %v661_v43, 0.0  ;;  %v671_v52 = vsel %vm5456_vm0, %v662_v44, 0.0  ;;  %v673_v56 = vsel %vm5456_vm0, %v663_v46, 0.0  ;;  %v3774_v44 = vld [vmem:[%s5442_s3] ss:$0 sm:$0xff] }
 0x140   : > { %v670_v49 = vadd.f32 %v669_v48, %v668_v47  ;;  %v675_v59 = vsel %vm5456_vm0, %v664_v51, 0.0  ;;  %v677_v62 = vsel %vm5456_vm0, %v665_v55, 0.0  ;;  %v679_v0 = vsel %vm5456_vm0, %v666_v58, 0.0  ;;  %v3775_v51 = vld [vmem:[%s5443_s4] ss:$0 sm:$0xff] }
 0x141   : > { %v681_v2 = vsel %vm5456_vm0, %v667_v61, 0.0 }
 0x142   : > { %v672_v53 = vadd.f32 %v671_v52, %v670_v49 }
 0x144   : > { %v674_v57 = vadd.f32 %v673_v56, %v672_v53 }
 0x145   : > { %1160 = vperm.xlu1 %3772, %v557_v15   ;;  %v3708_v15 = vld [vmem:[%s5445_s6 + $0x18] sm:$0xff] }
 0x146   : > { %v676_v60 = vadd.f32 %v675_v59, %v674_v57  ;;  %1165 = vperm.xlu0 %3771, %v558_v17   ;;  %1069 = vmatpush.bf16.msrb.mxu0 %v3708_v15 }
 0x148   : > { %v678_v63 = vadd.f32 %v677_v62, %v676_v60 }
 0x14a   : > { %v680_v1 = vadd.f32 %v679_v0, %v678_v63 }
 0x14c   : > { %v682_v3 = vadd.f32 %v681_v2, %v680_v1 }
 0x14d   : > { %1170 = vperm.xlu1 %3772, %v559_v18   ;;  %v3706_v18 = vld [vmem:[%s5445_s6 + $0x8] sm:$0xff] }
 0x14e   : > { %v683_v4 = vrot.slane %v682_v3, 4  ;;  %993 = vperm.xlu0 %3771, %v553_v20   ;;  %1122 = vmatpush.bf16.msrb.mxu2 %v3706_v18 }
 0x150   : > { %v684_v5 = vadd.f32 %v683_v4, %v682_v3 }
 0x152   : > { %v685_v6 = vrot.slane %v684_v5, 2 }
 0x154   : > { %v686_v7 = vadd.f32 %v685_v6, %v684_v5 }
 0x155   : > { %1175 = vperm.xlu1 %3772, %v560_v21  }
 0x156   : > { %v687_v8 = vrot.slane %v686_v7, 1  ;;  %998 = vperm.xlu0 %3771, %v554_v25  }
 0x158   : > { %v688_v9 = vadd.f32 %v687_v8, %v686_v7 }
 0x15a   : > { %3263 = vmatmul.msk.f32.vlgmr.msra.gmra.mxu2 %vm5456_vm0, %v688_v9  ;;  %v3866_v9 = vmov 0.0  }
 0x15b   : > { %937 = vst.msk [vmem:[#allocation2] sm:$0xff] %vm5456_vm0, %v3866_v9 }
 0x15c   : > { %2190 = vst.msk [vmem:[#allocation3] sm:$0xff] %vm1792_vm4, %v3866_v9 }
 0x15d   : > { %1003 = vperm.xlu1 %3772, %v555_v26   ;;  %938 = vst.msk [vmem:[#allocation2 + $0x8] sm:$0xff] %vm5456_vm0, %v3866_v9 }
 0x15e   : > { %1190 = vperm.xlu0 %3771, %v563_v28   ;;  %939 = vst.msk [vmem:[#allocation2 + $0x10] sm:$0xff] %vm5456_vm0, %v3866_v9 }
 0x15f   : > { %940 = vst.msk [vmem:[#allocation2 + $0x18] sm:$0xff] %vm5456_vm0, %v3866_v9 }
 0x160   : > { %941 = vst.msk [vmem:[#allocation2 + $0x20] sm:$0xff] %vm5456_vm0, %v3866_v9 }
 0x161   : > { %942 = vst.msk [vmem:[#allocation2 + $0x28] sm:$0xff] %vm5456_vm0, %v3866_v9 }
 0x162   : > { %943 = vst.msk [vmem:[#allocation2 + $0x30] sm:$0xff] %vm5456_vm0, %v3866_v9 }
 0x163   : > { %944 = vst.msk [vmem:[#allocation2 + $0x38] sm:$0xff] %vm5456_vm0, %v3866_v9 }
 0x164   : > { %945 = vst.msk [vmem:[#allocation2 + $0x40] sm:$0xff] %vm5456_vm0, %v3866_v9 }
 0x165   : > { %946 = vst.msk [vmem:[#allocation2 + $0x48] sm:$0xff] %vm5456_vm0, %v3866_v9 }
 0x166   : > { %2191 = vst.msk [vmem:[#allocation3 + $0x8] sm:$0xff] %vm1792_vm4, %v3866_v9 }
 0x167   : > { %2192 = vst.msk [vmem:[#allocation3 + $0x10] sm:$0xff] %vm1792_vm4, %v3866_v9 }
 0x168   : > { %2193 = vst.msk [vmem:[#allocation3 + $0x18] sm:$0xff] %vm1792_vm4, %v3866_v9 }
 0x169   : > { %2194 = vst.msk [vmem:[#allocation3 + $0x20] sm:$0xff] %vm1792_vm4, %v3866_v9 }
 0x16a   : > { %2195 = vst.msk [vmem:[#allocation3 + $0x28] sm:$0xff] %vm1792_vm4, %v3866_v9 }
 0x16b   : > { %2196 = vst.msk [vmem:[#allocation3 + $0x30] sm:$0xff] %vm1792_vm4, %v3866_v9 }
 0x16c   : > { %2197 = vst.msk [vmem:[#allocation3 + $0x38] sm:$0xff] %vm1792_vm4, %v3866_v9 }
 0x16d   : > { %2198 = vst.msk [vmem:[#allocation3 + $0x40] sm:$0xff] %vm1792_vm4, %v3866_v9 }
 0x16e   : > { %2199 = vst.msk [vmem:[#allocation3 + $0x48] sm:$0xff] %vm1792_vm4, %v3866_v9 }
 0x16f   : > { %948 = vst.msk [vmem:[#allocation2 + $0x50] sm:$0x3] %vm947_vm7, %v3866_v9 }
 0x1dd   : > { %v709_v23 = vpop.f32.mrf.mxu2 }
 0x1de   : > { %v712_v24 = vmul.f32 0.015625, %v709_v23  ;;  %v3707_v23 = vld [vmem:[%s5445_s6 + $0x10] sm:$0xff] }
 0x1df   : > { %1070 = vmatpush.bf16.msrb.mxu0 %v3707_v23 }
 0x1e0   : > { %3268 = vmatmul.msk.f32.vlgmr.msra.gmra.mxu0 %vm5456_vm0, %v712_v24  ;;  %vm2200_vm0 = vcmask 517120  }
 0x1e1   : > { %2201 = vst.msk [vmem:[#allocation3 + $0x50] sm:$0x3] %vm2200_vm0, %v3866_v9 }
 0x25d   : > { %v733_v29 = vpop.f32.mrf.mxu0 }
 0x25e   : > { %v734_v30 = vadd.f32 1e-05, %v733_v29 }
 0x260   : > { %3781 = vrsqrt.f32 %v734_v30  ;;  %vm742_vm2 = vweird.f32 %v734_v30 }
 0x266   : > { %v3782_v31 = vpop.eup %3781 }
 0x267   : > { %v737_v32 = vmul.f32 %v3782_v31, %v734_v30  ;;  %vm743_vm1 = vweird.f32 %v3782_v31 }
 0x268   : > { %vm744_vm3 = vmor %vm742_vm2, %vm743_vm1 }
 0x269   : > { %v738_v33 = vmul.f32 %v3782_v31, %v737_v32  ;;  %v3705_v32 = vld [vmem:[%s5445_s6] sm:$0xff] }
 0x26a   : > { %1123 = vmatpush.bf16.msrb.mxu2 %v3705_v32 }
 0x26b   : > { %v739_v34 = vmul.f32 0.5, %v738_v33  ;;  %v3709_v33 = vld [vmem:[%s5445_s6 + $0x20] sm:$0xff] }
 0x26c   : > { %1241 = vmatpush.bf16.msra.mxu1 %v3709_v33 }
 0x26d   : > { %v740_v35 = vsub.f32 1.5, %v739_v34  ;;  %v3711_v34 = vld [vmem:[%s5445_s6 + $0x30] sm:$0xff] }
 0x26e   : > { %1327 = vmatpush.bf16.msra.mxu3 %v3711_v34 }
 0x26f   : > { %v741_v36 = vmul.f32 %v3782_v31, %v740_v35 }
 0x271   : > { %v745_v42 = vsel %vm744_vm3, %v3782_v31, %v741_v36 }
 0x272   : > { %v746_v43 = vperm.slane %v745_v42, 0 }
 0x274   : > { %v747_v46 = vmul.f32 %v746_v43, %v4008_v37  ;;  %v748_v47 = vmul.f32 %v746_v43, %v4010_v38  ;;  %v749_v48 = vmul.f32 %v746_v43, %v4012_v39  ;;  %v750_v49 = vmul.f32 %v746_v43, %v4014_v40 }
 0x275   : > { %v751_v52 = vmul.f32 %v746_v43, %v4016_v41  ;;  %v752_v53 = vmul.f32 %v746_v43, %v4024_v45  ;;  %v753_v55 = vmul.f32 %v746_v43, %v4030_v50  ;;  %v754_v56 = vmul.f32 %v746_v43, %v4035_v54 }
 0x276   : > { %v758_v57 = vmul.f32 %v3774_v44, %v747_v46  ;;  %v759_v37 = vmul.f32 %v3774_v44, %v748_v47  ;;  %v760_v58 = vmul.f32 %v3774_v44, %v749_v48  ;;  %v761_v38 = vmul.f32 %v3774_v44, %v750_v49  ;;  %v958_v47 = vld [vmem:[#allocation2] sm:$0xff] }
 0x277   : > { %v762_v59 = vmul.f32 %v3774_v44, %v751_v52  ;;  %v763_v39 = vmul.f32 %v3774_v44, %v752_v53  ;;  %v764_v60 = vmul.f32 %v3774_v44, %v753_v55  ;;  %v765_v40 = vmul.f32 %v3774_v44, %v754_v56 }
 0x278   : > { %v4112_v61 = vadd.f32 %v3775_v51, %v758_v57  ;;  %v4114_v62 = vadd.f32 %v3775_v51, %v759_v37  ;;  %v4116_v63 = vadd.f32 %v3775_v51, %v760_v58  ;;  %v4118_v41 = vadd.f32 %v3775_v51, %v761_v38 }
 0x279   : > { %v4120_v45 = vadd.f32 %v3775_v51, %v762_v59  ;;  %v4122_v50 = vadd.f32 %v3775_v51, %v763_v39  ;;  %v4127_v2 = vadd.f32 %v3775_v51, %v765_v40  ;;  %v4130_v4 = vadd.f32 %v3775_v51, %v764_v60  ;;  %v3714_v51 = vld [vmem:[%s5445_s6 + $0x48] sm:$0xff]  ;;  %v4359_v60 = vpop.permute.xlu2 %978 }
 0x27a   : > { %v3269_v54 = vmul.f32 -1.442695, %v4112_v61  ;;  %v3270_v0 = vmul.f32 -1.442695, %v4114_v62  ;;  %v3271_v1 = vmul.f32 -1.442695, %v4116_v63  ;;  %1404 = vmatpush.bf16.msra.mxu0 %v3714_v51 }
 0x27b   : > { %v3272_v3 = vmul.f32 -1.442695, %v4118_v41  ;;  %v3273_v5 = vmul.f32 -1.442695, %v4120_v45  ;;  %v3274_v6 = vmul.f32 -1.442695, %v4122_v50 }
 0x27c   : > { %3783 = vpow2.f32 %v3269_v54  ;;  %v3276_v7 = vmul.f32 -1.442695, %v4127_v2  ;;  %v3275_v8 = vmul.f32 -1.442695, %v4130_v4 }
 0x27d   : > { %3785 = vpow2.f32 %v3270_v0 }
 0x27e   : > { %3787 = vpow2.f32 %v3271_v1 }
 0x27f   : > { %3789 = vpow2.f32 %v3272_v3 }
 0x280   : > { %3791 = vpow2.f32 %v3273_v5 }
 0x281   : > { %3793 = vpow2.f32 %v3274_v6 }
 0x282   : > { %v3784_v10 = vpop.eup %3783  ;;  %3795 = vpow2.f32 %v3276_v7 }
 0x283   : > { %v3786_v11 = vpop.eup %3785  ;;  %v4140_v12 = vadd.f32 1.0, %v3784_v10  ;;  %3797 = vpow2.f32 %v3275_v8 }
 0x284   : > { %v3788_v13 = vpop.eup %3787  ;;  %v4144_v14 = vadd.f32 1.0, %v3786_v11 }
 0x285   : > { %v3790_v16 = vpop.eup %3789  ;;  %v4151_v17 = vadd.f32 1.0, %v3788_v13  ;;  %3799 = vrcp.f32 %v4140_v12  ;;  %v818_v26 = vand.u32 2147483647, %v4140_v12  ;;  %v820_v27 = vand.u32 2147483648, %v4140_v12 }
 0x286   : > { %v3792_v20 = vpop.eup %3791  ;;  %v4162_v21 = vadd.f32 1.0, %v3790_v16  ;;  %3801 = vrcp.f32 %v4144_v14  ;;  %v833_v29 = vand.u32 2147483647, %v4144_v14  ;;  %vm814_vm5 = vweird.f32 %v4140_v12 }
 0x287   : > { %v4173_v24 = vadd.f32 1.0, %v3792_v20  ;;  %v3794_v25 = vpop.eup %3793  ;;  %3803 = vrcp.f32 %v4151_v17  ;;  %v835_v31 = vand.u32 2147483648, %v4144_v14  ;;  %vm829_vm6 = vweird.f32 %v4144_v14 }
 0x288   : > { %v3796_v28 = vpop.eup %3795  ;;  %3805 = vrcp.f32 %v4162_v21  ;;  %v848_v42 = vand.u32 2147483647, %v4151_v17  ;;  %v4208_v44 = vadd.f32 1.0, %v3794_v25  ;;  %vm4212_vm8 = vcmp.eq.f32.partialorder %v818_v26, 8.507059e+37  ;;  %v4299_v26 = vpop.permute.xlu0 %968 }
 0x289   : > { %v3798_v30 = vpop.eup %3797  ;;  %v4199_v36 = vadd.f32 1.0, %v3796_v28  ;;  %3807 = vrcp.f32 %v4173_v24  ;;  %v821_v48 = vor.u32 1.1754944e-38, %v820_v27  ;;  %v850_v49 = vand.u32 2147483648, %v4151_v17 }
 0x28a   : > { %vm844_vm9 = vweird.f32 %v4151_v17  ;;  %v863_v53 = vand.u32 2147483647, %v4162_v21  ;;  %v865_v55 = vand.u32 2147483648, %v4162_v21  ;;  %v4231_v57 = vadd.f32 1.0, %v3798_v30 }
 0x28b   : > { %v4197_v35 = vpop.eup %3799  ;;  %vm4233_vm10 = vcmp.eq.f32.partialorder %v833_v29, 8.507059e+37  ;;  %v836_v38 = vor.u32 1.1754944e-38, %v835_v31  ;;  %vm4242_vm12 = vcmp.eq.f32.partialorder %v848_v42, 8.507059e+37  ;;  %vm859_vm13 = vweird.f32 %v4162_v21  ;;  %v4313_v31 = vpop.permute.xlu1 %1155 }
 0x28c   : > { %v4206_v43 = vpop.eup %3801  ;;  %v810_v46 = vmul.f32 %v4197_v35, %v4140_v12  ;;  %vm815_vm11 = vweird.f32 %v4197_v35  ;;  %3809 = vrcp.f32 %v4199_v36  ;;  %v851_v0 = vor.u32 1.1754944e-38, %v850_v49 }
 0x28d   : > { %v825_v52 = vmul.f32 %v4206_v43, %v4144_v14  ;;  %v4229_v56 = vpop.eup %3803  ;;  %vm830_vm14 = vweird.f32 %v4206_v43  ;;  %3811 = vrcp.f32 %v4208_v44  ;;  %vm4262_vm15 = vcmp.eq.f32.partialorder %v863_v53, 8.507059e+37  ;;  %vm816_vm2 = vmor %vm814_vm5, %vm815_vm11 }
 0x28e   : > { %v811_v37 = vsub.f32 1.0, %v810_v46  ;;  %v840_v39 = vmul.f32 %v4229_v56, %v4151_v17  ;;  %v4250_v40 = vpop.eup %3805  ;;  %v866_v8 = vor.u32 1.1754944e-38, %v865_v55  ;;  %vm845_vm1 = vweird.f32 %v4229_v56  ;;  %vm831_vm3 = vmor %vm829_vm6, %vm830_vm14 }
 0x28f   : > { %v826_v59 = vsub.f32 1.0, %v825_v52  ;;  %v4257_v1 = vpop.eup %3807  ;;  %v855_v6 = vmul.f32 %v4250_v40, %v4162_v21  ;;  %3813 = vrcp.f32 %v4231_v57  ;;  %v923_v11 = vand.u32 2147483647, %v4199_v36  ;;  %vm846_vm6 = vmor %vm844_vm9, %vm845_vm1 }
 0x290   : > { %v812_v54 = vmul.f32 %v4197_v35, %v811_v37  ;;  %v841_v5 = vsub.f32 1.0, %v840_v39  ;;  %v870_v18 = vmul.f32 %v4257_v1, %v4173_v24  ;;  %vm860_vm5 = vweird.f32 %v4250_v40 }
 0x291   : > { %v827_v3 = vmul.f32 %v4206_v43, %v826_v59  ;;  %v856_v16 = vsub.f32 1.0, %v855_v6  ;;  %vm919_vm11 = vweird.f32 %v4199_v36  ;;  %v925_v12 = vand.u32 2147483648, %v4199_v36  ;;  %vm861_vm7 = vmor %vm859_vm13, %vm860_vm5 }
 0x292   : > { %v813_v10 = vadd.f32 %v4197_v35, %v812_v54  ;;  %v842_v15 = vmul.f32 %v4229_v56, %v841_v5  ;;  %v3810_v20 = vpop.eup %3809  ;;  %v871_v17 = vsub.f32 1.0, %v870_v18  ;;  %vm5485_vm9 = vcmask 261120  }
 0x293   : > { %v828_v13 = vadd.f32 %v4206_v43, %v827_v3  ;;  %v857_v14 = vmul.f32 %v4250_v40, %v856_v16  ;;  %v4303_v27 = vpop.eup %3811  ;;  %v915_v29 = vmul.f32 %v3810_v20, %v4199_v36  ;;  %vm5486_vm0 = vmmov %vm5485_vm9  ;;  %vm874_vm14 = vweird.f32 %v4173_v24 }
 0x294   : > { %v817_v19 = vsel %vm816_vm2, %v4197_v35, %v813_v10  ;;  %v843_v25 = vadd.f32 %v4229_v56, %v842_v15  ;;  %v885_v21 = vmul.f32 %v4303_v27, %v4208_v44  ;;  %vm5489_vm13 = vmmov %vm5486_vm0  ;;  %v926_v37 = vor.u32 1.1754944e-38, %v925_v12  ;;  %v4376_v15 = vpop.permute.xlu1 %1160 }
 0x295   : > { %v822_v22 = vsel %vm4212_vm8, %v821_v48, %v817_v19  ;;  %v832_v23 = vsel %vm831_vm3, %v4206_v43, %v828_v13  ;;  %vm875_vm8 = vweird.f32 %v4257_v1  ;;  %v858_v33 = vadd.f32 %v4250_v40, %v857_v14  ;;  %v4323_v35 = vpop.eup %3813  ;;  %vm5490_vm2 = vmmov %vm5486_vm0  ;;  %v3713_v14 = vld [vmem:[%s5445_s6 + $0x40] sm:$0xff] }
 0x296   : > { %v837_v28 = vsel %vm4233_vm10, %v836_v38, %v832_v23  ;;  %v929_v30 = vmul.f32 %v822_v22, %v4112_v61  ;;  %v847_v32 = vsel %vm846_vm6, %v4229_v56, %v843_v25  ;;  %v916_v42 = vsub.f32 1.0, %v915_v29  ;;  %1405 = vmatpush.bf16.msra.mxu0 %v3713_v14 }
 0x297   : > { %v930_v34 = vmul.f32 %v837_v28, %v4114_v62  ;;  %v852_v61 = vsel %vm4242_vm12, %v851_v0, %v847_v32  ;;  %v878_v43 = vand.u32 2147483647, %v4173_v24  ;;  %v880_v62 = vand.u32 2147483648, %v4173_v24  ;;  %v4365_v0 = vpop.permute.xlu0 %973 }
 0x298   : > { %949 = vst.msk [vmem:[#allocation2 + $0x9] sm:$0xff] %vm5485_vm9, %v929_v30  ;;  %v862_v9 = vsel %vm861_vm7, %v4250_v40, %v858_v33  ;;  %v931_v46 = vmul.f32 %v852_v61, %v4116_v63  ;;  %v872_v48 = vmul.f32 %v4257_v1, %v871_v17  ;;  %v917_v51 = vmul.f32 %v3810_v20, %v916_v42  ;;  %vm5493_vm7 = vmmov %vm5486_vm0 }
 0x299   : > { %950 = vst.msk [vmem:[#allocation2 + $0x11] sm:$0xff] %vm5486_vm0, %v930_v34  ;;  %v867_v49 = vsel %vm4262_vm15, %v866_v8, %v862_v9  ;;  %vm920_vm10 = vweird.f32 %v3810_v20  ;;  %vm4342_vm12 = vcmp.eq.f32.partialorder %v923_v11, 8.507059e+37  ;;  %v886_v55 = vsub.f32 1.0, %v885_v21  ;;  %vm876_vm15 = vmor %vm874_vm14, %vm875_vm8 }
 0x29a   : > { %v932_v53 = vmul.f32 %v867_v49, %v4118_v41  ;;  %951 = vst.msk [vmem:[#allocation2 + $0x19] sm:$0xff] %vm5489_vm13, %v931_v46  ;;  %v873_v63 = vadd.f32 %v4257_v1, %v872_v48  ;;  %v918_v56 = vadd.f32 %v3810_v20, %v917_v51  ;;  %v1006_v58 = vmul.f32 %v4299_v26, %v958_v47  ;;  %vm921_vm1 = vmor %vm919_vm11, %vm920_vm10  ;;  %v1022_v41 = vld [vmem:[#allocation2 + $0x1] sm:$0xff] }
 0x29b   : > { %v881_v38 = vor.u32 1.1754944e-38, %v880_v62  ;;  %vm879_vm3 = vcmp.eq.f32.partialorder %v878_v43, 8.507059e+37  ;;  %v887_v24 = vmul.f32 %v4303_v27, %v886_v55  ;;  %vm889_vm5 = vweird.f32 %v4208_v44  ;;  %vm5491_vm11 = vmmov %vm5486_vm0 }
 0x29c   : > { %952 = vst.msk [vmem:[#allocation2 + $0x21] sm:$0xff] %vm5490_vm2, %v932_v53  ;;  %v877_v59 = vsel %vm876_vm15, %v4257_v1, %v873_v63  ;;  %v922_v39 = vsel %vm921_vm1, %v3810_v20, %v918_v56  ;;  %vm890_vm6 = vweird.f32 %v4303_v27  ;;  %v893_v54 = vand.u32 2147483647, %v4208_v44  ;;  %vm5492_vm8 = vmmov %vm5486_vm0  ;;  %v4438_v53 = vpop.permute.xlu1 %1170 }
 0x29d   : > { %v882_v40 = vsel %vm879_vm3, %v881_v38, %v877_v59  ;;  %v927_v36 = vsel %vm4342_vm12, %v926_v37, %v922_v39  ;;  %v888_v7 = vadd.f32 %v4303_v27, %v887_v24  ;;  %v895_v8 = vand.u32 2147483648, %v4208_v44  ;;  %vm891_vm9 = vmor %vm889_vm5, %vm890_vm6  ;;  %5497 = vst [vmem:[#allocation4_spill] sm:$0xff] %v4438_v53 }
 0x29e   : > { %v933_v6 = vmul.f32 %v882_v40, %v4120_v45  ;;  %v936_v10 = vmul.f32 %v927_v36, %v4127_v2  ;;  %v900_v20 = vmul.f32 %v4323_v35, %v4231_v57  ;;  %vm5494_vm10 = vmmov %vm5486_vm0  ;;  %vm894_vm13 = vcmp.eq.f32.partialorder %v893_v54, 8.507059e+37 }
 0x29f   : > { %v959_v3 = vld [vmem:[#allocation2 + $0x8] sm:$0xff]  ;;  %v892_v28 = vsel %vm891_vm9, %v4303_v27, %v888_v7  ;;  %v896_v29 = vor.u32 1.1754944e-38, %v895_v8  ;;  %vm5495_vm12 = vmmov %vm5486_vm0  ;;  %v4409_v27 = vpop.permute.xlu2 %983  ;;  %vm905_vm14 = vweird.f32 %v4323_v35  ;;  %v908_v61 = vand.u32 2147483647, %v4231_v57  ;;  %v4430_v21 = vpop.permute.xlu0 %1165  ;;  %v3720_v7 = vld [vmem:[%s5445_s6 + $0x78] sm:$0xff] }
 0x2a0   : > { %v4367_v1 = vld [vmem:[#allocation2 + $0x9] sm:$0xff]  ;;  %v1007_v13 = vmul.f32 %v4365_v0, %v959_v3  ;;  %v1279_v12 = vmul.f32 %v4299_v26, %v959_v3  ;;  %953 = vst.msk [vmem:[#allocation2 + $0x29] sm:$0xff] %vm5491_vm11, %v933_v6  ;;  %v901_v30 = vsub.f32 1.0, %v900_v20  ;;  %v910_v42 = vand.u32 2147483648, %v4231_v57  ;;  %vm5496_vm15 = vmmov %vm5486_vm0  ;;  %v3716_v6 = vld [vmem:[%s5445_s6 + $0x58] sm:$0xff]  ;;  %1654 = vmatpush.bf16.msrb.mxu3 %v3720_v7 }
 0x2a1   : > { %v1145_v5 = vld [vmem:[#allocation2 + $0x2] sm:$0xff]  ;;  %v4373_v11 = vld [vmem:[#allocation2 + $0xa] sm:$0xff]  ;;  %v1030_v16 = vpack.c.bf16 %v4367_v1, %v1022_v41  ;;  %956 = vst.msk [vmem:[#allocation2 + $0x41] sm:$0xff] %vm5492_vm8, %v936_v10  ;;  %v897_v44 = vsel %vm894_vm13, %v896_v29, %v892_v28  ;;  %v4405_v34 = vld [vmem:[#allocation2 + $0x12] sm:$0xff]  ;;  %vm904_vm1 = vweird.f32 %v4231_v57  ;;  %vm909_vm3 = vcmp.eq.f32.partialorder %v908_v61, 8.507059e+37  ;;  %1490 = vmatpush.bf16.msra.mxu2 %v3716_v6 }
 0x2a2   : > { %v1193_v18 = vmul.f32 %v4313_v31, %v1145_v5  ;;  %v4380_v19 = vld [vmem:[#allocation2 + $0x10] sm:$0xff]  ;;  %v1194_v45 = vmul.f32 %v4373_v11, %v4376_v15  ;;  %v1014_v22 = vpack.c.bf16 %v1007_v13, %v1006_v58  ;;  %v934_v32 = vmul.f32 %v897_v44, %v4122_v50  ;;  %v4425_v9 = vld [vmem:[#allocation2 + $0x18] sm:$0xff]  ;;  %vm906_vm2 = vmor %vm904_vm1, %vm905_vm14 }
 0x2a3   : > { %v1280_v2 = vmul.f32 %v4380_v19, %v4365_v0  ;;  %3289 = vmatmul.msk.bf16.vlgmr.msrb.gmra.mxu0 %vm5493_vm7, %v1030_v16  ;;  %v902_v33 = vmul.f32 %v4323_v35, %v901_v30  ;;  %v4407_v17 = vld [vmem:[#allocation2 + $0x1a] sm:$0xff]  ;;  %v4419_v50 = vmul.f32 %v4405_v34, %v4313_v31  ;;  %v911_v46 = vor.u32 1.1754944e-38, %v910_v42  ;;  %v4432_v57 = vld [vmem:[#allocation2 + $0x11] sm:$0xff]  ;;  %vm5498_vm5 = vmmov %vm5486_vm0 }
 0x2a4   : > { %v1201_v23 = vpack.c.bf16 %v1194_v45, %v1193_v18  ;;  %3301 = vmatmul.msk.bf16.vlgmr.msrb.gmra.mxu2 %vm5486_vm0, %v1014_v22  ;;  %954 = vst.msk [vmem:[#allocation2 + $0x31] sm:$0xff] %vm5496_vm15, %v934_v32  ;;  %v4423_v62 = vmul.f32 %v4407_v17, %v4376_v15  ;;  %v4427_v47 = vld [vmem:[#allocation2 + $0x20] sm:$0xff]  ;;  %v1008_v63 = vmul.f32 %v4380_v19, %v4359_v60  ;;  %vm5500_vm6 = vmmov %vm5486_vm0  ;;  %v3718_v8 = vld [vmem:[%s5445_s6 + $0x68] sm:$0xff] }
 0x2a5   : > { %v1287_v25 = vpack.c.bf16 %v1280_v2, %v1279_v12  ;;  %v903_v43 = vadd.f32 %v4323_v35, %v902_v33  ;;  %v4434_v49 = vld [vmem:[#allocation2 + $0x19] sm:$0xff]  ;;  %v1009_v55 = vmul.f32 %v4409_v27, %v4425_v9  ;;  %v1196_v37 = vmul.f32 %v4407_v17, %v4438_v53  ;;  %vm5501_vm11 = vmmov %vm5486_vm0  ;;  %v3715_v10 = vld [vmem:[%s5445_s6 + $0x50] sm:$0xff]  ;;  %1576 = vmatpush.bf16.msrb.mxu1 %v3718_v8  ;;  %v4503_v2 = vpop.permute.xlu1 %1175 }
 0x2a6   : > { %3317 = vmatmul.msk.bf16.vlgmr.msra.gmra.mxu1 %vm5494_vm10, %v1201_v23  ;;  %v1281_v58 = vmul.f32 %v4359_v60, %v4425_v9  ;;  %v1282_v38 = vmul.f32 %v4427_v47, %v4409_v27  ;;  %v1701_v41 = vpack.c.bf16 %v4423_v62, %v4419_v50  ;;  %v4457_v59 = vpack.c.bf16 %v4434_v49, %v4432_v57  ;;  %vm5502_vm8 = vmmov %vm5486_vm0  ;;  %v3719_v13 = vld [vmem:[%s5445_s6 + $0x70] sm:$0xff]  ;;  %v3717_v18 = vld [vmem:[%s5445_s6 + $0x60] sm:$0xff] }
 0x2a7   : > { %3333 = vmatmul.msk.bf16.vlgmr.msra.gmra.mxu3 %vm5495_vm12, %v1287_v25  ;;  %v907_v48 = vsel %vm906_vm2, %v4323_v35, %v903_v43  ;;  %v4436_v51 = vld [vmem:[#allocation2 + $0x22] sm:$0xff]  ;;  %v1195_v35 = vmul.f32 %v4405_v34, %v4430_v21  ;;  %v4466_v39 = vpop.permute.xlu2 %988  ;;  %v1015_v40 = vpack.c.bf16 %v1009_v55, %v1008_v63  ;;  %vm5503_vm7 = vmmov %vm5486_vm0  ;;  %v4494_v16 = vpop.permute.xlu0 %993  ;;  %5505 = vst [vmem:[#allocation7_spill] sm:$0xff] %v4503_v2 }
 0x2a8   : > { %v912_v52 = vsel %vm909_vm3, %v911_v46, %v907_v48  ;;  %5499 = vst [vmem:[#allocation5_spill] sm:$0xff] %v4466_v39  ;;  %v1288_v3 = vpack.c.bf16 %v1282_v38, %v1281_v58  ;;  %v4505_v20 = vld [vmem:[#allocation2 + $0x28] sm:$0xff]  ;;  %1491 = vmatpush.bf16.msra.mxu2 %v3715_v10  ;;  %1655 = vmatpush.bf16.msrb.mxu3 %v3719_v13  ;;  %vm5508_vm9 = vmmov %vm5486_vm0 }
 0x2a9   : > { %v935_v56 = vmul.f32 %v912_v52, %v4130_v4  ;;  %v4464_v4 = vmul.f32 %v4430_v21, %v4436_v51  ;;  %v1202_v36 = vpack.c.bf16 %v1196_v37, %v1195_v35  ;;  %5504 = vst [vmem:[#allocation6_spill] sm:$0xff] %v4494_v16  ;;  %1577 = vmatpush.bf16.msrb.mxu1 %v3717_v18  ;;  %v1026_v14 = vld [vmem:[#allocation2 + $0x21] sm:$0xff]  ;;  %v4515_v28 = vld [vmem:[#allocation2 + $0x29] sm:$0xff]  ;;  %vm5509_vm10 = vmmov %vm5486_vm0 }
 0x2aa   : > { %v1010_v30 = vmul.f32 %v4427_v47, %v4466_v39  ;;  %v1011_v44 = vmul.f32 %v4494_v16, %v4505_v20  ;;  %v1197_v32 = vmul.f32 %v4503_v2, %v4436_v51  ;;  %v1283_v61 = vmul.f32 %v4466_v39, %v4505_v20  ;;  %v3722_v63 = vld [vmem:[%s5445_s6 + $0x88] sm:$0xff]  ;;  %vm5510_vm12 = vmmov %vm5486_vm0 }
 0x2ab   : > { %v4459_v24 = vld [vmem:[#allocation2 + $0x2a] sm:$0xff]  ;;  %955 = vst.msk [vmem:[#allocation2 + $0x39] sm:$0xff] %vm5498_vm5, %v935_v56  ;;  %v1032_v46 = vpack.c.bf16 %v4515_v28, %v1026_v14  ;;  %1740 = vmatpush.bf16.msrb.mxu0 %v3722_v63  ;;  %vm5514_vm13 = vmmov %vm5486_vm0  ;;  %v1530_v63 = vmul.f32 %v4365_v0, %v4425_v9  ;;  %v1532_v9 = vmul.f32 %v4409_v27, %v4505_v20 }
 0x2ac   : > { %v4472_v54 = vmul.f32 %v4438_v53, %v4459_v24  ;;  %v4509_v23 = vld [vmem:[#allocation2 + $0x30] sm:$0xff]  ;;  %v1016_v52 = vpack.c.bf16 %v1011_v44, %v1010_v30  ;;  %vm5515_vm14 = vmmov %vm5486_vm0 }
 0x2ad   : > { %v1284_v42 = vmul.f32 %v4509_v23, %v4494_v16  ;;  %v4545_v56 = vpop.permute.xlu1 %1003  ;;  %vm5516_vm15 = vmmov %vm5486_vm0 }
 0x2ae   : > { %v1702_v5 = vpack.c.bf16 %v4472_v54, %v4464_v4  ;;  %5511 = vst [vmem:[#allocation10_spill] sm:$0xff] %v4545_v56  ;;  %vm5517_vm1 = vmmov %vm5486_vm0 }
 0x2af   : > { %v4507_v22 = vpop.permute.xlu2 %1180  ;;  %v4536_v48 = vpop.permute.xlu0 %998  ;;  %v1289_v35 = vpack.c.bf16 %v1284_v42, %v1283_v61  ;;  %v1443_v61 = vmul.f32 %v4373_v11, %v4313_v31  ;;  %v1444_v42 = vmul.f32 %v4405_v34, %v4376_v15  ;;  %vm5518_vm2 = vmmov %vm5486_vm0  ;;  %v1531_v34 = vmul.f32 %v4427_v47, %v4359_v60 }
 0x2b0   : > { %5506 = vst [vmem:[#allocation8_spill] sm:$0xff] %v4507_v22  ;;  %v1198_v33 = vmul.f32 %v4507_v22, %v4459_v24  ;;  %v1012_v6 = vmul.f32 %v4509_v23, %v4536_v48  ;;  %vm5519_vm3 = vmmov %vm5486_vm0 }
 0x2b1   : > { %5507 = vst [vmem:[#allocation9_spill] sm:$0xff] %v4536_v48  ;;  %vm5520_vm5 = vmmov %vm5486_vm0 }
 0x2b2   : > { %v4499_v45 = vld [vmem:[#allocation2 + $0x32] sm:$0xff]  ;;  %v4501_v12 = vld [vmem:[#allocation2 + $0x3a] sm:$0xff]  ;;  %v1203_v55 = vpack.c.bf16 %v1198_v33, %v1197_v32 }
 0x2b3   : > { %3290 = vmatmul.msk.bf16.gmra.mxu0 %vm5500_vm6, %v4457_v59  ;;  %v4513_v25 = vmul.f32 %v4503_v2, %v4499_v45  ;;  %v4519_v29 = vmul.f32 %v4507_v22, %v4501_v12  ;;  %v965_v37 = vld [vmem:[#allocation2 + $0x38] sm:$0xff]  ;;  %vm5521_vm6 = vmmov %vm5486_vm0  ;;  %v1448_v47 = vmul.f32 %v4507_v22, %v4499_v45 }
 0x2b4   : > { %3302 = vmatmul.msk.bf16.gmra.mxu2 %vm5501_vm11, %v1015_v40  ;;  %v1278_v40 = vld [vmem:[#allocation2 + $0x40] sm:$0xff]  ;;  %v1013_v7 = vmul.f32 %v4545_v56, %v965_v37  ;;  %v1285_v13 = vmul.f32 %v4536_v48, %v965_v37  ;;  %vm5522_vm11 = vmmov %vm5486_vm0 }
 0x2b5   : > { %v1703_v43 = vpack.c.bf16 %v4519_v29, %v4513_v25  ;;  %v1286_v18 = vmul.f32 %v1278_v40, %v4545_v56 }
 0x2b6   : > { %3318 = vmatmul.msk.bf16.gmra.mxu1 %vm5502_vm8, %v1202_v36  ;;  %v1028_v36 = vld [vmem:[#allocation2 + $0x31] sm:$0xff]  ;;  %v1017_v44 = vpack.c.bf16 %v1013_v7, %v1012_v6  ;;  %v3721_v6 = vld [vmem:[%s5445_s6 + $0x80] sm:$0xff]  ;;  %vm5523_vm8 = vmmov %vm5486_vm0 }
 0x2b7   : > { %3334 = vmatmul.msk.bf16.gmra.mxu3 %vm5503_vm7, %v1288_v3  ;;  %v4547_v58 = vpop.permute.xlu2 %1185  ;;  %v4549_v38 = vpop.permute.xlu0 %1190  ;;  %v1029_v3 = vld [vmem:[#allocation2 + $0x39] sm:$0xff]  ;;  %v1290_v33 = vpack.c.bf16 %v1286_v18, %v1285_v13  ;;  %1741 = vmatpush.bf16.msrb.mxu0 %v3721_v6  ;;  %vm5524_vm7 = vmmov %vm5486_vm0  ;;  %v1614_v13 = vld [vmem:[#allocation2 + $0x49] sm:$0xff] }
 0x2b8   : > { %5512 = vst [vmem:[#allocation11_spill] sm:$0xff] %v4547_v58  ;;  %v1199_v8 = vmul.f32 %v4547_v58, %v4499_v45  ;;  %v1200_v10 = vmul.f32 %v4549_v38, %v4501_v12  ;;  %v1033_v30 = vpack.c.bf16 %v1029_v3, %v1028_v36  ;;  %v1364_v45 = vld [vmem:[#allocation2 + $0x41] sm:$0xff] }
 0x2b9   : > { %5513 = vst [vmem:[#allocation12_spill] sm:$0xff] %v4549_v38 }
 0x2ba   : > { %v1204_v32 = vpack.c.bf16 %v1200_v10, %v1199_v8  ;;  %v1538_v8 = vpack.c.bf16 %v1532_v9, %v1531_v34  ;;  %v1368_v10 = vpack.c.bf16 %v1364_v45, %v1029_v3 }
 0x2c3   : > { %3291 = vmatmul.msk.bf16.gmra.mxu0 %vm5508_vm9, %v1032_v46  ;;  %vm5525_vm9 = vmmov %vm5486_vm0 }
 0x2c4   : > { %3303 = vmatmul.msk.bf16.gmra.mxu2 %vm5486_vm0, %v1016_v52  ;;  %v1529_v52 = vmul.f32 %v4380_v19, %v4299_v26  ;;  %v1445_v19 = vmul.f32 %v4407_v17, %v4430_v21  ;;  %v1447_v17 = vmul.f32 %v4503_v2, %v4459_v24  ;;  %v1691_v24 = vld [vmem:[#allocation2 + $0x42] sm:$0xff] }
 0x2c6   : > { %3319 = vmatmul.msk.bf16.gmra.mxu1 %vm5509_vm10, %v1203_v55  ;;  %v1365_v55 = vpack.c.bf16 %v4432_v57, %v4367_v1  ;;  %v1537_v11 = vpack.c.bf16 %v1530_v63, %v1529_v52  ;;  %v1446_v1 = vmul.f32 %v4438_v53, %v4436_v51  ;;  %v1366_v57 = vpack.c.bf16 %v1026_v14, %v4434_v49  ;;  %vm5526_vm10 = vmmov %vm5486_vm0 }
 0x2c7   : > { %3335 = vmatmul.msk.bf16.gmra.mxu3 %vm5510_vm12, %v1289_v35  ;;  %v1451_v35 = vpack.c.bf16 %v1444_v42, %v1443_v61  ;;  %v1533_v51 = vmul.f32 %v4509_v23, %v4466_v39  ;;  %v1534_v49 = vmul.f32 %v4494_v16, %v965_v37  ;;  %v1453_v20 = vpack.c.bf16 %v1448_v47, %v1447_v17  ;;  %vm5527_vm12 = vmmov %vm5486_vm0 }
 0x2c8   : > { %v1452_v7 = vpack.c.bf16 %v1446_v1, %v1445_v19  ;;  %v1449_v23 = vmul.f32 %v4547_v58, %v4501_v12  ;;  %v1450_v37 = vmul.f32 %v1691_v24, %v4549_v38 }
 0x2c9   : > { %v1539_v14 = vpack.c.bf16 %v1534_v49, %v1533_v51  ;;  %v1692_v49 = vld [vmem:[#allocation2 + $0x4a] sm:$0xff] }
 0x2ca   : > { %v1454_v18 = vpack.c.bf16 %v1450_v37, %v1449_v23 }
 0x2d3   : > { %3292 = vmatmul.msk.bf16.gmra.mxu0 %vm5514_vm13, %v1033_v30  ;;  %vm5528_vm13 = vmmov %vm5486_vm0 }
 0x2d4   : > { %3304 = vmatmul.msk.bf16.gmra.mxu2 %vm5515_vm14, %v1017_v44  ;;  %vm5529_vm14 = vmmov %vm5486_vm0 }
 0x2d6   : > { %3320 = vmatmul.msk.bf16.gmra.mxu1 %vm5516_vm15, %v1204_v32  ;;  %v1618_v32 = vpack.c.bf16 %v1614_v13, %v1364_v45  ;;  %vm5530_vm15 = vmmov %vm5486_vm0 }
 0x2d7   : > { %3336 = vmatmul.msk.bf16.gmra.mxu3 %vm5517_vm1, %v1290_v33  ;;  %vm5531_vm1 = vmmov %vm5486_vm0 }
 0x2e3   : > { %3349 = vmatmul.msk.bf16.vlgmr.msra.gmra.mxu0 %vm5518_vm2, %v1365_v55  ;;  %vm5532_vm2 = vmmov %vm5486_vm0 }
 0x2e4   : > { %3365 = vmatmul.msk.bf16.vlgmr.msra.gmra.mxu2 %vm5519_vm3, %v1451_v35  ;;  %vm5533_vm3 = vmmov %vm5486_vm0 }
 0x2e6   : > { %3381 = vmatmul.msk.bf16.vlgmr.msrb.gmra.mxu1 %vm5520_vm5, %v1537_v11  ;;  %vm5534_vm5 = vmmov %vm5486_vm0 }
 0x2e7   : > { %3397 = vmatmul.msk.bf16.vlgmr.msrb.gmra.mxu3 %vm5521_vm6, %v4457_v59  ;;  %v1367_v59 = vpack.c.bf16 %v1028_v36, %v4515_v28  ;;  %v1535_v28 = vmul.f32 %v1278_v40, %v4536_v48  ;;  %vm5535_vm6 = vmmov %vm5486_vm0 }
 0x2f3   : > { %3350 = vmatmul.msk.bf16.gmra.mxu0 %vm5522_vm11, %v1366_v57  ;;  %vm5536_vm11 = vmmov %vm5486_vm0 }
 0x2f4   : > { %3366 = vmatmul.msk.bf16.gmra.mxu2 %vm5523_vm8, %v1452_v7  ;;  %vm5537_vm8 = vmmov %vm5486_vm0 }
 0x2f6   : > { %3382 = vmatmul.msk.bf16.gmra.mxu1 %vm5524_vm7, %v1538_v8  ;;  %vm5538_vm7 = vmmov %vm5486_vm0 }
 0x2f7   : > { %3398 = vmatmul.msk.bf16.gmra.mxu3 %vm5525_vm9, %v1032_v46  ;;  %v1528_v46 = vld [vmem:[#allocation2 + $0x48] sm:$0xff]  ;;  %vm5539_vm9 = vmmov %vm5486_vm0 }
 0x2f8   : > { %v1536_v36 = vmul.f32 %v1528_v46, %v4545_v56 }
 0x2fa   : > { %v1540_v44 = vpack.c.bf16 %v1536_v36, %v1535_v28 }
 0x303   : > { %3351 = vmatmul.msk.bf16.gmra.mxu0 %vm5486_vm0, %v1367_v59 }
 0x304   : > { %3367 = vmatmul.msk.bf16.gmra.mxu2 %vm5526_vm10, %v1453_v20  ;;  %v1699_v20 = vmul.f32 %v1691_v24, %v4547_v58  ;;  %vm5540_vm10 = vmmov %vm5486_vm0 }
 0x306   : > { %3383 = vmatmul.msk.bf16.gmra.mxu1 %vm5527_vm12, %v1539_v14  ;;  %v1700_v14 = vmul.f32 %v1692_v49, %v4549_v38  ;;  %vm5541_vm12 = vmmov %vm5486_vm0 }
 0x307   : > { %3399 = vmatmul.msk.bf16.gmra.mxu3 %vm5528_vm13, %v1033_v30  ;;  %vm5542_vm13 = vmmov %vm5486_vm0 }
 0x308   : > { %v1704_v37 = vpack.c.bf16 %v1700_v14, %v1699_v20 }
 0x313   : > { %3352 = vmatmul.msk.bf16.gmra.mxu0 %vm5529_vm14, %v1368_v10  ;;  %vm5543_vm14 = vmmov %vm5486_vm0 }
 0x314   : > { %3368 = vmatmul.msk.bf16.gmra.mxu2 %vm5530_vm15, %v1454_v18  ;;  %vm5544_vm15 = vmmov %vm5486_vm0 }
 0x316   : > { %3384 = vmatmul.msk.bf16.gmra.mxu1 %vm5531_vm1, %v1540_v44  ;;  %vm5545_vm1 = vmmov %vm5486_vm0 }
 0x317   : > { %3400 = vmatmul.msk.bf16.gmra.mxu3 %vm5532_vm2, %v1618_v32  ;;  %vm5546_vm2 = vmmov %vm5486_vm0 }
 0x320   : > { %v1072_v12 = vpop.f32.mrf.mxu0 }
 0x323   : > { %v1243_v30 = vpop.f32.mrf.mxu1  ;;  %3413 = vmatmul.msk.bf16.vlgmr.msrb.gmra.mxu0 %vm5533_vm3, %v1701_v41  ;;  %vm5547_vm3 = vmmov %vm5486_vm0 }
 0x327   : > { %v1125_v3 = vpop.f32.mrf.mxu2 }
 0x328   : > { %v1074_v40 = vpop.f32.mrf.mxu0  ;;  %v1126_v33 = vadd.f32 %v1125_v3, %v1072_v12 }
 0x32a   : > { %v1329_v61 = vpop.f32.mrf.mxu3  ;;  %v1263_v10 = vadd.f32 %v1243_v30, %v1126_v33 }
 0x32b   : > { %v1245_v42 = vpop.f32.mrf.mxu1 }
 0x32c   : > { %v1349_v13 = vadd.f32 %v1329_v61, %v1263_v10 }
 0x32f   : > { %v1127_v63 = vpop.f32.mrf.mxu2 }
 0x330   : > { %v1077_v52 = vpop.f32.mrf.mxu0  ;;  %v1128_v55 = vadd.f32 %v1127_v63, %v1074_v40 }
 0x332   : > { %v1331_v35 = vpop.f32.mrf.mxu3  ;;  %v1264_v6 = vadd.f32 %v1245_v42, %v1128_v55 }
 0x333   : > { %v1248_v11 = vpop.f32.mrf.mxu1  ;;  %3414 = vmatmul.msk.bf16.gmra.mxu0 %vm5534_vm5, %v1702_v5  ;;  %vm5548_vm5 = vmmov %vm5486_vm0 }
 0x334   : > { %v4624_v19 = vadd.f32 %v1331_v35, %v1264_v6 }
 0x337   : > { %v1130_v62 = vpop.f32.mrf.mxu2 }
 0x338   : > { %v1079_v50 = vpop.f32.mrf.mxu0  ;;  %v1131_v41 = vadd.f32 %v1130_v62, %v1077_v52 }
 0x33a   : > { %v1334_v1 = vpop.f32.mrf.mxu3  ;;  %v1265_v32 = vadd.f32 %v1248_v11, %v1131_v41 }
 0x33b   : > { %v1250_v34 = vpop.f32.mrf.mxu1 }
 0x33c   : > { %v1351_v12 = vadd.f32 %v1334_v1, %v1265_v32 }
 0x33f   : > { %v1132_v57 = vpop.f32.mrf.mxu2 }
 0x340   : > { %v1082_v9 = vpop.f32.mrf.mxu0  ;;  %v1133_v7 = vadd.f32 %v1132_v57, %v1079_v50 }
 0x342   : > { %v1336_v8 = vpop.f32.mrf.mxu3  ;;  %v1266_v17 = vadd.f32 %v1250_v34, %v1133_v7  ;;  %v4660_v34 = vld [vmem:[%s5449_s10 + $0x38] sm:$0xff] }
 0x343   : > { %3415 = vmatmul.msk.bf16.gmra.mxu0 %vm5535_vm6, %v1703_v43  ;;  %v1253_v54 = vpop.f32.mrf.mxu1  ;;  %1825 = vmatpush.msrb.mxu2 %v4660_v34  ;;  %vm5549_vm6 = vmmov %vm5486_vm0 }
 0x344   : > { %v4630_v4 = vadd.f32 %v1336_v8, %v1266_v17  ;;  %3418 = vmatpush.xpose.msk.msra.mxu1 %vm5537_vm8, %v4660_v34  ;;  %1934 = vmatpush.msra.mxu3 %v4660_v34  ;;  %v4671_v17 = vld [vmem:[%s5449_s10 + $0x30] sm:$0xff]  ;;  %vm5551_vm8 = vmmov %vm5486_vm0 }
 0x345   : > { %1826 = vmatpush.msrb.mxu2 %v4671_v17 }
 0x346   : > { %1935 = vmatpush.msra.mxu3 %v4671_v17 }
 0x347   : > { %v1135_v47 = vpop.f32.mrf.mxu2 }
 0x348   : > { %v1084_v5 = vpop.f32.mrf.mxu0  ;;  %v1136_v51 = vadd.f32 %v1135_v47, %v1082_v9  ;;  %3419 = vmatpush.xpose.msk.msra.mxu1 %vm5538_vm7, %v4671_v17  ;;  %vm5552_vm7 = vmmov %vm5486_vm0 }
 0x34a   : > { %v1339_v59 = vpop.f32.mrf.mxu3  ;;  %v1267_v55 = vadd.f32 %v1253_v54, %v1136_v51  ;;  %v4682_v51 = vld [vmem:[%s5449_s10 + $0x28] sm:$0xff] }
 0x34b   : > { %v1255_v25 = vpop.f32.mrf.mxu1  ;;  %1827 = vmatpush.msrb.mxu2 %v4682_v51  ;;  %1936 = vmatpush.msra.mxu3 %v4682_v51 }
 0x34c   : > { %v1353_v30 = vadd.f32 %v1339_v59, %v1267_v55  ;;  %3420 = vmatpush.xpose.msk.msra.mxu1 %vm5539_vm9, %v4682_v51  ;;  %vm5553_vm9 = vmmov %vm5486_vm0 }
 0x34f   : > { %v1137_v45 = vpop.f32.mrf.mxu2 }
 0x350   : > { %v4634_v46 = vpop.f32.mrf.mxu0  ;;  %v1138_v23 = vadd.f32 %v1137_v45, %v1084_v5  ;;  %v4691_v45 = vld [vmem:[%s5449_s10 + $0x20] sm:$0xff] }
 0x351   : > { %1828 = vmatpush.msrb.mxu2 %v4691_v45  ;;  %3421 = vmatpush.xpose.msk.msra.mxu1 %vm5486_vm0, %v4691_v45 }
 0x352   : > { %v1268_v29 = vadd.f32 %v1255_v25, %v1138_v23  ;;  %v1341_v43 = vpop.f32.mrf.mxu3  ;;  %1937 = vmatpush.msra.mxu3 %v4691_v45 }
 0x353   : > { %3416 = vmatmul.msk.bf16.gmra.mxu0 %vm5536_vm11, %v1704_v37  ;;  %v1258_v52 = vpop.f32.mrf.mxu1  ;;  %vm5550_vm11 = vmmov %vm5486_vm0 }
 0x354   : > { %v4637_v28 = vadd.f32 %v1341_v43, %v1268_v29  ;;  %v4700_v43 = vld [vmem:[%s5449_s10 + $0x18] sm:$0xff] }
 0x355   : > { %1829 = vmatpush.msrb.mxu2 %v4700_v43  ;;  %3422 = vmatpush.xpose.msk.msra.mxu1 %vm5540_vm10, %v4700_v43 }
 0x356   : > { %1938 = vmatpush.msra.mxu3 %v4700_v43 }
 0x357   : > { %v1140_v42 = vpop.f32.mrf.mxu2 }
 0x358   : > { %v4639_v36 = vpop.f32.mrf.mxu0  ;;  %v1141_v55 = vadd.f32 %v1140_v42, %v4634_v46 }
 0x35a   : > { %v4647_v35 = vpop.f32.mrf.mxu3  ;;  %v1269_v38 = vadd.f32 %v1258_v52, %v1141_v55 }
 0x35b   : > { %v4653_v50 = vpop.f32.mrf.mxu1 }
 0x35c   : > { %v1355_v53 = vadd.f32 %v4647_v35, %v1269_v38 }
 0x35f   : > { %v4649_v6 = vpop.f32.mrf.mxu2 }
 0x360   : > { %v1407_v18 = vpop.f32.mrf.mxu0  ;;  %v1143_v46 = vadd.f32 %v4649_v6, %v4639_v36 }
 0x361   : > { %v4641_v24 = vadd.f32 %v1407_v18, %v1349_v13  ;;  %v4709_v18 = vld [vmem:[%s5449_s10 + $0x10] sm:$0xff] }
 0x362   : > { %v4655_v62 = vpop.f32.mrf.mxu3  ;;  %1830 = vmatpush.msrb.mxu2 %v4709_v18  ;;  %3423 = vmatpush.xpose.msk.msra.mxu1 %vm5541_vm12, %v4709_v18 }
 0x363   : > { %v1579_v1 = vpop.f32.mrf.mxu1  ;;  %1939 = vmatpush.msra.mxu3 %v4709_v18 }
 0x367   : > { %v1493_v11 = vpop.f32.mrf.mxu2 }
 0x368   : > { %v4643_v44 = vpop.f32.mrf.mxu0  ;;  %v1513_v56 = vadd.f32 %v1493_v11, %v4641_v24 }
 0x36a   : > { %v4662_v9 = vpop.f32.mrf.mxu3  ;;  %v1599_v52 = vadd.f32 %v1579_v1, %v1513_v56 }
 0x36b   : > { %v1581_v8 = vpop.f32.mrf.mxu1 }
 0x36c   : > { %v1677_v38 = vadd.f32 %v4662_v9, %v1599_v52 }
 0x36f   : > { %v1495_v57 = vpop.f32.mrf.mxu2 }
 0x370   : > { %v1412_v40 = vpop.f32.mrf.mxu0 }
 0x371   : > { %v4645_v3 = vadd.f32 %v1412_v40, %v1351_v12 }
 0x372   : > { %v1659_v5 = vpop.f32.mrf.mxu3 }
 0x373   : > { %v1584_v49 = vpop.f32.mrf.mxu1 }
 0x377   : > { %v1498_v47 = vpop.f32.mrf.mxu2 }
 0x378   : > { %v1414_v63 = vpop.f32.mrf.mxu0  ;;  %v1515_v16 = vadd.f32 %v1498_v47, %v4645_v3 }
 0x379   : > { %v1430_v48 = vadd.f32 %v1414_v63, %v4630_v4 }
 0x37a   : > { %v1662_v20 = vpop.f32.mrf.mxu3 }
 0x37b   : > { %v1586_v37 = vpop.f32.mrf.mxu1 }
 0x37f   : > { %v1500_v14 = vpop.f32.mrf.mxu2 }
 0x380   : > { %v1417_v33 = vpop.f32.mrf.mxu0  ;;  %v1516_v2 = vadd.f32 %v1500_v14, %v1430_v48 }
 0x381   : > { %v4651_v61 = vadd.f32 %v1417_v33, %v1353_v30  ;;  %v1428_v30 = vadd.f32 %v4643_v44, %v4624_v19 }
 0x382   : > { %v1664_v25 = vpop.f32.mrf.mxu3  ;;  %v1602_v3 = vadd.f32 %v1586_v37, %v1516_v2 }
 0x383   : > { %v1589_v13 = vpop.f32.mrf.mxu1  ;;  %v1514_v33 = vadd.f32 %v1495_v57, %v1428_v30  ;;  %v1601_v57 = vadd.f32 %v1584_v49, %v1515_v16 }
 0x384   : > { %v1680_v14 = vadd.f32 %v1664_v25, %v1602_v3 }
 0x385   : > { %v1600_v22 = vadd.f32 %v1581_v8, %v1514_v33  ;;  %v1270_v8 = vadd.f32 %v4653_v50, %v1143_v46  ;;  %v1679_v35 = vadd.f32 %v1662_v20, %v1601_v57 }
 0x387   : > { %v1503_v29 = vpop.f32.mrf.mxu2  ;;  %v1678_v63 = vadd.f32 %v1659_v5, %v1600_v22  ;;  %v1356_v2 = vadd.f32 %v4655_v62, %v1270_v8 }
 0x388   : > { %v1419_v41 = vpop.f32.mrf.mxu0  ;;  %v1517_v24 = vadd.f32 %v1503_v29, %v4651_v61  ;;  %v1785_v61 = vld [vmem:[%s5449_s10 + $0x8] sm:$0xff] }
 0x389   : > { %v1432_v42 = vadd.f32 %v1419_v41, %v4637_v28  ;;  %1831 = vmatpush.msrb.mxu2 %v1785_v61  ;;  %3424 = vmatpush.xpose.msk.msra.mxu1 %vm5542_vm13, %v1785_v61 }
 0x38a   : > { %v1667_v32 = vpop.f32.mrf.mxu3  ;;  %v1603_v47 = vadd.f32 %v1589_v13, %v1517_v24  ;;  %1940 = vmatpush.msra.mxu3 %v1785_v61 }
 0x38b   : > { %v1591_v58 = vpop.f32.mrf.mxu1 }
 0x38c   : > { %v1681_v50 = vadd.f32 %v1667_v32, %v1603_v47 }
 0x38f   : > { %v1505_v12 = vpop.f32.mrf.mxu2 }
 0x390   : > { %v1422_v7 = vpop.f32.mrf.mxu0  ;;  %v1518_v4 = vadd.f32 %v1505_v12, %v1432_v42 }
 0x391   : > { %v1433_v11 = vadd.f32 %v1422_v7, %v1355_v53  ;;  %v3776_v53 = vld [vmem:[%s5446_s7] ss:$0 sm:$0xff] }
 0x392   : > { %v1669_v19 = vpop.f32.mrf.mxu3  ;;  %v1604_v6 = vadd.f32 %v1591_v58, %v1518_v4  ;;  %v1784_v58 = vld [vmem:[%s5449_s10] sm:$0xff] }
 0x393   : > { %v1594_v28 = vpop.f32.mrf.mxu1  ;;  %1832 = vmatpush.msrb.mxu2 %v1784_v58  ;;  %1941 = vmatpush.msra.mxu3 %v1784_v58 }
 0x394   : > { %v1682_v7 = vadd.f32 %v1669_v19, %v1604_v6  ;;  %3425 = vmatpush.xpose.msk.msra.mxu1 %vm5544_vm15, %v1784_v58 }
 0x395   : > { %3428 = vmatpush.xpose.msk.msra.mxu2 %vm5543_vm14, %v4660_v34 }
 0x397   : > { %v1508_v44 = vpop.f32.mrf.mxu2 }
 0x398   : > { %v4676_v54 = vpop.f32.mrf.mxu0  ;;  %v1519_v48 = vadd.f32 %v1508_v44, %v1433_v11 }
 0x399   : > { %v1434_v62 = vadd.f32 %v4676_v54, %v1356_v2  ;;  %3429 = vmatpush.xpose.msk.msra.mxu2 %vm5545_vm1, %v4671_v17 }
 0x39a   : > { %v1605_v22 = vadd.f32 %v1594_v28, %v1519_v48  ;;  %v1672_v5 = vpop.f32.mrf.mxu3 }
 0x39b   : > { %v1596_v55 = vpop.f32.mrf.mxu1 }
 0x39c   : > { %v1683_v37 = vadd.f32 %v1672_v5, %v1605_v22 }
 0x39d   : > { %3430 = vmatpush.xpose.msk.msra.mxu2 %vm5546_vm2, %v4682_v51 }
 0x39f   : > { %v1510_v49 = vpop.f32.mrf.mxu2 }
 0x3a0   : > { %v1743_v59 = vpop.f32.mrf.mxu0  ;;  %v1520_v25 = vadd.f32 %v1510_v49, %v1434_v62 }
 0x3a1   : > { %v1763_v56 = vadd.f32 %v1743_v59, %v1677_v38  ;;  %3431 = vmatpush.xpose.msk.msra.mxu2 %vm5547_vm3, %v4691_v45 }
 0x3a2   : > { %v1606_v34 = vadd.f32 %v1596_v55, %v1520_v25  ;;  %v1674_v52 = vpop.f32.mrf.mxu3 }
 0x3a3   : > { %v1774_v59 = vadd.f32 %v3776_v53, %v1763_v56 }
 0x3a4   : > { %v1684_v24 = vadd.f32 %v1674_v52, %v1606_v34 }
 0x3a5   : > { %v1793_v54 = vsel %vm1792_vm4, %v1774_v59, 0.0  ;;  %3432 = vmatpush.xpose.msk.msra.mxu2 %vm5548_vm5, %v4700_v43 }
 0x3a8   : > { %v1745_v23 = vpop.f32.mrf.mxu0 }
 0x3a9   : > { %v1764_v36 = vadd.f32 %v1745_v23, %v1678_v63  ;;  %3433 = vmatpush.xpose.msk.msra.mxu2 %vm5549_vm6, %v4709_v18 }
 0x3ab   : > { %v4738_v1 = vadd.f32 %v3776_v53, %v1764_v36 }
 0x3ad   : > { %v1794_v29 = vsel %vm1792_vm4, %v4738_v1, 0.0  ;;  %3434 = vmatpush.xpose.msk.msra.mxu2 %vm5550_vm11, %v1785_v61 }
 0x3ae   : > { %v1795_v30 = vadd.f32 %v1794_v29, %v1793_v54 }
 0x3b0   : > { %v1748_v10 = vpop.f32.mrf.mxu0 }
 0x3b1   : > { %v1765_v16 = vadd.f32 %v1748_v10, %v1679_v35  ;;  %3435 = vmatpush.xpose.msk.msra.mxu2 %vm5551_vm8, %v1784_v58 }
 0x3b3   : > { %v1776_v20 = vadd.f32 %v3776_v53, %v1765_v16 }
 0x3b5   : > { %v1796_v12 = vsel %vm1792_vm4, %v1776_v20, 0.0 }
 0x3b6   : > { %v1797_v42 = vadd.f32 %v1796_v12, %v1795_v30 }
 0x3b8   : > { %v1750_v40 = vpop.f32.mrf.mxu0 }
 0x3b9   : > { %v1766_v9 = vadd.f32 %v1750_v40, %v1680_v14 }
 0x3bb   : > { %v1777_v10 = vadd.f32 %v3776_v53, %v1766_v9 }
 0x3bd   : > { %v1798_v33 = vsel %vm1792_vm4, %v1777_v10, 0.0 }
 0x3be   : > { %v1799_v57 = vadd.f32 %v1798_v33, %v1797_v42 }
 0x3c0   : > { %v1753_v39 = vpop.f32.mrf.mxu0 }
 0x3c1   : > { %v1767_v23 = vadd.f32 %v1753_v39, %v1681_v50 }
 0x3c3   : > { %v1778_v39 = vadd.f32 %v3776_v53, %v1767_v23 }
 0x3c5   : > { %v1800_v19 = vsel %vm1792_vm4, %v1778_v39, 0.0 }
 0x3c6   : > { %v1801_v4 = vadd.f32 %v1800_v19, %v1799_v57 }
 0x3c8   : > { %v1755_v41 = vpop.f32.mrf.mxu0 }
 0x3c9   : > { %v1768_v13 = vadd.f32 %v1755_v41, %v1682_v7 }
 0x3cb   : > { %v1779_v46 = vadd.f32 %v3776_v53, %v1768_v13 }
 0x3cd   : > { %v1802_v11 = vsel %vm1792_vm4, %v1779_v46, 0.0 }
 0x3ce   : > { %v1803_v8 = vadd.f32 %v1802_v11, %v1801_v4 }
 0x3d0   : > { %v1758_v32 = vpop.f32.mrf.mxu0 }
 0x3d1   : > { %v1769_v40 = vadd.f32 %v1758_v32, %v1683_v37 }
 0x3d3   : > { %v1780_v44 = vadd.f32 %v3776_v53, %v1769_v40 }
 0x3d5   : > { %v1804_v17 = vsel %vm1792_vm4, %v1780_v44, 0.0 }
 0x3d6   : > { %v1805_v38 = vadd.f32 %v1804_v17, %v1803_v8 }
 0x3d8   : > { %v1760_v63 = vpop.f32.mrf.mxu0 }
 0x3d9   : > { %v1770_v3 = vadd.f32 %v1760_v63, %v1684_v24 }
 0x3db   : > { %v1781_v48 = vadd.f32 %v3776_v53, %v1770_v3 }
 0x3dd   : > { %v1806_v35 = vsel %vm1792_vm4, %v1781_v48, 0.0 }
 0x3de   : > { %v1807_v47 = vadd.f32 %v1806_v35, %v1805_v38 }
 0x3e0   : > { %v1808_v51 = vrot.slane %v1807_v47, 4 }
 0x3e2   : > { %v1809_v36 = vadd.f32 %v1808_v51, %v1807_v47  ;;  %v2011_v51 = vld [vmem:[%s533_s28] sm:$0x3] }
 0x3e4   : > { %v1810_v6 = vrot.slane %v1809_v36, 2 }
 0x3e6   : > { %v1811_v28 = vadd.f32 %v1810_v6, %v1809_v36 }
 0x3e8   : > { %v1812_v41 = vrot.slane %v1811_v28, 1 }
 0x3ea   : > { %v1813_v14 = vadd.f32 %v1812_v41, %v1811_v28  ;;  %v3777_v28 = vld [vmem:[%s5447_s8] ss:$0 sm:$0xff]  ;;  %v2012_v41 = vperm.slane %v2011_v51, 0 }
 0x3ec   : > { %3417 = vmatmul.msk.f32.vlgmr.msrb.gmra.mxu2 %vm1792_vm4, %v1813_v14  ;;  %v2021_v14 = vperm.slane %v2011_v51, 1 }
 0x46f   : > { %v1834_v45 = vpop.f32.mrf.mxu2 }
 0x470   : > { %v1837_v56 = vmul.f32 0.0078125, %v1834_v45 }
 0x472   : > { %3426 = vmatmul.msk.f32.vlgmr.msra.gmra.mxu1 %vm5552_vm7, %v1837_v56 }
 0x4ef   : > { %v1882_v43 = vpop.f32.mrf.mxu1 }
 0x4f0   : > { %v1885_v53 = vperm.slane %v1882_v43, 0 }
 0x4f2   : > { %v1886_v16 = vsub.f32 %v1774_v59, %v1885_v53  ;;  %v1887_v2 = vsub.f32 %v4738_v1, %v1885_v53  ;;  %v1888_v18 = vsub.f32 %v1776_v20, %v1885_v53  ;;  %v1889_v22 = vsub.f32 %v1777_v10, %v1885_v53 }
 0x4f3   : > { %v1890_v50 = vsub.f32 %v1778_v39, %v1885_v53  ;;  %v1891_v5 = vsub.f32 %v1779_v46, %v1885_v53  ;;  %v1892_v37 = vsub.f32 %v1780_v44, %v1885_v53  ;;  %v1893_v13 = vsub.f32 %v1781_v48, %v1885_v53 }
 0x4f4   : > { %v1894_v9 = vmul.f32 %v1886_v16, %v1886_v16  ;;  %v1895_v61 = vmul.f32 %v1887_v2, %v1887_v2  ;;  %v1896_v7 = vmul.f32 %v1888_v18, %v1888_v18  ;;  %v1897_v49 = vmul.f32 %v1889_v22, %v1889_v22 }
 0x4f5   : > { %v1898_v25 = vmul.f32 %v1890_v50, %v1890_v50  ;;  %v1899_v1 = vmul.f32 %v1891_v5, %v1891_v5  ;;  %v1900_v32 = vmul.f32 %v1892_v37, %v1892_v37  ;;  %v1901_v39 = vmul.f32 %v1893_v13, %v1893_v13 }
 0x4f6   : > { %v1902_v58 = vsel %vm1792_vm4, %v1894_v9, 0.0  ;;  %v1903_v62 = vsel %vm1792_vm4, %v1895_v61, 0.0  ;;  %v1905_v29 = vsel %vm1792_vm4, %v1896_v7, 0.0  ;;  %v1907_v20 = vsel %vm1792_vm4, %v1897_v49, 0.0  ;;  %v3778_v9 = vld [vmem:[%s5448_s9] ss:$0 sm:$0xff] }
 0x4f7   : > { %v1904_v23 = vadd.f32 %v1903_v62, %v1902_v58  ;;  %v1909_v54 = vsel %vm1792_vm4, %v1898_v25, 0.0  ;;  %v1911_v40 = vsel %vm1792_vm4, %v1899_v1, 0.0  ;;  %v1913_v30 = vsel %vm1792_vm4, %v1900_v32, 0.0 }
 0x4f8   : > { %v1915_v33 = vsel %vm1792_vm4, %v1901_v39, 0.0 }
 0x4f9   : > { %v1906_v59 = vadd.f32 %v1905_v29, %v1904_v23 }
 0x4fb   : > { %v1908_v10 = vadd.f32 %v1907_v20, %v1906_v59 }
 0x4fd   : > { %v1910_v12 = vadd.f32 %v1909_v54, %v1908_v10 }
 0x4ff   : > { %v1912_v55 = vadd.f32 %v1911_v40, %v1910_v12 }
 0x501   : > { %v1914_v34 = vadd.f32 %v1913_v30, %v1912_v55 }
 0x503   : > { %v1916_v46 = vadd.f32 %v1915_v33, %v1914_v34 }
 0x505   : > { %v1917_v42 = vrot.slane %v1916_v46, 4 }
 0x507   : > { %v1918_v19 = vadd.f32 %v1917_v42, %v1916_v46 }
 0x509   : > { %v1919_v44 = vrot.slane %v1918_v19, 2 }
 0x50b   : > { %v1920_v52 = vadd.f32 %v1919_v44, %v1918_v19 }
 0x50d   : > { %v1921_v57 = vrot.slane %v1920_v52, 1 }
 0x50f   : > { %v1922_v24 = vadd.f32 %v1921_v57, %v1920_v52  ;;  %v3730_v57 = vld [vmem:[%s5451_s12 + $0x38] sm:$0xff] }
 0x510   : > { %2300 = vmatpush.bf16.msrb.mxu1 %v3730_v57 }
 0x511   : > { %3427 = vmatmul.msk.f32.vlgmr.msra.gmra.mxu3 %vm1792_vm4, %v1922_v24  ;;  %v3726_v24 = vld [vmem:[%s5451_s12 + $0x18] sm:$0xff] }
 0x512   : > { %2365 = vmatpush.bf16.msrb.mxu3 %v3726_v24 }
 0x594   : > { %v1943_v11 = vpop.f32.mrf.mxu3 }
 0x595   : > { %v1946_v4 = vmul.f32 0.0078125, %v1943_v11  ;;  %v3734_v11 = vld [vmem:[%s5451_s12 + $0x58] sm:$0xff] }
 0x596   : > { %2459 = vmatpush.bf16.msrb.mxu2 %v3734_v11 }
 0x597   : > { %3436 = vmatmul.msk.f32.vlgmr.msra.gmra.mxu2 %vm5553_vm9, %v1946_v4 }
 0x61a   : > { %v1967_v63 = vpop.f32.mrf.mxu2 }
 0x61b   : > { %v1968_v17 = vadd.f32 1e-05, %v1967_v63 }
 0x61d   : > { %3815 = vrsqrt.f32 %v1968_v17  ;;  %vm1976_vm10 = vweird.f32 %v1968_v17 }
 0x623   : > { %v3816_v3 = vpop.eup %3815 }
 0x624   : > { %v1971_v8 = vmul.f32 %v3816_v3, %v1968_v17  ;;  %vm1977_vm0 = vweird.f32 %v3816_v3 }
 0x625   : > { %vm1978_vm12 = vmor %vm1976_vm10, %vm1977_vm0 }
 0x626   : > { %v1972_v48 = vmul.f32 %v3816_v3, %v1971_v8 }
 0x628   : > { %v1973_v38 = vmul.f32 0.5, %v1972_v48 }
 0x62a   : > { %v1974_v35 = vsub.f32 1.5, %v1973_v38  ;;  %v3738_v38 = vld [vmem:[%s5451_s12 + $0x78] sm:$0xff] }
 0x62b   : > { %2561 = vmatpush.bf16.msra.mxu0 %v3738_v38 }
 0x62c   : > { %v1975_v47 = vmul.f32 %v3816_v3, %v1974_v35  ;;  %v3729_v35 = vld [vmem:[%s5451_s12 + $0x30] sm:$0xff] }
 0x62d   : > { %2301 = vmatpush.bf16.msrb.mxu1 %v3729_v35 }
 0x62e   : > { %v1979_v36 = vsel %vm1978_vm12, %v3816_v3, %v1975_v47  ;;  %v3725_v47 = vld [vmem:[%s5451_s12 + $0x10] sm:$0xff] }
 0x62f   : > { %v1980_v6 = vperm.slane %v1979_v36, 0  ;;  %2366 = vmatpush.bf16.msrb.mxu3 %v3725_v47 }
 0x631   : > { %v1981_v45 = vmul.f32 %v1980_v6, %v1886_v16  ;;  %v1982_v56 = vmul.f32 %v1980_v6, %v1887_v2  ;;  %v1983_v43 = vmul.f32 %v1980_v6, %v1888_v18  ;;  %v1984_v53 = vmul.f32 %v1980_v6, %v1889_v22 }
 0x632   : > { %v1985_v61 = vmul.f32 %v1980_v6, %v1890_v50  ;;  %v1986_v7 = vmul.f32 %v1980_v6, %v1891_v5  ;;  %v1987_v49 = vmul.f32 %v1980_v6, %v1892_v37  ;;  %v1988_v58 = vmul.f32 %v1980_v6, %v1893_v13  ;;  %v3733_v6 = vld [vmem:[%s5451_s12 + $0x50] sm:$0xff] }
 0x633   : > { %v1992_v62 = vmul.f32 %v3777_v28, %v1981_v45  ;;  %v1993_v23 = vmul.f32 %v3777_v28, %v1982_v56  ;;  %v1994_v25 = vmul.f32 %v3777_v28, %v1983_v43  ;;  %v1995_v29 = vmul.f32 %v3777_v28, %v1984_v53  ;;  %v3724_v45 = vld [vmem:[%s5451_s12 + $0x8] sm:$0xff]  ;;  %2460 = vmatpush.bf16.msrb.mxu2 %v3733_v6 }
 0x634   : > { %v1996_v59 = vmul.f32 %v3777_v28, %v1985_v61  ;;  %v1997_v1 = vmul.f32 %v3777_v28, %v1986_v7  ;;  %v1998_v20 = vmul.f32 %v3777_v28, %v1987_v49  ;;  %v1999_v10 = vmul.f32 %v3777_v28, %v1988_v58  ;;  %v3737_v28 = vld [vmem:[%s5451_s12 + $0x70] sm:$0xff]  ;;  %v3732_v43 = vld [vmem:[%s5451_s12 + $0x48] sm:$0xff]  ;;  %2367 = vmatpush.bf16.msrb.mxu3 %v3724_v45  ;;  %v3727_v49 = vld [vmem:[%s5451_s12 + $0x20] sm:$0xff] }
 0x635   : > { %v2003_v16 = vadd.f32 %v3778_v9, %v1992_v62  ;;  %v2004_v2 = vadd.f32 %v3778_v9, %v1993_v23  ;;  %v2005_v18 = vadd.f32 %v3778_v9, %v1994_v25  ;;  %v2006_v22 = vadd.f32 %v3778_v9, %v1995_v29  ;;  %2562 = vmatpush.bf16.msra.mxu0 %v3737_v28  ;;  %v3723_v58 = vld [vmem:[%s5451_s12] sm:$0xff] }
 0x636   : > { %v2007_v32 = vadd.f32 %v3778_v9, %v1996_v59  ;;  %v2008_v54 = vadd.f32 %v3778_v9, %v1997_v1  ;;  %v2009_v12 = vadd.f32 %v3778_v9, %v1998_v20  ;;  %v2010_v39 = vadd.f32 %v3778_v9, %v1999_v10  ;;  %v3736_v9 = vld [vmem:[%s5451_s12 + $0x68] sm:$0xff]  ;;  %v3731_v25 = vld [vmem:[%s5451_s12 + $0x40] sm:$0xff]  ;;  %v3746_v1 = vld [vmem:[%s5451_s12 + $0xb8] sm:$0xff] }
 0x637   : > { %v2013_v50 = vmul.f32 %v2012_v41, %v2003_v16  ;;  %v2014_v5 = vmul.f32 %v2012_v41, %v2004_v2  ;;  %v2016_v37 = vmul.f32 %v2012_v41, %v2006_v22  ;;  %v2015_v13 = vmul.f32 %v2012_v41, %v2005_v18  ;;  %2461 = vmatpush.bf16.msrb.mxu2 %v3732_v43  ;;  %v3742_v20 = vld [vmem:[%s5451_s12 + $0x98] sm:$0xff]  ;;  %v3735_v2 = vld [vmem:[%s5451_s12 + $0x60] sm:$0xff] }
 0x638   : > { %v2018_v40 = vmul.f32 %v2012_v41, %v2008_v54  ;;  %v2019_v55 = vmul.f32 %v2012_v41, %v2009_v12  ;;  %v2020_v30 = vmul.f32 %v2012_v41, %v2010_v39  ;;  %v2017_v34 = vmul.f32 %v2012_v41, %v2007_v32  ;;  %v2211_v22 = vld [vmem:[#allocation3] sm:$0xff]  ;;  %2368 = vmatpush.bf16.msrb.mxu3 %v3723_v58 }
 0x639   : > { %v4789_v33 = vadd.f32 %v2021_v14, %v2013_v50  ;;  %v4791_v46 = vadd.f32 %v2021_v14, %v2014_v5  ;;  %v4793_v42 = vadd.f32 %v2021_v14, %v2016_v37  ;;  %v4814_v8 = vadd.f32 %v2021_v14, %v2015_v13  ;;  %2563 = vmatpush.bf16.msra.mxu0 %v3736_v9 }
 0x63a   : > { %v4795_v19 = vadd.f32 %v2021_v14, %v2018_v40  ;;  %v4797_v44 = vadd.f32 %v2021_v14, %v2019_v55  ;;  %v4799_v52 = vadd.f32 %v2021_v14, %v2020_v30  ;;  %v4826_v51 = vadd.f32 %v2021_v14, %v2017_v34  ;;  %v3728_v14 = vld [vmem:[%s5451_s12 + $0x28] sm:$0xff] }
 0x63b   : > { %v3437_v4 = vmul.f32 -1.442695, %v4789_v33  ;;  %v3438_v63 = vmul.f32 -1.442695, %v4791_v46  ;;  %v3440_v17 = vmul.f32 -1.442695, %v4793_v42  ;;  %2302 = vmatpush.bf16.msrb.mxu1 %v3728_v14  ;;  %2462 = vmatpush.bf16.msrb.mxu2 %v3731_v25  ;;  %v4890_v55 = vmul.f32 %v2211_v22, %v4299_v26 }
 0x63c   : > { %v3442_v3 = vmul.f32 -1.442695, %v4795_v19  ;;  %v3443_v48 = vmul.f32 -1.442695, %v4797_v44  ;;  %v3444_v36 = vmul.f32 -1.442695, %v4799_v52  ;;  %2757 = vmatpush.bf16.msra.mxu3 %v3746_v1 }
 0x63d   : > { %3817 = vpow2.f32 %v3437_v4  ;;  %v3439_v41 = vmul.f32 -1.442695, %v4814_v8  ;;  %v3441_v56 = vmul.f32 -1.442695, %v4826_v51  ;;  %2564 = vmatpush.bf16.msra.mxu0 %v3735_v2  ;;  %v3750_v22 = vld [vmem:[%s5451_s12 + $0xd8] sm:$0xff] }
 0x63e   : > { %3819 = vpow2.f32 %v3438_v63 }
 0x63f   : > { %3821 = vpow2.f32 %v3440_v17  ;;  %2303 = vmatpush.bf16.msrb.mxu1 %v3727_v49  ;;  %2859 = vmatpush.bf16.msra.mxu2 %v3750_v22  ;;  %v5573_v22 = vld [vmem:[#allocation9_spill] sm:$0xff] }
 0x640   : > { %3823 = vpow2.f32 %v3442_v3 }
 0x641   : > { %3825 = vpow2.f32 %v3443_v48 }
 0x642   : > { %3827 = vpow2.f32 %v3444_v36 }
 0x643   : > { %v3818_v53 = vpop.eup %3817  ;;  %3829 = vpow2.f32 %v3439_v41  ;;  %2655 = vmatpush.bf16.msra.mxu1 %v3742_v20 }
 0x644   : > { %v3820_v61 = vpop.eup %3819  ;;  %v4849_v7 = vadd.f32 1.0, %v3818_v53  ;;  %3831 = vpow2.f32 %v3441_v56 }
 0x645   : > { %v3822_v62 = vpop.eup %3821  ;;  %v4857_v23 = vadd.f32 1.0, %v3820_v61 }
 0x646   : > { %v3824_v29 = vpop.eup %3823  ;;  %v4862_v59 = vadd.f32 1.0, %v3822_v62  ;;  %3833 = vrcp.f32 %v4849_v7  ;;  %v2073_v54 = vand.u32 2147483648, %v4849_v7  ;;  %v2071_v39 = vand.u32 2147483647, %v4849_v7 }
 0x647   : > { %v3826_v10 = vpop.eup %3825  ;;  %v4871_v16 = vadd.f32 1.0, %v3824_v29  ;;  %3835 = vrcp.f32 %v4857_v23  ;;  %v2086_v50 = vand.u32 2147483647, %v4857_v23  ;;  %v2088_v13 = vand.u32 2147483648, %v4857_v23 }
 0x648   : > { %v3828_v18 = vpop.eup %3827  ;;  %v4877_v32 = vadd.f32 1.0, %v3826_v10  ;;  %3837 = vrcp.f32 %v4862_v59  ;;  %vm2067_vm13 = vweird.f32 %v4849_v7  ;;  %v2074_v57 = vor.u32 1.1754944e-38, %v2073_v54 }
 0x649   : > { %v3830_v12 = vpop.eup %3829  ;;  %v4883_v37 = vadd.f32 1.0, %v3828_v18  ;;  %3839 = vrcp.f32 %v4871_v16  ;;  %vm2082_vm14 = vweird.f32 %v4857_v23  ;;  %v2116_v24 = vand.u32 2147483647, %v4862_v59 }
 0x64a   : > { %v3832_v5 = vpop.eup %3831  ;;  %v4887_v40 = vadd.f32 1.0, %v3830_v12  ;;  %3841 = vrcp.f32 %v4877_v32  ;;  %vm4899_vm15 = vcmp.eq.f32.partialorder %v2071_v39, 8.507059e+37  ;;  %v2118_v3 = vand.u32 2147483648, %v4862_v59 }
 0x64b   : > { %v4893_v30 = vadd.f32 1.0, %v3832_v5  ;;  %vm4907_vm1 = vcmp.eq.f32.partialorder %v2086_v50, 8.507059e+37  ;;  %v2089_v35 = vor.u32 1.1754944e-38, %v2088_v13  ;;  %vm2112_vm2 = vweird.f32 %v4862_v59 }
 0x64c   : > { %v3834_v34 = vpop.eup %3833  ;;  %3843 = vrcp.f32 %v4887_v40  ;;  %v2103_v17 = vand.u32 2147483648, %v4887_v40  ;;  %v2101_v6 = vand.u32 2147483647, %v4887_v40  ;;  %vm4918_vm6 = vcmp.eq.f32.partialorder %v2116_v24, 8.507059e+37 }
 0x64d   : > { %v3836_v11 = vpop.eup %3835  ;;  %v2063_v4 = vmul.f32 %v3834_v34, %v4849_v7  ;;  %3845 = vrcp.f32 %v4883_v37  ;;  %vm2068_vm3 = vweird.f32 %v3834_v34  ;;  %v2119_v53 = vor.u32 1.1754944e-38, %v2118_v3 }
 0x64e   : > { %v2078_v48 = vmul.f32 %v3836_v11, %v4857_v23  ;;  %v3838_v47 = vpop.eup %3837  ;;  %3847 = vrcp.f32 %v4893_v30  ;;  %vm2083_vm5 = vweird.f32 %v3836_v11  ;;  %v4922_v43 = vor.u32 1.1754944e-38, %v2103_v17  ;;  %vm2069_vm9 = vmor %vm2067_vm13, %vm2068_vm3  ;;  %v3741_v23 = vld [vmem:[%s5451_s12 + $0x90] sm:$0xff] }
 0x64f   : > { %v2064_v36 = vsub.f32 1.0, %v2063_v4  ;;  %v4915_v28 = vpop.eup %3839  ;;  %v2108_v14 = vmul.f32 %v3838_v47, %v4862_v59  ;;  %vm2097_vm11 = vweird.f32 %v4887_v40  ;;  %vm2113_vm8 = vweird.f32 %v3838_v47  ;;  %vm2084_vm10 = vmor %vm2082_vm14, %vm2083_vm5  ;;  %2656 = vmatpush.bf16.msra.mxu1 %v3741_v23 }
 0x650   : > { %v2079_v41 = vsub.f32 1.0, %v2078_v48  ;;  %v2138_v9 = vmul.f32 %v4915_v28, %v4871_v16  ;;  %v4926_v61 = vpop.eup %3841  ;;  %v2131_v62 = vand.u32 2147483647, %v4893_v30  ;;  %v2133_v1 = vand.u32 2147483648, %v4893_v30 }
 0x651   : > { %v2065_v56 = vmul.f32 %v3834_v34, %v2064_v36  ;;  %v2109_v58 = vsub.f32 1.0, %v2108_v14  ;;  %vm2142_vm7 = vweird.f32 %v4871_v16  ;;  %vm4938_vm0 = vcmp.eq.f32.partialorder %v2101_v6, 8.507059e+37 }
 0x652   : > { %v2080_v49 = vmul.f32 %v3836_v11, %v2079_v41  ;;  %v3844_v25 = vpop.eup %3843  ;;  %v2139_v20 = vsub.f32 1.0, %v2138_v9  ;;  %v2146_v12 = vand.u32 2147483647, %v4871_v16  ;;  %vm2127_vm12 = vweird.f32 %v4893_v30 }
 0x653   : > { %v2066_v29 = vadd.f32 %v3834_v34, %v2065_v56  ;;  %v4932_v10 = vpop.eup %3845  ;;  %v2093_v18 = vmul.f32 %v3844_v25, %v4887_v40  ;;  %v2110_v54 = vmul.f32 %v3838_v47, %v2109_v58  ;;  %vm2143_vm13 = vweird.f32 %v4915_v28 }
 0x654   : > { %v2081_v2 = vadd.f32 %v3836_v11, %v2080_v49  ;;  %v4943_v39 = vpop.eup %3847  ;;  %v2140_v7 = vmul.f32 %v4915_v28, %v2139_v20  ;;  %v2148_v5 = vand.u32 2147483648, %v4871_v16  ;;  %vm2098_vm14 = vweird.f32 %v3844_v25  ;;  %vm2144_vm5 = vmor %vm2142_vm7, %vm2143_vm13 }
 0x655   : > { %v2070_v50 = vsel %vm2069_vm9, %v3834_v34, %v2066_v29  ;;  %v2094_v4 = vsub.f32 1.0, %v2093_v18  ;;  %v2111_v17 = vadd.f32 %v3838_v47, %v2110_v54  ;;  %v3745_v34 = vld [vmem:[%s5451_s12 + $0xb0] sm:$0xff]  ;;  %vm4968_vm3 = vcmp.eq.f32.partialorder %v2131_v62, 8.507059e+37  ;;  %v2239_v29 = vld [vmem:[#allocation3 + $0x1] sm:$0xff] }
 0x656   : > { %v2075_v13 = vsel %vm4899_vm15, %v2074_v57, %v2070_v50  ;;  %v2085_v24 = vsel %vm2084_vm10, %v3836_v11, %v2081_v2  ;;  %vm2114_vm15 = vmor %vm2112_vm2, %vm2113_vm8  ;;  %v2123_v57 = vmul.f32 %v4943_v39, %v4893_v30  ;;  %2758 = vmatpush.bf16.msra.mxu3 %v3745_v34  ;;  %v2153_v41 = vmul.f32 %v4926_v61, %v4877_v32 }
 0x657   : > { %v2090_v3 = vsel %vm4907_vm1, %v2089_v35, %v2085_v24  ;;  %v2182_v48 = vmul.f32 %v2075_v13, %v4789_v33  ;;  %v2095_v36 = vmul.f32 %v3844_v25, %v2094_v4  ;;  %v2115_v6 = vsel %vm2114_vm15, %v3838_v47, %v2111_v17 }
 0x658   : > { %v2183_v63 = vmul.f32 %v2090_v3, %v4791_v46  ;;  %vm4973_vm1 = vcmp.eq.f32.partialorder %v2146_v12, 8.507059e+37  ;;  %v2120_v59 = vsel %vm4918_vm6, %v2119_v53, %v2115_v6  ;;  %v2124_v38 = vsub.f32 1.0, %v2123_v57  ;;  %vm2099_vm6 = vmor %vm2097_vm11, %vm2098_vm14 }
 0x659   : > { %2202 = vst.msk [vmem:[#allocation3 + $0x9] sm:$0xff] %vm1792_vm4, %v2182_v48  ;;  %v2141_v35 = vadd.f32 %v4915_v28, %v2140_v7  ;;  %v2096_v46 = vadd.f32 %v3844_v25, %v2095_v36  ;;  %v2185_v47 = vmul.f32 %v2120_v59, %v4793_v42  ;;  %vm2128_vm2 = vweird.f32 %v4943_v39 }
 0x65a   : > { %2203 = vst.msk [vmem:[#allocation3 + $0x11] sm:$0xff] %vm1792_vm4, %v2183_v63  ;;  %v2149_v14 = vor.u32 1.1754944e-38, %v2148_v5  ;;  %v2125_v45 = vmul.f32 %v4943_v39, %v2124_v38  ;;  %v2154_v53 = vsub.f32 1.0, %v2153_v41  ;;  %v2161_v9 = vand.u32 2147483647, %v4877_v32  ;;  %vm2129_vm11 = vmor %vm2127_vm12, %vm2128_vm2 }
 0x65b   : > { %v2145_v56 = vsel %vm2144_vm5, %v4915_v28, %v2141_v35  ;;  %v2100_v42 = vsel %vm2099_vm6, %v3844_v25, %v2096_v46  ;;  %2205 = vst.msk [vmem:[#allocation3 + $0x21] sm:$0xff] %vm1792_vm4, %v2185_v47  ;;  %v2163_v16 = vand.u32 2147483648, %v4877_v32  ;;  %v2168_v58 = vmul.f32 %v4932_v10, %v4883_v37 }
 0x65c   : > { %v2150_v49 = vsel %vm4973_vm1, %v2149_v14, %v2145_v56  ;;  %v2105_v40 = vsel %vm4938_vm0, %v4922_v43, %v2100_v42  ;;  %v2126_v28 = vadd.f32 %v4943_v39, %v2125_v45  ;;  %v2155_v25 = vmul.f32 %v4926_v61, %v2154_v53  ;;  %v5568_v56 = vld [vmem:[#allocation4_spill] sm:$0xff] }
 0x65d   : > { %v2187_v62 = vmul.f32 %v2150_v49, %v4795_v19  ;;  %v2184_v20 = vmul.f32 %v2105_v40, %v4814_v8  ;;  %v2134_v2 = vor.u32 1.1754944e-38, %v2133_v1  ;;  %vm2157_vm8 = vweird.f32 %v4877_v32 }
 0x65e   : > { %v2169_v18 = vsub.f32 1.0, %v2168_v58  ;;  %v2130_v43 = vsel %vm2129_vm11, %v4943_v39, %v2126_v28  ;;  %v2156_v19 = vadd.f32 %v4926_v61, %v2155_v25  ;;  %vm2158_vm7 = vweird.f32 %v4926_v61 }
 0x65f   : > { %2207 = vst.msk [vmem:[#allocation3 + $0x31] sm:$0xff] %vm1792_vm4, %v2187_v62  ;;  %vm5018_vm9 = vcmp.eq.f32.partialorder %v2161_v9, 8.507059e+37  ;;  %v2135_v1 = vsel %vm4968_vm3, %v2134_v2, %v2130_v43  ;;  %v2164_v12 = vor.u32 1.1754944e-38, %v2163_v16  ;;  %vm2172_vm0 = vweird.f32 %v4883_v37  ;;  %vm2159_vm10 = vmor %vm2157_vm8, %vm2158_vm7 }
 0x660   : > { %v5022_v8 = vld [vmem:[#allocation3 + $0x9] sm:$0xff]  ;;  %2204 = vst.msk [vmem:[#allocation3 + $0x19] sm:$0xff] %vm1792_vm4, %v2184_v20  ;;  %v2170_v39 = vmul.f32 %v4932_v10, %v2169_v18  ;;  %v2186_v23 = vmul.f32 %v2135_v1, %v4826_v51  ;;  %vm2173_vm12 = vweird.f32 %v4932_v10  ;;  %v2160_v48 = vsel %vm2159_vm10, %v4926_v61, %v2156_v19 }
 0x661   : > { %v2212_v30 = vld [vmem:[#allocation3 + $0x8] sm:$0xff]  ;;  %v2247_v50 = vpack.c.bf16 %v5022_v8, %v2239_v29  ;;  %v5034_v24 = vld [vmem:[#allocation3 + $0x10] sm:$0xff]  ;;  %v2176_v11 = vand.u32 2147483647, %v4883_v37  ;;  %v2165_v51 = vsel %vm5018_vm9, %v2164_v12, %v2160_v48  ;;  %v2178_v32 = vand.u32 2147483648, %v4883_v37  ;;  %vm2174_vm13 = vmor %vm2172_vm0, %vm2173_vm12 }
 0x662   : > { %v2390_v54 = vld [vmem:[#allocation3 + $0x2] sm:$0xff]  ;;  %v2220_v7 = vmul.f32 %v2212_v30, %v4365_v0  ;;  %v5031_v5 = vld [vmem:[#allocation3 + $0xa] sm:$0xff]  ;;  %v2500_v4 = vmul.f32 %v2212_v30, %v4299_v26  ;;  %v2501_v34 = vmul.f32 %v5034_v24, %v4365_v0  ;;  %v2171_v57 = vadd.f32 %v4932_v10, %v2170_v39  ;;  %2206 = vst.msk [vmem:[#allocation3 + $0x29] sm:$0xff] %vm1792_vm4, %v2186_v23  ;;  %v3749_v39 = vld [vmem:[%s5451_s12 + $0xd0] sm:$0xff] }
 0x663   : > { %v2398_v13 = vmul.f32 %v2390_v54, %v4313_v31  ;;  %v2399_v17 = vmul.f32 %v5031_v5, %v4376_v15  ;;  %3469 = vmatmul.msk.bf16.vlgmr.msrb.gmra.mxu1 %vm1792_vm4, %v2247_v50  ;;  %v2188_v6 = vmul.f32 %v2165_v51, %v4797_v44  ;;  %v3740_v61 = vld [vmem:[%s5451_s12 + $0x88] sm:$0xff]  ;;  %v2179_v44 = vor.u32 1.1754944e-38, %v2178_v32  ;;  %v3743_v19 = vld [vmem:[%s5451_s12 + $0xa0] sm:$0xff]  ;;  %v3754_v30 = vld [vmem:[%s5451_s12 + $0xf8] sm:$0xff]  ;;  %2860 = vmatpush.bf16.msra.mxu2 %v3749_v39 }
 0x664   : > { %v2227_v3 = vpack.c.bf16 %v2220_v7, %v4890_v55  ;;  %v2508_v36 = vpack.c.bf16 %v2501_v34, %v2500_v4  ;;  %v3744_v55 = vld [vmem:[%s5451_s12 + $0xa8] sm:$0xff]  ;;  %v2175_v33 = vsel %vm2174_vm13, %v4932_v10, %v2171_v57  ;;  %vm2177_vm14 = vcmp.eq.f32.partialorder %v2176_v11, 8.507059e+37  ;;  %2657 = vmatpush.bf16.msra.mxu1 %v3740_v61  ;;  %v3739_v54 = vld [vmem:[%s5451_s12 + $0x80] sm:$0xff]  ;;  %2953 = vmatpush.bf16.msrb.mxu0 %v3754_v30 }
 0x665   : > { %v2406_v63 = vpack.c.bf16 %v2399_v17, %v2398_v13  ;;  %2208 = vst.msk [vmem:[#allocation3 + $0x39] sm:$0xff] %vm1792_vm4, %v2188_v6  ;;  %2759 = vmatpush.bf16.msra.mxu3 %v3744_v55  ;;  %v2180_v37 = vsel %vm2177_vm14, %v2179_v44, %v2175_v33  ;;  %v5080_v10 = vld [vmem:[#allocation3 + $0x11] sm:$0xff]  ;;  %v2221_v14 = vmul.f32 %v5034_v24, %v4359_v60  ;;  %v5171_v11 = vld [vmem:[#allocation3 + $0x21] sm:$0xff]  ;;  %vm5577_vm15 = vcmask 261120  }
 0x666   : > { %3489 = vmatmul.msk.bf16.vlgmr.msrb.gmra.mxu3 %vm1792_vm4, %v2227_v3  ;;  %3545 = vmatmul.msk.bf16.vlgmr.msra.gmra.mxu0 %vm1792_vm4, %v2508_v36  ;;  %v2189_v59 = vmul.f32 %v2180_v37, %v4799_v52  ;;  %v5569_v50 = vld [vmem:[#allocation7_spill] sm:$0xff]  ;;  %v5570_v13 = vld [vmem:[#allocation8_spill] sm:$0xff]  ;;  %v5571_v36 = vld [vmem:[#allocation5_spill] sm:$0xff] }
 0x667   : > { %3517 = vmatmul.msk.bf16.vlgmr.msrb.gmra.mxu2 %vm1792_vm4, %v2406_v63  ;;  %v5071_v38 = vld [vmem:[#allocation3 + $0x18] sm:$0xff]  ;;  %v5078_v46 = vld [vmem:[#allocation3 + $0x20] sm:$0xff]  ;;  %v3748_v3 = vld [vmem:[%s5451_s12 + $0xc8] sm:$0xff] }
 0x668   : > { %2209 = vst.msk [vmem:[#allocation3 + $0x41] sm:$0xff] %vm1792_vm4, %v2189_v59  ;;  %v5074_v35 = vld [vmem:[#allocation3 + $0x12] sm:$0xff]  ;;  %v5076_v41 = vld [vmem:[#allocation3 + $0x1a] sm:$0xff]  ;;  %v2222_v52 = vmul.f32 %v5071_v38, %v4409_v27  ;;  %v2502_v9 = vmul.f32 %v5071_v38, %v4359_v60  ;;  %v2503_v42 = vmul.f32 %v5078_v46, %v4409_v27  ;;  %2658 = vmatpush.bf16.msra.mxu1 %v3739_v54  ;;  %v5572_v32 = vld [vmem:[#allocation6_spill] sm:$0xff] }
 0x669   : > { %v5082_v47 = vld [vmem:[#allocation3 + $0x19] sm:$0xff]  ;;  %v2400_v45 = vmul.f32 %v5074_v35, %v4430_v21  ;;  %v2401_v53 = vmul.f32 %v5076_v41, %v5568_v56  ;;  %v5096_v49 = vld [vmem:[#allocation3 + $0x22] sm:$0xff]  ;;  %v5098_v16 = vld [vmem:[#allocation3 + $0x2a] sm:$0xff]  ;;  %v5108_v28 = vmul.f32 %v5074_v35, %v4313_v31  ;;  %v5112_v62 = vmul.f32 %v5076_v41, %v4376_v15  ;;  %2760 = vmatpush.bf16.msra.mxu3 %v3743_v19 }
 0x66a   : > { %v5102_v58 = vpack.c.bf16 %v5082_v47, %v5080_v10  ;;  %v2228_v40 = vpack.c.bf16 %v2222_v52, %v2221_v14  ;;  %v5116_v25 = vmul.f32 %v5096_v49, %v4430_v21  ;;  %v5120_v29 = vmul.f32 %v5098_v16, %v5568_v56  ;;  %v3753_v17 = vld [vmem:[%s5451_s12 + $0xf0] sm:$0xff]  ;;  %v5161_v23 = vld [vmem:[#allocation3 + $0x28] sm:$0xff]  ;;  %v5166_v48 = vld [vmem:[#allocation3 + $0x30] sm:$0xff]  ;;  %2861 = vmatpush.bf16.msra.mxu2 %v3748_v3 }
 0x66b   : > { %v2407_v20 = vpack.c.bf16 %v2401_v53, %v2400_v45  ;;  %v2509_v2 = vpack.c.bf16 %v2503_v42, %v2502_v9  ;;  %v3002_v1 = vpack.c.bf16 %v5112_v62, %v5108_v28  ;;  %2954 = vmatpush.bf16.msrb.mxu0 %v3753_v17  ;;  %v3752_v57 = vld [vmem:[%s5451_s12 + $0xe8] sm:$0xff]  ;;  %v2223_v51 = vmul.f32 %v5078_v46, %v5571_v36  ;;  %v3747_v37 = vld [vmem:[%s5451_s12 + $0xc0] sm:$0xff]  ;;  %v3758_v42 = vld [vmem:[%s5451_s12 + $0x118] sm:$0xff] }
 0x66c   : > { %v5123_v18 = vld [vmem:[#allocation3 + $0x32] sm:$0xff]  ;;  %v3003_v12 = vpack.c.bf16 %v5120_v29, %v5116_v25  ;;  %v5173_v63 = vld [vmem:[#allocation3 + $0x29] sm:$0xff]  ;;  %v2224_v6 = vmul.f32 %v5161_v23, %v5572_v32  ;;  %v2402_v55 = vmul.f32 %v5096_v49, %v5569_v50  ;;  %v2403_v61 = vmul.f32 %v5098_v16, %v5570_v13  ;;  %3055 = vmatpush.bf16.msrb.mxu1 %v3758_v42  ;;  %vm5578_vm3 = vmmov %vm5577_vm15 }
 0x66d   : > { %v5150_v7 = vmul.f32 %v5123_v18, %v5569_v50  ;;  %v2504_v33 = vmul.f32 %v5161_v23, %v5571_v36  ;;  %v2505_v44 = vmul.f32 %v5166_v48, %v5572_v32  ;;  %v2249_v59 = vpack.c.bf16 %v5173_v63, %v5171_v11  ;;  %v3751_v14 = vld [vmem:[%s5451_s12 + $0xe0] sm:$0xff]  ;;  %v3760_v9 = vld [vmem:[%s5453_s14 + $0x8] sm:$0xff]  ;;  %v5207_v19 = vld [vmem:[#allocation3 + $0x39] sm:$0xff] }
 0x66e   : > { %v2229_v52 = vpack.c.bf16 %v2224_v6, %v2223_v51  ;;  %v2408_v45 = vpack.c.bf16 %v2403_v61, %v2402_v55  ;;  %2862 = vmatpush.bf16.msra.mxu2 %v3747_v37  ;;  %3141 = vmatpush.bf16.msrb.mxu3 %v3760_v9  ;;  %v2225_v30 = vmul.f32 %v5166_v48, %v5573_v22  ;;  %v5574_v54 = vld [vmem:[#allocation10_spill] sm:$0xff]  ;;  %v5575_v17 = vld [vmem:[#allocation11_spill] sm:$0xff]  ;;  %vm5579_vm1 = vmmov %vm5578_vm3 }
 0x66f   : > { %v5125_v43 = vld [vmem:[#allocation3 + $0x3a] sm:$0xff]  ;;  %2955 = vmatpush.bf16.msrb.mxu0 %v3752_v57  ;;  %v2510_v53 = vpack.c.bf16 %v2505_v44, %v2504_v33  ;;  %v2404_v3 = vmul.f32 %v5123_v18, %v5575_v17  ;;  %v2799_v9 = vmul.f32 %v5071_v38, %v4365_v0  ;;  %v2602_v42 = vpack.c.bf16 %v5080_v10, %v5022_v8  ;;  %vm5580_vm2 = vmmov %vm5579_vm1 }
 0x670   : > { %v5154_v4 = vmul.f32 %v5125_v43, %v5570_v13  ;;  %v5576_v57 = vld [vmem:[#allocation12_spill] sm:$0xff]  ;;  %v2698_v0 = vmul.f32 %v5076_v41, %v4430_v21  ;;  %v2800_v8 = vmul.f32 %v5078_v46, %v4359_v60  ;;  %v3755_v60 = vld [vmem:[%s5451_s12 + $0x100] sm:$0xff]  ;;  %v2701_v21 = vmul.f32 %v5123_v18, %v5570_v13 }
 0x671   : > { %v2405_v51 = vmul.f32 %v5125_v43, %v5576_v57  ;;  %v2802_v41 = vmul.f32 %v5166_v48, %v5571_v36  ;;  %v2702_v18 = vmul.f32 %v5125_v43, %v5575_v17 }
 0x672   : > { %v3004_v34 = vpack.c.bf16 %v5154_v4, %v5150_v7  ;;  %v3855_v4 = vld [vmem:[%s3981_s20 + $0x30] sm:$0xff] }
 0x673   : > { %3470 = vmatmul.msk.bf16.gmra.mxu1 %vm1792_vm4, %v5102_v58  ;;  %2956 = vmatpush.bf16.msrb.mxu0 %v3751_v14  ;;  %v2409_v44 = vpack.c.bf16 %v2405_v51, %v2404_v3  ;;  %v3757_v14 = vld [vmem:[%s5451_s12 + $0x110] sm:$0xff] }
 0x674   : > { %3056 = vmatpush.bf16.msrb.mxu1 %v3757_v14 }
 0x676   : > { %3490 = vmatmul.msk.bf16.gmra.mxu3 %vm1792_vm4, %v2228_v40  ;;  %3546 = vmatmul.msk.bf16.gmra.mxu0 %vm1792_vm4, %v2509_v2  ;;  %v2218_v40 = vld [vmem:[#allocation3 + $0x38] sm:$0xff] }
 0x677   : > { %3518 = vmatmul.msk.bf16.gmra.mxu2 %vm1792_vm4, %v2407_v20  ;;  %v5205_v20 = vld [vmem:[#allocation3 + $0x40] sm:$0xff]  ;;  %v2245_v2 = vld [vmem:[#allocation3 + $0x31] sm:$0xff]  ;;  %v2226_v39 = vmul.f32 %v2218_v40, %v5574_v54  ;;  %v2506_v6 = vmul.f32 %v2218_v40, %v5573_v22  ;;  %v2803_v46 = vmul.f32 %v2218_v40, %v5572_v32 }
 0x678   : > { %v2507_v55 = vmul.f32 %v5205_v20, %v5574_v54  ;;  %v2250_v61 = vpack.c.bf16 %v5207_v19, %v2245_v2  ;;  %v2604_v10 = vpack.c.bf16 %v2245_v2, %v5173_v63  ;;  %v2804_v13 = vmul.f32 %v5205_v20, %v5573_v22  ;;  %v3850_v40 = vld [vmem:[%s3981_s20 + $0x8] sm:$0xff] }
 0x679   : > { %v2230_v33 = vpack.c.bf16 %v2226_v39, %v2225_v30 }
 0x67a   : > { %v2511_v37 = vpack.c.bf16 %v2507_v55, %v2506_v6  ;;  %v3851_v6 = vld [vmem:[%s3981_s20 + $0x10] sm:$0xff]  ;;  %v3852_v55 = vld [vmem:[%s3981_s20 + $0x18] sm:$0xff] }
 0x683   : > { %3471 = vmatmul.msk.bf16.gmra.mxu1 %vm1792_vm4, %v2249_v59 }
 0x686   : > { %3491 = vmatmul.msk.bf16.gmra.mxu3 %vm1792_vm4, %v2229_v52  ;;  %3547 = vmatmul.msk.bf16.gmra.mxu0 %vm1792_vm4, %v2510_v53  ;;  %v2696_v52 = vmul.f32 %v5031_v5, %v4313_v31  ;;  %v2798_v53 = vmul.f32 %v5034_v24, %v4299_v26  ;;  %v3759_v26 = vld [vmem:[%s5453_s14] sm:$0xff]  ;;  %v3756_v31 = vld [vmem:[%s5451_s12 + $0x108] sm:$0xff]  ;;  %v2801_v5 = vmul.f32 %v5161_v23, %v4409_v27 }
 0x687   : > { %3519 = vmatmul.msk.bf16.gmra.mxu2 %vm1792_vm4, %v2408_v45  ;;  %v2697_v45 = vmul.f32 %v5074_v35, %v4376_v15  ;;  %3142 = vmatpush.bf16.msrb.mxu3 %v3759_v26  ;;  %v2699_v15 = vmul.f32 %v5096_v49, %v5568_v56  ;;  %v2603_v24 = vpack.c.bf16 %v5171_v11, %v5082_v47  ;;  %v2695_v49 = vld [vmem:[#allocation3 + $0x42] sm:$0xff] }
 0x688   : > { %v2806_v39 = vpack.c.bf16 %v2799_v9, %v2798_v53  ;;  %3057 = vmatpush.bf16.msrb.mxu1 %v3756_v31  ;;  %v2807_v35 = vpack.c.bf16 %v2801_v5, %v2800_v8  ;;  %v2700_v27 = vmul.f32 %v5098_v16, %v5569_v50  ;;  %v2808_v56 = vpack.c.bf16 %v2803_v46, %v2802_v41  ;;  %v2797_v16 = vld [vmem:[#allocation3 + $0x48] sm:$0xff] }
 0x689   : > { %v2704_v30 = vpack.c.bf16 %v2697_v45, %v2696_v52  ;;  %v2705_v38 = vpack.c.bf16 %v2699_v15, %v2698_v0  ;;  %v2703_v50 = vmul.f32 %v2695_v49, %v5576_v57  ;;  %v2805_v23 = vmul.f32 %v2797_v16, %v5574_v54  ;;  %v2899_v11 = vld [vmem:[#allocation3 + $0x49] sm:$0xff] }
 0x68a   : > { %v2706_v47 = vpack.c.bf16 %v2701_v21, %v2700_v27  ;;  %v3853_v52 = vld [vmem:[%s3981_s20 + $0x20] sm:$0xff]  ;;  %v3854_v45 = vld [vmem:[%s3981_s20 + $0x28] sm:$0xff]  ;;  %v3000_v26 = vmul.f32 %v2695_v49, %v5575_v17 }
 0x68b   : > { %v2707_v63 = vpack.c.bf16 %v2703_v50, %v2702_v18  ;;  %v2809_v36 = vpack.c.bf16 %v2805_v23, %v2804_v13  ;;  %v3101_v53 = vpack.c.bf16 %v3854_v45, %v3853_v52 }
 0x68c   : > { %3058 = vmatpush.bf16.msrb.mxu1 %v3755_v60 }
 0x693   : > { %3472 = vmatmul.msk.bf16.gmra.mxu1 %vm1792_vm4, %v2250_v61 }
 0x696   : > { %3492 = vmatmul.msk.bf16.gmra.mxu3 %vm1792_vm4, %v2230_v33  ;;  %3548 = vmatmul.msk.bf16.gmra.mxu0 %vm1792_vm4, %v2511_v37 }
 0x697   : > { %3520 = vmatmul.msk.bf16.gmra.mxu2 %vm1792_vm4, %v2409_v44 }
 0x6a3   : > { %3573 = vmatmul.msk.bf16.vlgmr.msra.gmra.mxu1 %vm1792_vm4, %v2602_v42 }
 0x6a6   : > { %3601 = vmatmul.msk.bf16.vlgmr.msra.gmra.mxu3 %vm1792_vm4, %v2704_v30  ;;  %3657 = vmatmul.msk.bf16.vlgmr.msrb.gmra.mxu0 %vm1792_vm4, %v5102_v58  ;;  %v2601_v58 = vld [vmem:[#allocation3 + $0x41] sm:$0xff]  ;;  %v2993_v30 = vld [vmem:[#allocation3 + $0x4a] sm:$0xff] }
 0x6a7   : > { %3629 = vmatmul.msk.bf16.vlgmr.msra.gmra.mxu2 %vm1792_vm4, %v2806_v39  ;;  %v2605_v48 = vpack.c.bf16 %v2601_v58, %v5207_v19  ;;  %v2903_v32 = vpack.c.bf16 %v2899_v11, %v2601_v58  ;;  %v3001_v31 = vmul.f32 %v2993_v30, %v5576_v57 }
 0x6a9   : > { %v3005_v7 = vpack.c.bf16 %v3001_v31, %v3000_v26 }
 0x6b3   : > { %3574 = vmatmul.msk.bf16.gmra.mxu1 %vm1792_vm4, %v2603_v24 }
 0x6b6   : > { %3602 = vmatmul.msk.bf16.gmra.mxu3 %vm1792_vm4, %v2705_v38  ;;  %3658 = vmatmul.msk.bf16.gmra.mxu0 %vm1792_vm4, %v2249_v59  ;;  %v3849_v59 = vld [vmem:[%s3981_s20] sm:$0xff] }
 0x6b7   : > { %3630 = vmatmul.msk.bf16.gmra.mxu2 %vm1792_vm4, %v2807_v35  ;;  %v3099_v20 = vpack.c.bf16 %v3850_v40, %v3849_v59 }
 0x6c3   : > { %3575 = vmatmul.msk.bf16.gmra.mxu1 %vm1792_vm4, %v2604_v10 }
 0x6c6   : > { %3603 = vmatmul.msk.bf16.gmra.mxu3 %vm1792_vm4, %v2706_v47  ;;  %3659 = vmatmul.msk.bf16.gmra.mxu0 %vm1792_vm4, %v2250_v61  ;;  %v3100_v61 = vpack.c.bf16 %v3852_v55, %v3851_v6 }
 0x6c7   : > { %3631 = vmatmul.msk.bf16.gmra.mxu2 %vm1792_vm4, %v2808_v56 }
 0x6d3   : > { %3576 = vmatmul.msk.bf16.gmra.mxu1 %vm1792_vm4, %v2605_v48 }
 0x6d6   : > { %3604 = vmatmul.msk.bf16.gmra.mxu3 %vm1792_vm4, %v2707_v63  ;;  %3660 = vmatmul.msk.bf16.gmra.mxu0 %vm1792_vm4, %v2903_v32 }
 0x6d7   : > { %3632 = vmatmul.msk.bf16.gmra.mxu2 %vm1792_vm4, %v2809_v36 }
 0x6e0   : > { %v2305_v43 = vpop.f32.mrf.mxu1 }
 0x6e3   : > { %3685 = vmatmul.msk.bf16.vlgmr.msrb.gmra.mxu1 %vm1792_vm4, %v3002_v1  ;;  %v2566_v9 = vpop.f32.mrf.mxu0 }
 0x6e6   : > { %3697 = vmatmul.msk.bf16.vlgmr.msrb.gmra.mxu3 %vm5577_vm15, %v3099_v20 }
 0x6e8   : > { %v2307_v2 = vpop.f32.mrf.mxu1 }
 0x6e9   : > { %v2370_v19 = vpop.f32.mrf.mxu3 }
 0x6ea   : > { %v5295_v22 = vadd.f32 %v2370_v19, %v2305_v43  ;;  %v2464_v33 = vpop.f32.mrf.mxu2 }
 0x6eb   : > { %v2568_v39 = vpop.f32.mrf.mxu0 }
 0x6f0   : > { %v2310_v54 = vpop.f32.mrf.mxu1 }
 0x6f1   : > { %v2372_v3 = vpop.f32.mrf.mxu3 }
 0x6f2   : > { %v5297_v51 = vadd.f32 %v2372_v3, %v2307_v2 }
 0x6f3   : > { %3686 = vmatmul.msk.bf16.gmra.mxu1 %vm1792_vm4, %v3003_v12  ;;  %v2466_v12 = vpop.f32.mrf.mxu2  ;;  %v2571_v38 = vpop.f32.mrf.mxu0 }
 0x6f6   : > { %3698 = vmatmul.msk.bf16.gmra.mxu3 %vm5578_vm3, %v3100_v61 }
 0x6f8   : > { %v2312_v28 = vpop.f32.mrf.mxu1 }
 0x6f9   : > { %v2375_v62 = vpop.f32.mrf.mxu3 }
 0x6fa   : > { %v5306_v1 = vadd.f32 %v2375_v62, %v2310_v54  ;;  %v2484_v54 = vadd.f32 %v2464_v33, %v5295_v22 }
 0x6fb   : > { %v2469_v24 = vpop.f32.mrf.mxu2  ;;  %v2573_v41 = vpop.f32.mrf.mxu0 }
 0x6fc   : > { %v2586_v6 = vadd.f32 %v2566_v9, %v2484_v54  ;;  %v2486_v22 = vadd.f32 %v2469_v24, %v5306_v1 }
 0x700   : > { %v2315_v44 = vpop.f32.mrf.mxu1 }
 0x701   : > { %v2377_v37 = vpop.f32.mrf.mxu3 }
 0x702   : > { %v5308_v14 = vadd.f32 %v2377_v37, %v2312_v28 }
 0x703   : > { %3687 = vmatmul.msk.bf16.gmra.mxu1 %vm1792_vm4, %v3004_v34  ;;  %v3856_v34 = vld [vmem:[%s3981_s20 + $0x38] sm:$0xff]  ;;  %v2471_v17 = vpop.f32.mrf.mxu2  ;;  %v5333_v49 = vpop.f32.mrf.mxu0 }
 0x704   : > { %v3102_v5 = vpack.c.bf16 %v3856_v34, %v3855_v4  ;;  %v2487_v24 = vadd.f32 %v2471_v17, %v5308_v14 }
 0x706   : > { %3699 = vmatmul.msk.bf16.gmra.mxu3 %vm5579_vm1, %v3101_v53 }
 0x708   : > { %v2317_v25 = vpop.f32.mrf.mxu1 }
 0x709   : > { %v2380_v29 = vpop.f32.mrf.mxu3 }
 0x70a   : > { %v5317_v42 = vadd.f32 %v2380_v29, %v2315_v44  ;;  %v2485_v44 = vadd.f32 %v2466_v12, %v5297_v51  ;;  %v5374_v51 = vld [vmem:[%s5454_s15] ss:$0 sm:$0xff]  ;;  %v2588_v12 = vadd.f32 %v2571_v38, %v2486_v22 }
 0x70b   : > { %v5331_v10 = vpop.f32.mrf.mxu2  ;;  %v5337_v50 = vpop.f32.mrf.mxu0 }
 0x70c   : > { %v2587_v45 = vadd.f32 %v2568_v39, %v2485_v44  ;;  %v2488_v14 = vadd.f32 %v5331_v10, %v5317_v42 }
 0x710   : > { %v2320_v0 = vpop.f32.mrf.mxu1 }
 0x711   : > { %v2382_v15 = vpop.f32.mrf.mxu3 }
 0x712   : > { %v5321_v8 = vadd.f32 %v2382_v15, %v2317_v25 }
 0x713   : > { %3688 = vmatmul.msk.bf16.gmra.mxu1 %vm1792_vm4, %v3005_v7  ;;  %v5335_v18 = vpop.f32.mrf.mxu2  ;;  %v5341_v11 = vpop.f32.mrf.mxu0 }
 0x714   : > { %v2489_v42 = vadd.f32 %v5335_v18, %v5321_v8 }
 0x716   : > { %3700 = vmatmul.msk.bf16.gmra.mxu3 %vm5580_vm2, %v3102_v5 }
 0x718   : > { %v2322_v35 = vpop.f32.mrf.mxu1 }
 0x719   : > { %v2385_v60 = vpop.f32.mrf.mxu3 }
 0x71a   : > { %v5327_v27 = vadd.f32 %v2385_v60, %v2320_v0  ;;  %v5369_v0 = vld [vmem:[%s5452_s13] ss:$0 sm:$0xff] }
 0x71b   : > { %v5339_v48 = vpop.f32.mrf.mxu2  ;;  %v5351_v40 = vpop.f32.mrf.mxu0 }
 0x720   : > { %v2660_v21 = vpop.f32.mrf.mxu1 }
 0x721   : > { %v2387_v57 = vpop.f32.mrf.mxu3  ;;  %v2680_v28 = vadd.f32 %v2660_v21, %v2586_v6 }
 0x722   : > { %v5329_v46 = vadd.f32 %v2387_v57, %v2322_v35 }
 0x723   : > { %v5345_v32 = vpop.f32.mrf.mxu2  ;;  %v2958_v3 = vpop.f32.mrf.mxu0 }
 0x728   : > { %v2662_v47 = vpop.f32.mrf.mxu1 }
 0x729   : > { %v2762_v56 = vpop.f32.mrf.mxu3  ;;  %v2681_v30 = vadd.f32 %v2662_v47, %v2587_v45  ;;  %v2589_v47 = vadd.f32 %v2573_v41, %v2487_v24  ;;  %v2590_v41 = vadd.f32 %v5333_v49, %v2488_v14  ;;  %v2591_v49 = vadd.f32 %v5337_v50, %v2489_v42 }
 0x72a   : > { %v2782_v37 = vadd.f32 %v2762_v56, %v2680_v28 }
 0x72b   : > { %v2864_v20 = vpop.f32.mrf.mxu2  ;;  %v2960_v52 = vpop.f32.mrf.mxu0 }
 0x72c   : > { %v2884_v53 = vadd.f32 %v2864_v20, %v2782_v37 }
 0x72e   : > { %v2978_v26 = vadd.f32 %v2958_v3, %v2884_v53 }
 0x730   : > { %v2665_v16 = vpop.f32.mrf.mxu1 }
 0x731   : > { %v2764_v58 = vpop.f32.mrf.mxu3  ;;  %v2682_v1 = vadd.f32 %v2665_v16, %v2588_v12 }
 0x732   : > { %v2783_v33 = vadd.f32 %v2764_v58, %v2681_v30 }
 0x733   : > { %v2866_v62 = vpop.f32.mrf.mxu2  ;;  %v2963_v15 = vpop.f32.mrf.mxu0 }
 0x734   : > { %v2885_v39 = vadd.f32 %v2866_v62, %v2783_v33 }
 0x736   : > { %v2979_v38 = vadd.f32 %v2960_v52, %v2885_v39 }
 0x738   : > { %v2667_v13 = vpop.f32.mrf.mxu1 }
 0x739   : > { %v2767_v23 = vpop.f32.mrf.mxu3  ;;  %v2683_v20 = vadd.f32 %v2667_v13, %v2589_v47 }
 0x73a   : > { %v2784_v35 = vadd.f32 %v2767_v23, %v2682_v1 }
 0x73b   : > { %v2869_v9 = vpop.f32.mrf.mxu2  ;;  %v2965_v54 = vpop.f32.mrf.mxu0 }
 0x73c   : > { %v2886_v56 = vadd.f32 %v2869_v9, %v2784_v35 }
 0x73e   : > { %v2980_v23 = vadd.f32 %v2963_v15, %v2886_v56 }
 0x740   : > { %v5343_v63 = vpop.f32.mrf.mxu1 }
 0x741   : > { %v2769_v36 = vpop.f32.mrf.mxu3  ;;  %v2684_v45 = vadd.f32 %v5343_v63, %v2590_v41 }
 0x742   : > { %v2785_v17 = vadd.f32 %v2769_v36, %v2683_v20 }
 0x743   : > { %v2871_v57 = vpop.f32.mrf.mxu2  ;;  %v2968_v10 = vpop.f32.mrf.mxu0 }
 0x744   : > { %v2887_v44 = vadd.f32 %v2871_v57, %v2785_v17 }
 0x746   : > { %v2981_v30 = vadd.f32 %v2965_v54, %v2887_v44 }
 0x748   : > { %v5347_v43 = vpop.f32.mrf.mxu1 }
 0x749   : > { %v5349_v59 = vpop.f32.mrf.mxu3 }
 0x74a   : > { %v2786_v36 = vadd.f32 %v5349_v59, %v2684_v45  ;;  %v2490_v59 = vadd.f32 %v5339_v48, %v5327_v27  ;;  %v2491_v48 = vadd.f32 %v5345_v32, %v5329_v46 }
 0x74b   : > { %v2874_v37 = vpop.f32.mrf.mxu2 }
 0x74c   : > { %v2888_v9 = vadd.f32 %v2874_v37, %v2786_v36  ;;  %v2592_v1 = vadd.f32 %v5341_v11, %v2490_v59  ;;  %v2593_v47 = vadd.f32 %v5351_v40, %v2491_v48 }
 0x74e   : > { %v2982_v15 = vadd.f32 %v2968_v10, %v2888_v9 }
 0x750   : > { %v5353_v2 = vpop.f32.mrf.mxu1 }
 0x751   : > { %v5355_v19 = vpop.f32.mrf.mxu3  ;;  %v2686_v24 = vadd.f32 %v5353_v2, %v2592_v1 }
 0x753   : > { %v2876_v18 = vpop.f32.mrf.mxu2 }
 0x758   : > { %v5358_v55 = vpop.f32.mrf.mxu1 }
 0x759   : > { %v5360_v61 = vpop.f32.mrf.mxu3 }
 0x75b   : > { %v2879_v57 = vpop.f32.mrf.mxu2 }
 0x760   : > { %v3060_v29 = vpop.f32.mrf.mxu1 }
 0x761   : > { %v5363_v25 = vpop.f32.mrf.mxu3  ;;  %v3080_v31 = vadd.f32 %v3060_v29, %v2978_v26 }
 0x763   : > { %v3091_v34 = vadd.f32 %v5369_v0, %v3080_v31  ;;  %v2685_v31 = vadd.f32 %v5347_v43, %v2591_v49 }
 0x765   : > { %v2787_v39 = vadd.f32 %v5355_v19, %v2685_v31  ;;  %v2788_v19 = vadd.f32 %v5360_v61, %v2686_v24 }
 0x767   : > { %v2889_v43 = vadd.f32 %v2876_v18, %v2787_v39  ;;  %v2890_v2 = vadd.f32 %v2879_v57, %v2788_v19 }
 0x768   : > { %v3062_v7 = vpop.f32.mrf.mxu1 }
 0x769   : > { %v3144_v4 = vpop.f32.mrf.mxu3  ;;  %v3081_v21 = vadd.f32 %v3062_v7, %v2979_v38 }
 0x76a   : > { %v3145_v5 = vadd.f32 %v5374_v51, %v3144_v4  ;;  %v2970_v4 = vpop.f32.mrf.mxu0 }
 0x76b   : > { %v3092_v3 = vadd.f32 %v5369_v0, %v3081_v21  ;;  %v2983_v38 = vadd.f32 %v2970_v4, %v2889_v43 }
 0x76c   : > { %v3164_v60 = vadd.f32 %v3145_v5, %v3091_v34 }
 0x76e   : > { %3172 = vst.msk [vmem:[%s5383_s26] sm:$0xff] %vm1792_vm4, %v3164_v60 }
 0x770   : > { %v3065_v16 = vpop.f32.mrf.mxu1 }
 0x771   : > { %v3146_v58 = vpop.f32.mrf.mxu3  ;;  %v3082_v62 = vadd.f32 %v3065_v16, %v2980_v23 }
 0x772   : > { %v3147_v6 = vadd.f32 %v5374_v51, %v3146_v58  ;;  %v2973_v11 = vpop.f32.mrf.mxu0  ;;  %v2687_v58 = vadd.f32 %v5358_v55, %v2593_v47 }
 0x773   : > { %v3093_v53 = vadd.f32 %v5369_v0, %v3082_v62  ;;  %v2984_v61 = vadd.f32 %v2973_v11, %v2890_v2 }
 0x774   : > { %v3165_v28 = vadd.f32 %v3147_v6, %v3092_v3  ;;  %v2789_v32 = vadd.f32 %v5363_v25, %v2687_v58  ;;  %v2881_v6 = vpop.f32.mrf.mxu2 }
 0x776   : > { %3173 = vst.msk [vmem:[%s5383_s26 + $0x8] sm:$0xff] %vm1792_vm4, %v3165_v28  ;;  %v2891_v40 = vadd.f32 %v2881_v6, %v2789_v32 }
 0x778   : > { %v3067_v13 = vpop.f32.mrf.mxu1 }
 0x779   : > { %v3149_v52 = vpop.f32.mrf.mxu3  ;;  %v3083_v33 = vadd.f32 %v3067_v13, %v2981_v30 }
 0x77a   : > { %v3150_v29 = vadd.f32 %v5374_v51, %v3149_v52  ;;  %v2975_v23 = vpop.f32.mrf.mxu0 }
 0x77b   : > { %v3094_v12 = vadd.f32 %v5369_v0, %v3083_v33  ;;  %v2985_v62 = vadd.f32 %v2975_v23, %v2891_v40 }
 0x77c   : > { %v3166_v22 = vadd.f32 %v3150_v29, %v3093_v53 }
 0x77e   : > { %3174 = vst.msk [vmem:[%s5383_s26 + $0x10] sm:$0xff] %vm1792_vm4, %v3166_v22 }
 0x780   : > { %v3070_v63 = vpop.f32.mrf.mxu1 }
 0x781   : > { %v3151_v26 = vpop.f32.mrf.mxu3  ;;  %v3084_v50 = vadd.f32 %v3070_v63, %v2982_v15 }
 0x782   : > { %v3152_v8 = vadd.f32 %v5374_v51, %v3151_v26 }
 0x783   : > { %v3095_v35 = vadd.f32 %v5369_v0, %v3084_v50 }
 0x784   : > { %v3167_v7 = vadd.f32 %v3152_v8, %v3094_v12 }
 0x786   : > { %3175 = vst.msk [vmem:[%s5383_s26 + $0x18] sm:$0xff] %vm1792_vm4, %v3167_v7 }
 0x788   : > { %v3072_v34 = vpop.f32.mrf.mxu1 }
 0x789   : > { %v3154_v5 = vpop.f32.mrf.mxu3  ;;  %v3085_v21 = vadd.f32 %v3072_v34, %v2983_v38 }
 0x78a   : > { %v3155_v27 = vadd.f32 %v5374_v51, %v3154_v5 }
 0x78b   : > { %v3096_v20 = vadd.f32 %v5369_v0, %v3085_v21 }
 0x78c   : > { %v3168_v60 = vadd.f32 %v3155_v27, %v3095_v35 }
 0x78e   : > { %3176 = vst.msk [vmem:[%s5383_s26 + $0x20] sm:$0xff] %vm1792_vm4, %v3168_v60 }
 0x790   : > { %v3075_v56 = vpop.f32.mrf.mxu1 }
 0x791   : > { %v3156_v16 = vpop.f32.mrf.mxu3  ;;  %v3086_v3 = vadd.f32 %v3075_v56, %v2984_v61 }
 0x792   : > { %v3157_v46 = vadd.f32 %v5374_v51, %v3156_v16 }
 0x793   : > { %v3097_v17 = vadd.f32 %v5369_v0, %v3086_v3 }
 0x794   : > { %v3169_v54 = vadd.f32 %v3157_v46, %v3096_v20 }
 0x796   : > { %3177 = vst.msk [vmem:[%s5383_s26 + $0x28] sm:$0xff] %vm1792_vm4, %v3169_v54 }
 0x798   : > { %v3077_v28 = vpop.f32.mrf.mxu1 }
 0x799   : > { %v3159_v14 = vpop.f32.mrf.mxu3  ;;  %v3087_v44 = vadd.f32 %v3077_v28, %v2985_v62 }
 0x79a   : > { %v3160_v55 = vadd.f32 %v5374_v51, %v3159_v14 }
 0x79b   : > { %v3098_v37 = vadd.f32 %v5369_v0, %v3087_v44 }
 0x79c   : > { %v3170_v41 = vadd.f32 %v3160_v55, %v3097_v17 }
 0x79e   : > { %3178 = vst.msk [vmem:[%s5383_s26 + $0x30] sm:$0xff] %vm1792_vm4, %v3170_v41 }
 0x7a1   : > { %v3161_v25 = vpop.f32.mrf.mxu3 }
 0x7a2   : > { %v3162_v13 = vadd.f32 %v5374_v51, %v3161_v25 }
 0x7a4   : > { %v3171_v52 = vadd.f32 %v3162_v13, %v3098_v37 }
 0x7a6   : > { %3179 = vst.msk [vmem:[%s5383_s26 + $0x38] sm:$0xff] %vm1792_vm4, %v3171_v52 }
 0x7a7 PF: > { %s26_s21 = sadd.s32 1, %s3863_s21  }
 0x7a8   : > { %p23_p4 = scmp.ge.s32.totalorder %s26_s21, 4  }
 0x7aa   :  { %25 = sbr.rel (!%p23_p4) target bundleno = 2 (0x2), region = 133 }

</bundles_post_ra>
